<compile_context>
chip_gen: v7x
topology: tpu7x:2x2x1
jax: 0.10.0
libtpu: 0.0.40
codegen_flags: <defaults>
</compile_context>

<pallas_src>
import jax
import jax.numpy as jnp
from jax.experimental import pallas as pl
from jax.experimental.pallas import tpu as pltpu

# Problem constants (batch = 1).
H = W = 14            # spatial size
CIN = 192             # conv input channels
COUT = 48             # conv output channels
KH = KW = 3           # kernel size
PW = 16               # padded row width (1 + 14 + 1)
M_OUT = PW * PW       # 256 output columns computed per channel (16x16 padded grid)
PH_PAD = 19           # padded rows kept: 1 (top) + 14 + 4 (bottom zero filler)
FLAT = PH_PAD * PW    # 304 >= M_OUT - 1 + max tap offset (255 + 34 = 289)


def conv3x3_kernel(x_ref, w_ref, o_ref):
    """3x3 'same' conv as 9 shifted (COUT,CIN)x(CIN,M_OUT) MXU matmuls.

    x_ref: (CIN, FLAT)    channel-major, spatially zero-padded, flattened input
    w_ref: (9, COUT, CIN) per-tap weight matrices
    o_ref: (COUT, M_OUT)  channel-major, fully lane-dense output (16x16 grid)
    """
    acc = jnp.dot(w_ref[0], x_ref[:, 0:M_OUT],
                  preferred_element_type=jnp.float32)
    for idx in range(1, KH * KW):          # statically unrolled 3x3 taps
        kh, kw = idx // KW, idx % KW
        off = kh * PW + kw                 # flat spatial offset of tap (kh, kw)
        acc = acc + jnp.dot(w_ref[idx], x_ref[:, off:off + M_OUT],
                            preferred_element_type=jnp.float32)
    o_ref[...] = acc                       # (48, 256): unmasked, lane-dense stores


def prepare_conv_weight(w_oihw):
    """OIHW (COUT, CIN, 3, 3) -> (9, COUT, CIN); call once, outside the hot path."""
    return jnp.transpose(w_oihw, (2, 3, 0, 1)).reshape(KH * KW, COUT, CIN)


def conv3x3_pallas(x_nchw, w9):
    """x_nchw: (1, CIN, 14, 14) f32; w9: (9, COUT, CIN) f32 -> (1, COUT, 14, 14)."""
    # TODO(synk): batch > 1 would need a leading 'parallel' grid axis.
    assert x_nchw.shape == (1, CIN, H, W), x_nchw.shape

    # Single remaining pre-kernel XLA op: channel-major spatial zero pad
    # (192,14,14) -> (192,19,16); the reshapes around it are free.
    xpad = jnp.pad(x_nchw.reshape(CIN, H, W),
                   ((0, 0), (1, PH_PAD - 1 - H), (1, PW - 1 - W)))
    xflat = xpad.reshape(CIN, FLAT)                                  # (192, 304)

    out = pl.pallas_call(
        conv3x3_kernel,
        out_shape=jax.ShapeDtypeStruct((COUT, M_OUT), jnp.float32),
        in_specs=[pl.BlockSpec(memory_space=pltpu.MemorySpace.VMEM),
                  pl.BlockSpec(memory_space=pltpu.MemorySpace.VMEM)],
        out_specs=pl.BlockSpec(memory_space=pltpu.MemorySpace.VMEM),
    )(xflat, w9)

    # (48, 256) on the 16x16 padded grid -> crop the valid 14x14 window.
    # Under jit this slice fuses into the downstream concatenate.
    return out.reshape(COUT, PW, PW)[:, :H, :W].reshape(1, COUT, H, W)


@jax.jit
def forward(x230, x140, x147, x154, x161, x168, x175, x182, x189,
            x196, x203, x210, x217, x224, x238, w9):
    x231 = conv3x3_pallas(x230, w9)
    # Channel concat stays in XLA; the conv output crop fuses into it.
    x239 = jnp.concatenate(
        [x140, x147, x154, x161, x168, x175, x182, x189, x196,
         x203, x210, x217, x224, x231, x238], axis=1)
    return x239


if __name__ == "__main__":
    key = jax.random.PRNGKey(0)
    keys = jax.random.split(key, 16)

    x230 = jax.random.normal(keys[0], (1, 192, 14, 14), dtype=jnp.float32)
    x140 = jax.random.normal(keys[1], (1, 384, 14, 14), dtype=jnp.float32)
    xs48 = [jax.random.normal(keys[2 + i], (1, 48, 14, 14), dtype=jnp.float32)
            for i in range(13)]
    (x147, x154, x161, x168, x175, x182, x189,
     x196, x203, x210, x217, x224, x238) = xs48

    # Deterministic conv weight (Kaiming-like scaling), shape (48, 192, 3, 3).
    fan_in = CIN * KH * KW
    conv_w = jax.random.normal(keys[15], (COUT, CIN, KH, KW),
                               dtype=jnp.float32) * (2.0 / fan_in) ** 0.5
    w9 = prepare_conv_weight(conv_w)   # hoisted: done once, not per forward call

    out = forward(x230, x140, x147, x154, x161, x168, x175, x182, x189,
                  x196, x203, x210, x217, x224, x238, w9)
    out = jax.block_until_ready(out)

    assert out.shape == (1, 1056, 14, 14), out.shape

    # Reference check of the Pallas conv against XLA's conv.
    ref_conv = jax.lax.conv_general_dilated(
        x230, conv_w, window_strides=(1, 1), padding=((1, 1), (1, 1)),
        dimension_numbers=("NCHW", "OIHW", "NCHW"))
    pallas_conv = out[:, 384 + 12 * 48: 384 + 13 * 48]
    assert jnp.allclose(pallas_conv, ref_conv, atol=1e-4, rtol=1e-4)

    print("KERNEL_OK")
</pallas_src>

<mosaic_0001>
module attributes {stable_mosaic.version = 11 : i64} {
  func.func @conv3x3_kernel(%arg0: memref<192x304xf32, #tpu.memory_space<vmem>>, %arg1: memref<9x48x192xf32, #tpu.memory_space<vmem>>, %arg2: memref<48x256xf32, #tpu.memory_space<vmem>>) attributes {dimension_semantics = [], scalar_prefetch = 0 : i64, scratch_operands = 0 : i64, tpu.core_type = #tpu.core_type<tc>} {
    %c0 = arith.constant 0 : index
    %c0_0 = arith.constant 0 : index
    %c0_1 = arith.constant 0 : index
    %0 = vector.load %arg1[%c0, %c0_0, %c0_1] : memref<9x48x192xf32, #tpu.memory_space<vmem>>, vector<1x48x192xf32>
    %1 = vector.shape_cast %0 : vector<1x48x192xf32> to vector<48x192xf32>
    %c0_2 = arith.constant 0 : index
    %c0_3 = arith.constant 0 : index
    %2 = vector.load %arg0[%c0_2, %c0_3] : memref<192x304xf32, #tpu.memory_space<vmem>>, vector<192x256xf32>
    %cst = arith.constant dense<0.000000e+00> : vector<48x256xf32>
    %3 = tpu.matmul %1, %2, %cst {dimension_numbers = #tpu.dot_dimension_numbers<[1], [0], [0], [1], [0, 0, 1, 1], [], []>} : vector<48x192xf32>, vector<192x256xf32>, vector<48x256xf32> -> vector<48x256xf32>
    %c1 = arith.constant 1 : index
    %c0_4 = arith.constant 0 : index
    %c0_5 = arith.constant 0 : index
    %4 = vector.load %arg1[%c1, %c0_4, %c0_5] : memref<9x48x192xf32, #tpu.memory_space<vmem>>, vector<1x48x192xf32>
    %5 = vector.shape_cast %4 : vector<1x48x192xf32> to vector<48x192xf32>
    %c0_6 = arith.constant 0 : index
    %c1_7 = arith.constant 1 : index
    %6 = vector.load %arg0[%c0_6, %c1_7] : memref<192x304xf32, #tpu.memory_space<vmem>>, vector<192x256xf32>
    %cst_8 = arith.constant dense<0.000000e+00> : vector<48x256xf32>
    %7 = tpu.matmul %5, %6, %cst_8 {dimension_numbers = #tpu.dot_dimension_numbers<[1], [0], [0], [1], [0, 0, 1, 1], [], []>} : vector<48x192xf32>, vector<192x256xf32>, vector<48x256xf32> -> vector<48x256xf32>
    %8 = arith.addf %3, %7 : vector<48x256xf32>
    %c2 = arith.constant 2 : index
    %c0_9 = arith.constant 0 : index
    %c0_10 = arith.constant 0 : index
    %9 = vector.load %arg1[%c2, %c0_9, %c0_10] : memref<9x48x192xf32, #tpu.memory_space<vmem>>, vector<1x48x192xf32>
    %10 = vector.shape_cast %9 : vector<1x48x192xf32> to vector<48x192xf32>
    %c0_11 = arith.constant 0 : index
    %c2_12 = arith.constant 2 : index
    %11 = vector.load %arg0[%c0_11, %c2_12] : memref<192x304xf32, #tpu.memory_space<vmem>>, vector<192x256xf32>
    %cst_13 = arith.constant dense<0.000000e+00> : vector<48x256xf32>
    %12 = tpu.matmul %10, %11, %cst_13 {dimension_numbers = #tpu.dot_dimension_numbers<[1], [0], [0], [1], [0, 0, 1, 1], [], []>} : vector<48x192xf32>, vector<192x256xf32>, vector<48x256xf32> -> vector<48x256xf32>
    %13 = arith.addf %8, %12 : vector<48x256xf32>
    %c3 = arith.constant 3 : index
    %c0_14 = arith.constant 0 : index
    %c0_15 = arith.constant 0 : index
    %14 = vector.load %arg1[%c3, %c0_14, %c0_15] : memref<9x48x192xf32, #tpu.memory_space<vmem>>, vector<1x48x192xf32>
    %15 = vector.shape_cast %14 : vector<1x48x192xf32> to vector<48x192xf32>
    %c0_16 = arith.constant 0 : index
    %c16 = arith.constant 16 : index
    %16 = vector.load %arg0[%c0_16, %c16] : memref<192x304xf32, #tpu.memory_space<vmem>>, vector<192x256xf32>
    %cst_17 = arith.constant dense<0.000000e+00> : vector<48x256xf32>
    %17 = tpu.matmul %15, %16, %cst_17 {dimension_numbers = #tpu.dot_dimension_numbers<[1], [0], [0], [1], [0, 0, 1, 1], [], []>} : vector<48x192xf32>, vector<192x256xf32>, vector<48x256xf32> -> vector<48x256xf32>
    %18 = arith.addf %13, %17 : vector<48x256xf32>
    %c4 = arith.constant 4 : index
    %c0_18 = arith.constant 0 : index
    %c0_19 = arith.constant 0 : index
    %19 = vector.load %arg1[%c4, %c0_18, %c0_19] : memref<9x48x192xf32, #tpu.memory_space<vmem>>, vector<1x48x192xf32>
    %20 = vector.shape_cast %19 : vector<1x48x192xf32> to vector<48x192xf32>
    %c0_20 = arith.constant 0 : index
    %c17 = arith.constant 17 : index
    %21 = vector.load %arg0[%c0_20, %c17] : memref<192x304xf32, #tpu.memory_space<vmem>>, vector<192x256xf32>
    %cst_21 = arith.constant dense<0.000000e+00> : vector<48x256xf32>
    %22 = tpu.matmul %20, %21, %cst_21 {dimension_numbers = #tpu.dot_dimension_numbers<[1], [0], [0], [1], [0, 0, 1, 1], [], []>} : vector<48x192xf32>, vector<192x256xf32>, vector<48x256xf32> -> vector<48x256xf32>
    %23 = arith.addf %18, %22 : vector<48x256xf32>
    %c5 = arith.constant 5 : index
    %c0_22 = arith.constant 0 : index
    %c0_23 = arith.constant 0 : index
    %24 = vector.load %arg1[%c5, %c0_22, %c0_23] : memref<9x48x192xf32, #tpu.memory_space<vmem>>, vector<1x48x192xf32>
    %25 = vector.shape_cast %24 : vector<1x48x192xf32> to vector<48x192xf32>
    %c0_24 = arith.constant 0 : index
    %c18 = arith.constant 18 : index
    %26 = vector.load %arg0[%c0_24, %c18] : memref<192x304xf32, #tpu.memory_space<vmem>>, vector<192x256xf32>
    %cst_25 = arith.constant dense<0.000000e+00> : vector<48x256xf32>
    %27 = tpu.matmul %25, %26, %cst_25 {dimension_numbers = #tpu.dot_dimension_numbers<[1], [0], [0], [1], [0, 0, 1, 1], [], []>} : vector<48x192xf32>, vector<192x256xf32>, vector<48x256xf32> -> vector<48x256xf32>
    %28 = arith.addf %23, %27 : vector<48x256xf32>
    %c6 = arith.constant 6 : index
    %c0_26 = arith.constant 0 : index
    %c0_27 = arith.constant 0 : index
    %29 = vector.load %arg1[%c6, %c0_26, %c0_27] : memref<9x48x192xf32, #tpu.memory_space<vmem>>, vector<1x48x192xf32>
    %30 = vector.shape_cast %29 : vector<1x48x192xf32> to vector<48x192xf32>
    %c0_28 = arith.constant 0 : index
    %c32 = arith.constant 32 : index
    %31 = vector.load %arg0[%c0_28, %c32] : memref<192x304xf32, #tpu.memory_space<vmem>>, vector<192x256xf32>
    %cst_29 = arith.constant dense<0.000000e+00> : vector<48x256xf32>
    %32 = tpu.matmul %30, %31, %cst_29 {dimension_numbers = #tpu.dot_dimension_numbers<[1], [0], [0], [1], [0, 0, 1, 1], [], []>} : vector<48x192xf32>, vector<192x256xf32>, vector<48x256xf32> -> vector<48x256xf32>
    %33 = arith.addf %28, %32 : vector<48x256xf32>
    %c7 = arith.constant 7 : index
    %c0_30 = arith.constant 0 : index
    %c0_31 = arith.constant 0 : index
    %34 = vector.load %arg1[%c7, %c0_30, %c0_31] : memref<9x48x192xf32, #tpu.memory_space<vmem>>, vector<1x48x192xf32>
    %35 = vector.shape_cast %34 : vector<1x48x192xf32> to vector<48x192xf32>
    %c0_32 = arith.constant 0 : index
    %c33 = arith.constant 33 : index
    %36 = vector.load %arg0[%c0_32, %c33] : memref<192x304xf32, #tpu.memory_space<vmem>>, vector<192x256xf32>
    %cst_33 = arith.constant dense<0.000000e+00> : vector<48x256xf32>
    %37 = tpu.matmul %35, %36, %cst_33 {dimension_numbers = #tpu.dot_dimension_numbers<[1], [0], [0], [1], [0, 0, 1, 1], [], []>} : vector<48x192xf32>, vector<192x256xf32>, vector<48x256xf32> -> vector<48x256xf32>
    %38 = arith.addf %33, %37 : vector<48x256xf32>
    %c8 = arith.constant 8 : index
    %c0_34 = arith.constant 0 : index
    %c0_35 = arith.constant 0 : index
    %39 = vector.load %arg1[%c8, %c0_34, %c0_35] : memref<9x48x192xf32, #tpu.memory_space<vmem>>, vector<1x48x192xf32>
    %40 = vector.shape_cast %39 : vector<1x48x192xf32> to vector<48x192xf32>
    %c0_36 = arith.constant 0 : index
    %c34 = arith.constant 34 : index
    %41 = vector.load %arg0[%c0_36, %c34] : memref<192x304xf32, #tpu.memory_space<vmem>>, vector<192x256xf32>
    %cst_37 = arith.constant dense<0.000000e+00> : vector<48x256xf32>
    %42 = tpu.matmul %40, %41, %cst_37 {dimension_numbers = #tpu.dot_dimension_numbers<[1], [0], [0], [1], [0, 0, 1, 1], [], []>} : vector<48x192xf32>, vector<192x256xf32>, vector<48x256xf32> -> vector<48x256xf32>
    %43 = arith.addf %38, %42 : vector<48x256xf32>
    %c0_38 = arith.constant 0 : index
    %c0_39 = arith.constant 0 : index
    %44 = vector.load %arg2[%c0_38, %c0_39] : memref<48x256xf32, #tpu.memory_space<vmem>>, vector<48x256xf32>
    tpu.vector_store %arg2[%c0_38, %c0_39], %43 {strides = array<i32>} : memref<48x256xf32, #tpu.memory_space<vmem>>, vector<48x256xf32>,
    return
  }
}

</mosaic_0001>

<bundles_post_ra>
// kernel: forward.1
= control target key start
LH: loop header
LB: loop body
LE: loop exit
PB: predicated region body
PF: predicated region fallthrough
CT: control target
= control target key end

     0   :  { %s5737_s25 = smov 127   ;;  %vm421_vm0 = vcmask 523264   ;;  %s5738_s20 = smov 126   ;;  %vm324_vm1 = vcmask 1039360   ;;  %vm817_vm2 = vcmask 1031168   ;;  %vm1202_vm3 = vcmask 916480   ;;  %s8642_s0 = inlined_call_operand.vmem [shape: f32[192,304], index: 0, kind: input, shape index: {}]   ;;  %s8643_s1 = inlined_call_operand.vmem [shape: f32[9,48,192], index: 1, kind: input, shape index: {}]   ;;  %s8644_s2 = inlined_call_operand.vmem [shape: f32[48,256], index: 2, kind: output, shape index: {}]  }
   0x1   :  { %v5763_v0 = vld [vmem:[%s8642_s0 + $0x20] sm:$0xff]  ;;  %v85_v1 = vld [vmem:[%s8642_s0 + $0x28] sm:$0xff]  ;;  %v5784_v5 = vld [vmem:[%s8642_s0 + $0x30] sm:$0xff]  ;;  %vm1587_vm4 = vcmask 908288   ;;  %s5742_s15 = smov 96   ;;  %vm1972_vm5 = vcmask 900096  }
   0x2   :  { %v5771_v2 = vld [vmem:[%s8642_s0] sm:$0xff]  ;;  %v5774_v3 = vpack.i.bf16 %v85_v1, %v5763_v0  ;;  %v5779_v4 = vld [vmem:[%s8642_s0 + $0x8] sm:$0xff]  ;;  %v5789_v6 = vld [vmem:[%s8642_s0 + $0x38] sm:$0xff]  ;;  %s5743_s26 = smov 95   ;;  %vm2357_vm6 = vcmask 785408   ;;  %vm2742_vm7 = vcmask 777216  }
   0x3   :  { %v5793_v7 = vpack.i.bf16 %v5779_v4, %v5771_v2  ;;  %v5798_v8 = vld [vmem:[%s8642_s0 + $0x18] sm:$0xff]  ;;  %v84_v9 = vld [vmem:[%s8642_s0 + $0x10] sm:$0xff]  ;;  %v5807_v10 = vpack.i.bf16 %v5789_v6, %v5784_v5  ;;  %v5825_v14 = vld [vmem:[%s8642_s0 + $0x48] sm:$0xff]  ;;  %vm3127_vm8 = vcmask 769024  }
   0x4   :  { %4092 = vrot.lane.b32.xlu1 %v5774_v3, %s5737_s25  ;;  %v5812_v11 = vpack.i.bf16 %v5798_v8, %v84_v9  ;;  %v5817_v12 = vld [vmem:[%s8642_s0 + $0x50] sm:$0xff]  ;;  %v87_v13 = vld [vmem:[%s8642_s0 + $0x58] sm:$0xff]  ;;  %8689 = vst [vmem:[#allocation2_spill] sm:$0xff] %v5825_v14  ;;  %v86_v15 = vld [vmem:[%s8642_s0 + $0x40] sm:$0xff] }
   0x5   :  { %4082 = vrot.lane.b32.xlu0 %v5793_v7, %s5737_s25  ;;  %v5833_v16 = vpack.i.bf16 %v87_v13, %v5817_v12  ;;  %v5838_v17 = vpack.i.bf16 %v5825_v14, %v86_v15  ;;  %v5843_v18 = vld [vmem:[%s8642_s0 + $0x78] sm:$0xff]  ;;  %v88_v19 = vld [vmem:[%s8642_s0 + $0x70] sm:$0xff]  ;;  %v5851_v20 = vld [vmem:[%s8642_s0 + $0x60] sm:$0xff] }
   0x6   :  { %8690 = vst [vmem:[#allocation3_spill] sm:$0xff] %v5843_v18  ;;  %8691 = vst [vmem:[#allocation4_spill] sm:$0xff] %v5851_v20  ;;  %v5856_v21 = vld [vmem:[%s8642_s0 + $0x68] sm:$0xff]  ;;  %v5861_v22 = vpack.i.bf16 %v5843_v18, %v88_v19  ;;  %v5872_v24 = vld [vmem:[%s8642_s0 + $0x90] sm:$0xff] }
   0x7   :  { %8692 = vst [vmem:[#allocation5_spill] sm:$0xff] %v5856_v21  ;;  %v5867_v23 = vpack.i.bf16 %v5856_v21, %v5851_v20  ;;  %8693 = vst [vmem:[#allocation6_spill] sm:$0xff] %v5872_v24  ;;  %v5877_v25 = vld [vmem:[%s8642_s0 + $0x98] sm:$0xff]  ;;  %v5882_v26 = vld [vmem:[%s8642_s0 + $0x80] sm:$0xff] }
   0x8   :  { %4097 = vrot.lane.b32.xlu1 %v5807_v10, %s5737_s25  ;;  %8694 = vst [vmem:[#allocation7_spill] sm:$0xff] %v5877_v25  ;;  %8695 = vst [vmem:[#allocation8_spill] sm:$0xff] %v5882_v26  ;;  %v89_v27 = vld [vmem:[%s8642_s0 + $0x88] sm:$0xff]  ;;  %v5891_v28 = vpack.i.bf16 %v5877_v25, %v5872_v24  ;;  %v5901_v30 = vld [vmem:[%s8642_s0 + $0xb0] sm:$0xff] }
   0x9   :  { %4087 = vrot.lane.b32.xlu0 %v5812_v11, %s5737_s25  ;;  %v5896_v29 = vpack.i.bf16 %v89_v27, %v5882_v26  ;;  %8696 = vst [vmem:[#allocation9_spill] sm:$0xff] %v5901_v30  ;;  %v91_v31 = vld [vmem:[%s8642_s0 + $0xb8] sm:$0xff]  ;;  %v5909_v32 = vld [vmem:[%s8642_s0 + $0xa8] sm:$0xff]  ;;  %v90_v33 = vld [vmem:[%s8642_s0 + $0xa0] sm:$0xff] }
   0xa   :  { %8697 = vst [vmem:[#allocation10_spill] sm:$0xff] %v5909_v32  ;;  %v5917_v34 = vpack.i.bf16 %v91_v31, %v5901_v30  ;;  %v5922_v35 = vpack.i.bf16 %v5909_v32, %v90_v33  ;;  %v5927_v36 = vld [vmem:[%s8642_s0 + $0xd8] sm:$0xff]  ;;  %v92_v37 = vld [vmem:[%s8642_s0 + $0xd0] sm:$0xff]  ;;  %v5935_v38 = vld [vmem:[%s8642_s0 + $0xc0] sm:$0xff] }
   0xb   :  { %8698 = vst [vmem:[#allocation11_spill] sm:$0xff] %v5927_v36  ;;  %8699 = vst [vmem:[#allocation12_spill] sm:$0xff] %v5935_v38  ;;  %v5940_v39 = vld [vmem:[%s8642_s0 + $0xc8] sm:$0xff]  ;;  %v5945_v40 = vpack.i.bf16 %v5927_v36, %v92_v37  ;;  %v5956_v42 = vld [vmem:[%s8642_s0 + $0xf0] sm:$0xff] }
   0xc   :  { %4107 = vrot.lane.b32.xlu1 %v5833_v16, %s5737_s25  ;;  %8700 = vst [vmem:[#allocation13_spill] sm:$0xff] %v5940_v39  ;;  %v5951_v41 = vpack.i.bf16 %v5940_v39, %v5935_v38  ;;  %8701 = vst [vmem:[#allocation14_spill] sm:$0xff] %v5956_v42  ;;  %v5961_v43 = vld [vmem:[%s8642_s0 + $0xf8] sm:$0xff]  ;;  %v5966_v44 = vld [vmem:[%s8642_s0 + $0xe0] sm:$0xff] }
   0xd   :  { %4102 = vrot.lane.b32.xlu0 %v5838_v17, %s5737_s25  ;;  %8702 = vst [vmem:[#allocation15_spill] sm:$0xff] %v5961_v43  ;;  %8703 = vst [vmem:[#allocation16_spill] sm:$0xff] %v5966_v44  ;;  %v93_v45 = vld [vmem:[%s8642_s0 + $0xe8] sm:$0xff]  ;;  %v5975_v46 = vpack.i.bf16 %v5961_v43, %v5956_v42  ;;  %v5985_v48 = vld [vmem:[%s8642_s0 + $0x110] sm:$0xff] }
   0xe   :  { %v5980_v47 = vpack.i.bf16 %v93_v45, %v5966_v44  ;;  %8704 = vst [vmem:[#allocation17_spill] sm:$0xff] %v5985_v48  ;;  %v95_v49 = vld [vmem:[%s8642_s0 + $0x118] sm:$0xff]  ;;  %v5993_v50 = vld [vmem:[%s8642_s0 + $0x108] sm:$0xff]  ;;  %v94_v51 = vld [vmem:[%s8642_s0 + $0x100] sm:$0xff] }
   0xf   :  { %8705 = vst [vmem:[#allocation18_spill] sm:$0xff] %v5993_v50  ;;  %v6001_v52 = vpack.i.bf16 %v95_v49, %v5985_v48  ;;  %v6006_v53 = vpack.i.bf16 %v5993_v50, %v94_v51  ;;  %v6011_v54 = vld [vmem:[%s8642_s0 + $0x138] sm:$0xff]  ;;  %v96_v55 = vld [vmem:[%s8642_s0 + $0x130] sm:$0xff]  ;;  %v6019_v56 = vld [vmem:[%s8642_s0 + $0x120] sm:$0xff] }
  0x10   :  { %4117 = vrot.lane.b32.xlu1 %v5861_v22, %s5737_s25  ;;  %8706 = vst [vmem:[#allocation19_spill] sm:$0xff] %v6011_v54  ;;  %8707 = vst [vmem:[#allocation20_spill] sm:$0xff] %v6019_v56  ;;  %v6024_v57 = vld [vmem:[%s8642_s0 + $0x128] sm:$0xff]  ;;  %v6029_v58 = vpack.i.bf16 %v6011_v54, %v96_v55  ;;  %v6040_v60 = vld [vmem:[%s8642_s0 + $0x150] sm:$0xff] }
  0x11   :  { %4112 = vrot.lane.b32.xlu0 %v5867_v23, %s5737_s25  ;;  %8708 = vst [vmem:[#allocation21_spill] sm:$0xff] %v6024_v57  ;;  %v6035_v59 = vpack.i.bf16 %v6024_v57, %v6019_v56  ;;  %8709 = vst [vmem:[#allocation22_spill] sm:$0xff] %v6040_v60  ;;  %v6045_v61 = vld [vmem:[%s8642_s0 + $0x158] sm:$0xff]  ;;  %v6050_v62 = vld [vmem:[%s8642_s0 + $0x140] sm:$0xff] }
  0x12   :  { %8710 = vst [vmem:[#allocation23_spill] sm:$0xff] %v6045_v61  ;;  %8711 = vst [vmem:[#allocation24_spill] sm:$0xff] %v6050_v62  ;;  %v97_v63 = vld [vmem:[%s8642_s0 + $0x148] sm:$0xff]  ;;  %v6059_v1 = vpack.i.bf16 %v6045_v61, %v6040_v60  ;;  %v6069_v13 = vld [vmem:[%s8642_s0 + $0x170] sm:$0xff] }
  0x13   :  { %v6064_v9 = vpack.i.bf16 %v97_v63, %v6050_v62  ;;  %8712 = vst [vmem:[#allocation25_spill] sm:$0xff] %v6069_v13  ;;  %v99_v15 = vld [vmem:[%s8642_s0 + $0x178] sm:$0xff]  ;;  %v6077_v19 = vld [vmem:[%s8642_s0 + $0x168] sm:$0xff]  ;;  %v98_v27 = vld [vmem:[%s8642_s0 + $0x160] sm:$0xff] }
  0x14   :  { %4127 = vrot.lane.b32.xlu1 %v5891_v28, %s5737_s25  ;;  %8713 = vst [vmem:[#allocation26_spill] sm:$0xff] %v6077_v19  ;;  %v6085_v31 = vpack.i.bf16 %v99_v15, %v6069_v13  ;;  %v6090_v33 = vpack.i.bf16 %v6077_v19, %v98_v27  ;;  %v6095_v37 = vld [vmem:[%s8642_s0 + $0x198] sm:$0xff]  ;;  %v100_v45 = vld [vmem:[%s8642_s0 + $0x190] sm:$0xff]  ;;  %v6103_v49 = vld [vmem:[%s8642_s0 + $0x180] sm:$0xff] }
  0x15   :  { %4122 = vrot.lane.b32.xlu0 %v5896_v29, %s5737_s25  ;;  %8714 = vst [vmem:[#allocation27_spill] sm:$0xff] %v6095_v37  ;;  %8715 = vst [vmem:[#allocation28_spill] sm:$0xff] %v6103_v49  ;;  %v6108_v51 = vld [vmem:[%s8642_s0 + $0x188] sm:$0xff]  ;;  %v6113_v55 = vpack.i.bf16 %v6095_v37, %v100_v45  ;;  %v6124_v15 = vld [vmem:[%s8642_s0 + $0x1b0] sm:$0xff] }
  0x16   :  { %8716 = vst [vmem:[#allocation29_spill] sm:$0xff] %v6108_v51  ;;  %v6119_v63 = vpack.i.bf16 %v6108_v51, %v6103_v49  ;;  %8717 = vst [vmem:[#allocation30_spill] sm:$0xff] %v6124_v15  ;;  %v6129_v27 = vld [vmem:[%s8642_s0 + $0x1b8] sm:$0xff]  ;;  %v6134_v45 = vld [vmem:[%s8642_s0 + $0x1a0] sm:$0xff] }
  0x17   :  { %8718 = vst [vmem:[#allocation31_spill] sm:$0xff] %v6129_v27  ;;  %8719 = vst [vmem:[#allocation32_spill] sm:$0xff] %v6134_v45  ;;  %v101_v37 = vld [vmem:[%s8642_s0 + $0x1a8] sm:$0xff]  ;;  %v6143_v49 = vpack.i.bf16 %v6129_v27, %v6124_v15  ;;  %v6153_v19 = vld [vmem:[%s8642_s0 + $0x1d0] sm:$0xff] }
  0x18   :  { %4137 = vrot.lane.b32.xlu1 %v5917_v34, %s5737_s25  ;;  %v6148_v51 = vpack.i.bf16 %v101_v37, %v6134_v45  ;;  %8720 = vst [vmem:[#allocation33_spill] sm:$0xff] %v6153_v19  ;;  %v103_v60 = vld [vmem:[%s8642_s0 + $0x1d8] sm:$0xff]  ;;  %v6161_v15 = vld [vmem:[%s8642_s0 + $0x1c8] sm:$0xff]  ;;  %v102_v27 = vld [vmem:[%s8642_s0 + $0x1c0] sm:$0xff] }
  0x19   :  { %4132 = vrot.lane.b32.xlu0 %v5922_v35, %s5737_s25  ;;  %8721 = vst [vmem:[#allocation34_spill] sm:$0xff] %v6161_v15  ;;  %v6169_v37 = vpack.i.bf16 %v103_v60, %v6153_v19  ;;  %v6174_v45 = vpack.i.bf16 %v6161_v15, %v102_v27  ;;  %v6179_v13 = vld [vmem:[%s8642_s0 + $0x1f8] sm:$0xff]  ;;  %v104_v61 = vld [vmem:[%s8642_s0 + $0x1f0] sm:$0xff]  ;;  %v6187_v60 = vld [vmem:[%s8642_s0 + $0x1e0] sm:$0xff] }
  0x1a   :  { %8722 = vst [vmem:[#allocation35_spill] sm:$0xff] %v6179_v13  ;;  %8723 = vst [vmem:[#allocation36_spill] sm:$0xff] %v6187_v60  ;;  %v6192_v19 = vld [vmem:[%s8642_s0 + $0x1e8] sm:$0xff]  ;;  %v6197_v27 = vpack.i.bf16 %v6179_v13, %v104_v61  ;;  %v6208_v54 = vld [vmem:[%s8642_s0 + $0x210] sm:$0xff] }
  0x1b   :  { %8724 = vst [vmem:[#allocation37_spill] sm:$0xff] %v6192_v19  ;;  %v6203_v15 = vpack.i.bf16 %v6192_v19, %v6187_v60  ;;  %8725 = vst [vmem:[#allocation38_spill] sm:$0xff] %v6208_v54  ;;  %v6213_v56 = vld [vmem:[%s8642_s0 + $0x218] sm:$0xff]  ;;  %v6218_v61 = vld [vmem:[%s8642_s0 + $0x200] sm:$0xff] }
  0x1c   :  { %4147 = vrot.lane.b32.xlu1 %v5945_v40, %s5737_s25  ;;  %8726 = vst [vmem:[#allocation39_spill] sm:$0xff] %v6213_v56  ;;  %8727 = vst [vmem:[#allocation40_spill] sm:$0xff] %v6218_v61  ;;  %v105_v13 = vld [vmem:[%s8642_s0 + $0x208] sm:$0xff]  ;;  %v6227_v60 = vpack.i.bf16 %v6213_v56, %v6208_v54  ;;  %v6237_v62 = vld [vmem:[%s8642_s0 + $0x230] sm:$0xff] }
  0x1d   :  { %4142 = vrot.lane.b32.xlu0 %v5951_v41, %s5737_s25  ;;  %v6232_v19 = vpack.i.bf16 %v105_v13, %v6218_v61  ;;  %8728 = vst [vmem:[#allocation41_spill] sm:$0xff] %v6237_v62  ;;  %v107_v57 = vld [vmem:[%s8642_s0 + $0x238] sm:$0xff]  ;;  %v6245_v54 = vld [vmem:[%s8642_s0 + $0x228] sm:$0xff]  ;;  %v106_v56 = vld [vmem:[%s8642_s0 + $0x220] sm:$0xff] }
  0x1e   :  { %8729 = vst [vmem:[#allocation42_spill] sm:$0xff] %v6245_v54  ;;  %v6253_v13 = vpack.i.bf16 %v107_v57, %v6237_v62  ;;  %v3372_v61 = vld [vmem:[%s8643_s1 + $0x68] sm:$0xff]  ;;  %v6261_v50 = vpack.i.bf16 %v6245_v54, %v106_v56 }
  0x1f   :  { %3383 = vmatprep.mubr.msk.f32.mxu1 %vm421_vm0, %v3372_v61 }
  0x20   :  { %4157 = vrot.lane.b32.xlu1 %v5975_v46, %s5737_s25 }
  0x21   :  { %4152 = vrot.lane.b32.xlu0 %v5980_v47, %s5737_s25 }
  0x24   :  { %4167 = vrot.lane.b32.xlu1 %v6001_v52, %s5737_s25 }
  0x25   :  { %4162 = vrot.lane.b32.xlu0 %v6006_v53, %s5737_s25 }
  0x28   :  { %4177 = vrot.lane.b32.xlu1 %v6029_v58, %s5737_s25 }
  0x29   :  { %4172 = vrot.lane.b32.xlu0 %v6035_v59, %s5737_s25 }
  0x2c   :  { %4187 = vrot.lane.b32.xlu1 %v6059_v1, %s5737_s25 }
  0x2d   :  { %4182 = vrot.lane.b32.xlu0 %v6064_v9, %s5737_s25 }
  0x30   :  { %4197 = vrot.lane.b32.xlu1 %v6085_v31, %s5737_s25 }
  0x31   :  { %4192 = vrot.lane.b32.xlu0 %v6090_v33, %s5737_s25 }
  0x34   :  { %4207 = vrot.lane.b32.xlu1 %v6113_v55, %s5737_s25 }
  0x35   :  { %4202 = vrot.lane.b32.xlu0 %v6119_v63, %s5737_s25 }
  0x38   :  { %4217 = vrot.lane.b32.xlu1 %v6143_v49, %s5737_s25 }
  0x39   :  { %4212 = vrot.lane.b32.xlu0 %v6148_v51, %s5737_s25 }
  0x3c   :  { %4227 = vrot.lane.b32.xlu1 %v6169_v37, %s5737_s25 }
  0x3d   :  { %4222 = vrot.lane.b32.xlu0 %v6174_v45, %s5737_s25 }
  0x40   :  { %4237 = vrot.lane.b32.xlu1 %v6197_v27, %s5737_s25 }
  0x41   :  { %4232 = vrot.lane.b32.xlu0 %v6203_v15, %s5737_s25 }
  0x44   :  { %4247 = vrot.lane.b32.xlu1 %v6227_v60, %s5737_s25 }
  0x45   :  { %4242 = vrot.lane.b32.xlu0 %v6232_v19, %s5737_s25 }
  0x48   :  { %4257 = vrot.lane.b32.xlu1 %v6253_v13, %s5737_s25 }
  0x49   :  { %4252 = vrot.lane.b32.xlu0 %v6261_v50, %s5737_s25  ;;  %s5739_s25 = smov 112  }
  0x4c   :  { %4267 = vrot.lane.b32.xlu1 %v5812_v11, %s5738_s20 }
  0x4d   :  { %4262 = vrot.lane.b32.xlu0 %v5793_v7, %s5738_s20 }
  0x50   :  { %4277 = vrot.lane.b32.xlu1 %v5807_v10, %s5738_s20 }
  0x51   :  { %4272 = vrot.lane.b32.xlu0 %v5774_v3, %s5738_s20 }
  0x54   :  { %4287 = vrot.lane.b32.xlu1 %v5833_v16, %s5738_s20 }
  0x55   :  { %4282 = vrot.lane.b32.xlu0 %v5838_v17, %s5738_s20 }
  0x58   :  { %4297 = vrot.lane.b32.xlu1 %v5861_v22, %s5738_s20 }
  0x59   :  { %4292 = vrot.lane.b32.xlu0 %v5867_v23, %s5738_s20 }
  0x5c   :  { %4307 = vrot.lane.b32.xlu1 %v5891_v28, %s5738_s20 }
  0x5d   :  { %4302 = vrot.lane.b32.xlu0 %v5896_v29, %s5738_s20 }
  0x60   :  { %4317 = vrot.lane.b32.xlu1 %v5917_v34, %s5738_s20 }
  0x61   :  { %4312 = vrot.lane.b32.xlu0 %v5922_v35, %s5738_s20 }
  0x64   :  { %4327 = vrot.lane.b32.xlu1 %v5945_v40, %s5738_s20 }
  0x65   :  { %4322 = vrot.lane.b32.xlu0 %v5951_v41, %s5738_s20 }
  0x68   :  { %4337 = vrot.lane.b32.xlu1 %v5975_v46, %s5738_s20 }
  0x69   :  { %4332 = vrot.lane.b32.xlu0 %v5980_v47, %s5738_s20 }
  0x6c   :  { %4347 = vrot.lane.b32.xlu1 %v6001_v52, %s5738_s20 }
  0x6d   :  { %4342 = vrot.lane.b32.xlu0 %v6006_v53, %s5738_s20 }
  0x70   :  { %4357 = vrot.lane.b32.xlu1 %v6029_v58, %s5738_s20 }
  0x71   :  { %4352 = vrot.lane.b32.xlu0 %v6035_v59, %s5738_s20 }
  0x74   :  { %4367 = vrot.lane.b32.xlu1 %v6059_v1, %s5738_s20 }
  0x75   :  { %4362 = vrot.lane.b32.xlu0 %v6064_v9, %s5738_s20 }
  0x76   :  { %v4093_v56 = vpop.permute.xlu1 %4092 }
  0x77   :  { %v4083_v57 = vpop.permute.xlu0 %4082  ;;  %v4095_v61 = vunpack.i.h.bf16 %v4093_v56  ;;  %v4094_v54 = vunpack.i.l.bf16 %v4093_v56 }
  0x78   :  { %4377 = vrot.lane.b32.xlu1 %v6085_v31, %s5738_s20  ;;  %v4085_v62 = vunpack.i.h.bf16 %v4083_v57  ;;  %v4084_v42 = vunpack.i.l.bf16 %v4083_v57 }
  0x79   :  { %4372 = vrot.lane.b32.xlu0 %v6090_v33, %s5738_s20  ;;  %v328_v44 = vsel %vm324_vm1, %v4094_v54, %v4095_v61 }
  0x7a   :  { %v4098_v48 = vpop.permute.xlu1 %4097  ;;  %v325_v56 = vsel %vm324_vm1, %v4084_v42, %v4085_v62 }
  0x7b   :  { %v4088_v43 = vpop.permute.xlu0 %4087  ;;  %v4100_v39 = vunpack.i.h.bf16 %v4098_v48  ;;  %v4099_v57 = vunpack.i.l.bf16 %v4098_v48 }
  0x7c   :  { %v4090_v36 = vunpack.i.h.bf16 %v4088_v43  ;;  %v4089_v38 = vunpack.i.l.bf16 %v4088_v43  ;;  %4387 = vrot.lane.b32.xlu1 %v6113_v55, %s5738_s20 }
  0x7d   :  { %4382 = vrot.lane.b32.xlu0 %v6119_v63, %s5738_s20 }
  0x7e   :  { %v4108_v32 = vpop.permute.xlu1 %4107  ;;  %v326_v24 = vsel %vm324_vm1, %v4085_v62, %v4089_v38  ;;  %v327_v30 = vsel %vm324_vm1, %v4090_v36, %v4094_v54 }
  0x7f   :  { %v4110_v25 = vunpack.i.h.bf16 %v4108_v32  ;;  %v4109_v18 = vunpack.i.l.bf16 %v4108_v32  ;;  %v4103_v43 = vpop.permute.xlu0 %4102  ;;  %v3521_v20 = vpack.c.bf16 %v328_v44, %v326_v24  ;;  %v3523_v26 = vpack.c.bf16 %v327_v30, %v325_v56 }
  0x80   :  { %v4105_v21 = vunpack.i.h.bf16 %v4103_v43  ;;  %v4104_v14 = vunpack.i.l.bf16 %v4103_v43  ;;  %4397 = vrot.lane.b32.xlu1 %v6143_v49, %s5738_s20  ;;  %v329_v32 = vsel %vm324_vm1, %v4099_v57, %v4100_v39 }
  0x81   :  { %4392 = vrot.lane.b32.xlu0 %v6148_v51, %s5738_s20  ;;  %3522 = vmatprep.subr.bf16.mxu1 %v3521_v20  ;;  %v332_v42 = vsel %vm324_vm1, %v4109_v18, %v4110_v25 }
  0x82   :  { %3524 = vmatpush1.bf16.msra.mxu1 %v3523_v26  ;;  %v4118_v38 = vpop.permute.xlu1 %4117  ;;  %v330_v36 = vsel %vm324_vm1, %v4100_v39, %v4104_v14  ;;  %v331_v24 = vsel %vm324_vm1, %v4105_v21, %v4109_v18 }
  0x83   :  { %v4113_v30 = vpop.permute.xlu0 %4112  ;;  %v3525_v44 = vpack.c.bf16 %v332_v42, %v330_v36  ;;  %v3527_v48 = vpack.c.bf16 %v331_v24, %v329_v32  ;;  %v4119_v54 = vunpack.i.l.bf16 %v4118_v38  ;;  %v4120_v25 = vunpack.i.h.bf16 %v4118_v38 }
  0x84   :  { %4407 = vrot.lane.b32.xlu1 %v6169_v37, %s5738_s20  ;;  %v4115_v62 = vunpack.i.h.bf16 %v4113_v30  ;;  %v4114_v61 = vunpack.i.l.bf16 %v4113_v30 }
  0x85   :  { %4402 = vrot.lane.b32.xlu0 %v6174_v45, %s5738_s20  ;;  %3526 = vmatprep.subr.bf16.mxu1 %v3525_v44 }
  0x86   :  { %3528 = vmatpush1.bf16.msra.mxu1 %v3527_v48  ;;  %v4128_v20 = vpop.permute.xlu1 %4127  ;;  %v334_v18 = vsel %vm324_vm1, %v4115_v62, %v4119_v54  ;;  %v333_v21 = vsel %vm324_vm1, %v4114_v61, %v4115_v62 }
  0x87   :  { %v4123_v14 = vpop.permute.xlu0 %4122  ;;  %v4130_v56 = vunpack.i.h.bf16 %v4128_v20  ;;  %v4129_v57 = vunpack.i.l.bf16 %v4128_v20 }
  0x88   :  { %v4125_v26 = vunpack.i.h.bf16 %v4123_v14  ;;  %v4124_v39 = vunpack.i.l.bf16 %v4123_v14  ;;  %4417 = vrot.lane.b32.xlu1 %v6197_v27, %s5738_s20 }
  0x89   :  { %4412 = vrot.lane.b32.xlu0 %v6203_v15, %s5738_s20  ;;  %v337_v20 = vsel %vm324_vm1, %v4129_v57, %v4130_v56 }
  0x8a   :  { %v4138_v43 = vpop.permute.xlu1 %4137  ;;  %v336_v42 = vsel %vm324_vm1, %v4124_v39, %v4125_v26  ;;  %v335_v36 = vsel %vm324_vm1, %v4120_v25, %v4124_v39 }
  0x8b   :  { %v4140_v38 = vunpack.i.h.bf16 %v4138_v43  ;;  %v4139_v32 = vunpack.i.l.bf16 %v4138_v43  ;;  %v4133_v24 = vpop.permute.xlu0 %4132  ;;  %v3529_v30 = vpack.c.bf16 %v336_v42, %v334_v18  ;;  %v3531_v44 = vpack.c.bf16 %v335_v36, %v333_v21 }
  0x8c   :  { %v4135_v48 = vunpack.i.h.bf16 %v4133_v24  ;;  %v4134_v14 = vunpack.i.l.bf16 %v4133_v24  ;;  %4427 = vrot.lane.b32.xlu1 %v6227_v60, %s5738_s20 }
  0x8d   :  { %4422 = vrot.lane.b32.xlu0 %v6232_v19, %s5738_s20  ;;  %3530 = vmatprep.subr.bf16.mxu1 %v3529_v30  ;;  %v340_v54 = vsel %vm324_vm1, %v4139_v32, %v4140_v38 }
  0x8e   :  { %3532 = vmatpush1.bf16.msra.mxu1 %v3531_v44  ;;  %v4148_v62 = vpop.permute.xlu1 %4147  ;;  %v338_v61 = vsel %vm324_vm1, %v4130_v56, %v4134_v14  ;;  %v339_v25 = vsel %vm324_vm1, %v4135_v48, %v4139_v32 }
  0x8f   :  { %v4143_v26 = vpop.permute.xlu0 %4142  ;;  %v3533_v39 = vpack.c.bf16 %v340_v54, %v338_v61  ;;  %v3535_v18 = vpack.c.bf16 %v339_v25, %v337_v20  ;;  %v4149_v21 = vunpack.i.l.bf16 %v4148_v62  ;;  %v4150_v24 = vunpack.i.h.bf16 %v4148_v62 }
  0x90   :  { %4437 = vrot.lane.b32.xlu1 %v6253_v13, %s5738_s20  ;;  %v4145_v43 = vunpack.i.h.bf16 %v4143_v26  ;;  %v4144_v42 = vunpack.i.l.bf16 %v4143_v26 }
  0x91   :  { %4432 = vrot.lane.b32.xlu0 %v6261_v50, %s5738_s20  ;;  %3534 = vmatprep.subr.bf16.mxu1 %v3533_v39 }
  0x92   :  { %3536 = vmatpush1.bf16.msra.mxu1 %v3535_v18  ;;  %v4158_v36 = vpop.permute.xlu1 %4157  ;;  %v342_v32 = vsel %vm324_vm1, %v4145_v43, %v4149_v21  ;;  %v341_v30 = vsel %vm324_vm1, %v4144_v42, %v4145_v43 }
  0x93   :  { %v4153_v38 = vpop.permute.xlu0 %4152  ;;  %v4160_v44 = vunpack.i.h.bf16 %v4158_v36  ;;  %v4159_v48 = vunpack.i.l.bf16 %v4158_v36 }
  0x94   :  { %v4155_v56 = vunpack.i.h.bf16 %v4153_v38  ;;  %v4154_v57 = vunpack.i.l.bf16 %v4153_v38  ;;  %4447 = vrot.lane.b32.xlu1 %v5812_v11, %s5739_s25 }
  0x95   :  { %4442 = vrot.lane.b32.xlu0 %v5793_v7, %s5739_s25  ;;  %v345_v42 = vsel %vm324_vm1, %v4159_v48, %v4160_v44 }
  0x96   :  { %v4168_v14 = vpop.permute.xlu1 %4167  ;;  %v344_v54 = vsel %vm324_vm1, %v4154_v57, %v4155_v56  ;;  %v343_v62 = vsel %vm324_vm1, %v4150_v24, %v4154_v57 }
  0x97   :  { %v4170_v61 = vunpack.i.h.bf16 %v4168_v14  ;;  %v4169_v20 = vunpack.i.l.bf16 %v4168_v14  ;;  %v4163_v25 = vpop.permute.xlu0 %4162  ;;  %v3537_v26 = vpack.c.bf16 %v344_v54, %v342_v32  ;;  %v3539_v39 = vpack.c.bf16 %v343_v62, %v341_v30 }
  0x98   :  { %v4165_v11 = vunpack.i.h.bf16 %v4163_v25  ;;  %v4164_v18 = vunpack.i.l.bf16 %v4163_v25  ;;  %4457 = vrot.lane.b32.xlu1 %v5807_v10, %s5739_s25 }
  0x99   :  { %4452 = vrot.lane.b32.xlu0 %v5774_v3, %s5739_s25  ;;  %3538 = vmatprep.subr.bf16.mxu1 %v3537_v26  ;;  %v348_v7 = vsel %vm324_vm1, %v4169_v20, %v4170_v61 }
  0x9a   :  { %3540 = vmatpush1.bf16.msra.mxu1 %v3539_v39  ;;  %v4178_v21 = vpop.permute.xlu1 %4177  ;;  %v346_v43 = vsel %vm324_vm1, %v4160_v44, %v4164_v18  ;;  %v347_v36 = vsel %vm324_vm1, %v4165_v11, %v4169_v20 }
  0x9b   :  { %v4173_v38 = vpop.permute.xlu0 %4172  ;;  %v3541_v24 = vpack.c.bf16 %v348_v7, %v346_v43  ;;  %v3543_v56 = vpack.c.bf16 %v347_v36, %v345_v42  ;;  %v4179_v10 = vunpack.i.l.bf16 %v4178_v21  ;;  %v4180_v14 = vunpack.i.h.bf16 %v4178_v21 }
  0x9c   :  { %4467 = vrot.lane.b32.xlu1 %v5833_v16, %s5739_s25  ;;  %v4175_v57 = vunpack.i.h.bf16 %v4173_v38  ;;  %v4174_v3 = vunpack.i.l.bf16 %v4173_v38 }
  0x9d   :  { %4462 = vrot.lane.b32.xlu0 %v5838_v17, %s5739_s25  ;;  %3542 = vmatprep.subr.bf16.mxu1 %v3541_v24 }
  0x9e   :  { %3544 = vmatpush1.bf16.msra.mxu1 %v3543_v56  ;;  %v4188_v32 = vpop.permute.xlu1 %4187  ;;  %v350_v16 = vsel %vm324_vm1, %v4175_v57, %v4179_v10  ;;  %v349_v54 = vsel %vm324_vm1, %v4174_v3, %v4175_v57 }
  0x9f   :  { %v4183_v30 = vpop.permute.xlu0 %4182  ;;  %v4190_v62 = vunpack.i.h.bf16 %v4188_v32  ;;  %v4189_v61 = vunpack.i.l.bf16 %v4188_v32 }
  0xa0   :  { %v4185_v44 = vunpack.i.h.bf16 %v4183_v30  ;;  %v4184_v48 = vunpack.i.l.bf16 %v4183_v30  ;;  %4477 = vrot.lane.b32.xlu1 %v5861_v22, %s5739_s25 }
  0xa1   :  { %4472 = vrot.lane.b32.xlu0 %v5867_v23, %s5739_s25  ;;  %v353_v36 = vsel %vm324_vm1, %v4189_v61, %v4190_v62 }
  0xa2   :  { %v4198_v17 = vpop.permute.xlu1 %4197  ;;  %v352_v20 = vsel %vm324_vm1, %v4184_v48, %v4185_v44  ;;  %v351_v25 = vsel %vm324_vm1, %v4180_v14, %v4184_v48 }
  0xa3   :  { %v4200_v26 = vunpack.i.h.bf16 %v4198_v17  ;;  %v4199_v39 = vunpack.i.l.bf16 %v4198_v17  ;;  %v4193_v11 = vpop.permute.xlu0 %4192  ;;  %v3545_v18 = vpack.c.bf16 %v352_v20, %v350_v16  ;;  %v3547_v7 = vpack.c.bf16 %v351_v25, %v349_v54 }
  0xa4   :  { %v4195_v22 = vunpack.i.h.bf16 %v4193_v11  ;;  %v4194_v21 = vunpack.i.l.bf16 %v4193_v11  ;;  %4487 = vrot.lane.b32.xlu1 %v5891_v28, %s5739_s25 }
  0xa5   :  { %4482 = vrot.lane.b32.xlu0 %v5896_v29, %s5739_s25  ;;  %3546 = vmatprep.subr.bf16.mxu1 %v3545_v18  ;;  %v356_v23 = vsel %vm324_vm1, %v4199_v39, %v4200_v26 }
  0xa6   :  { %3548 = vmatpush1.bf16.msra.mxu1 %v3547_v7  ;;  %v4208_v43 = vpop.permute.xlu1 %4207  ;;  %v354_v42 = vsel %vm324_vm1, %v4190_v62, %v4194_v21  ;;  %v355_v38 = vsel %vm324_vm1, %v4195_v22, %v4199_v39 }
  0xa7   :  { %v4203_v24 = vpop.permute.xlu0 %4202  ;;  %v3549_v56 = vpack.c.bf16 %v356_v23, %v354_v42  ;;  %v3551_v10 = vpack.c.bf16 %v355_v38, %v353_v36  ;;  %v4209_v28 = vunpack.i.l.bf16 %v4208_v43  ;;  %v4210_v30 = vunpack.i.h.bf16 %v4208_v43 }
  0xa8   :  { %4497 = vrot.lane.b32.xlu1 %v5917_v34, %s5739_s25  ;;  %v4205_v57 = vunpack.i.h.bf16 %v4203_v24  ;;  %v4204_v29 = vunpack.i.l.bf16 %v4203_v24 }
  0xa9   :  { %4492 = vrot.lane.b32.xlu0 %v5922_v35, %s5739_s25  ;;  %3550 = vmatprep.subr.bf16.mxu1 %v3549_v56 }
  0xaa   :  { %3552 = vmatpush1.bf16.msra.mxu1 %v3551_v10  ;;  %v4218_v3 = vpop.permute.xlu1 %4217  ;;  %v358_v34 = vsel %vm324_vm1, %v4205_v57, %v4209_v28  ;;  %v357_v48 = vsel %vm324_vm1, %v4204_v29, %v4205_v57 }
  0xab   :  { %v4213_v32 = vpop.permute.xlu0 %4212  ;;  %v4220_v16 = vunpack.i.h.bf16 %v4218_v3  ;;  %v4219_v54 = vunpack.i.l.bf16 %v4218_v3 }
  0xac   :  { %v4215_v14 = vunpack.i.h.bf16 %v4213_v32  ;;  %v4214_v44 = vunpack.i.l.bf16 %v4213_v32  ;;  %4507 = vrot.lane.b32.xlu1 %v5945_v40, %s5739_s25 }
  0xad   :  { %4502 = vrot.lane.b32.xlu0 %v5951_v41, %s5739_s25  ;;  %v361_v22 = vsel %vm324_vm1, %v4219_v54, %v4220_v16 }
  0xae   :  { %v4228_v35 = vpop.permute.xlu1 %4227  ;;  %v360_v62 = vsel %vm324_vm1, %v4214_v44, %v4215_v14  ;;  %v359_v61 = vsel %vm324_vm1, %v4210_v30, %v4214_v44 }
  0xaf   :  { %v4230_v17 = vunpack.i.h.bf16 %v4228_v35  ;;  %v4229_v20 = vunpack.i.l.bf16 %v4228_v35  ;;  %v4223_v25 = vpop.permute.xlu0 %4222  ;;  %v3553_v26 = vpack.c.bf16 %v360_v62, %v358_v34  ;;  %v3555_v39 = vpack.c.bf16 %v359_v61, %v357_v48 }
  0xb0   :  { %v4225_v40 = vunpack.i.h.bf16 %v4223_v25  ;;  %v4224_v11 = vunpack.i.l.bf16 %v4223_v25  ;;  %4517 = vrot.lane.b32.xlu1 %v5975_v46, %s5739_s25 }
  0xb1   :  { %4512 = vrot.lane.b32.xlu0 %v5980_v47, %s5739_s25  ;;  %3554 = vmatprep.subr.bf16.mxu1 %v3553_v26  ;;  %v364_v41 = vsel %vm324_vm1, %v4229_v20, %v4230_v17 }
  0xb2   :  { %3556 = vmatpush1.bf16.msra.mxu1 %v3555_v39  ;;  %v4238_v18 = vpop.permute.xlu1 %4237  ;;  %v362_v7 = vsel %vm324_vm1, %v4220_v16, %v4224_v11  ;;  %v363_v21 = vsel %vm324_vm1, %v4225_v40, %v4229_v20  ;;  %v3371_v39 = vld [vmem:[%s8643_s1 + $0x60] sm:$0xff]  ;;  %v3571_v40 = vpack.c.bf16 %v5798_v8, %v5771_v2 }
  0xb3   :  { %v4233_v23 = vpop.permute.xlu0 %4232  ;;  %v3557_v43 = vpack.c.bf16 %v364_v41, %v362_v7  ;;  %v3559_v42 = vpack.c.bf16 %v363_v21, %v361_v22  ;;  %v4239_v46 = vunpack.i.l.bf16 %v4238_v18  ;;  %v4240_v56 = vunpack.i.h.bf16 %v4238_v18  ;;  %v8730_v2 = vld [vmem:[#allocation2_spill] sm:$0xff]  ;;  %v8733_v18 = vld [vmem:[#allocation4_spill] sm:$0xff]  ;;  %v8734_v7 = vld [vmem:[#allocation3_spill] sm:$0xff] }
  0xb4   :  { %4527 = vrot.lane.b32.xlu1 %v6001_v52, %s5739_s25  ;;  %v4235_v36 = vunpack.i.h.bf16 %v4233_v23  ;;  %v4234_v47 = vunpack.i.l.bf16 %v4233_v23  ;;  %v3575_v8 = vpack.c.bf16 %v8730_v2, %v5784_v5  ;;  %v3579_v22 = vpack.c.bf16 %v8734_v7, %v8733_v18  ;;  %v3375_v21 = vld [vmem:[%s8643_s1 + $0x80] sm:$0xff]  ;;  %v8751_v2 = vld [vmem:[#allocation23_spill] sm:$0xff] }
  0xb5   :  { %4522 = vrot.lane.b32.xlu0 %v6006_v53, %s5739_s25  ;;  %3558 = vmatprep.subr.bf16.mxu1 %v3557_v43  ;;  %v8736_v43 = vld [vmem:[#allocation9_spill] sm:$0xff]  ;;  %v5528_v18 = vld [vmem:[%s8642_s0 + $0x28] sm:$0xff] }
  0xb6   :  { %3560 = vmatpush1.bf16.msra.mxu1 %v3559_v42  ;;  %v4248_v38 = vpop.permute.xlu1 %4247  ;;  %v366_v52 = vsel %vm324_vm1, %v4235_v36, %v4239_v46  ;;  %v365_v57 = vsel %vm324_vm1, %v4234_v47, %v4235_v36  ;;  %v8737_v36 = vld [vmem:[#allocation6_spill] sm:$0xff] }
  0xb7   :  { %v4243_v24 = vpop.permute.xlu0 %4242  ;;  %v4250_v29 = vunpack.i.h.bf16 %v4248_v38  ;;  %v4249_v3 = vunpack.i.l.bf16 %v4248_v38  ;;  %v8738_v47 = vld [vmem:[#allocation10_spill] sm:$0xff] }
  0xb8   :  { %v4245_v10 = vunpack.i.h.bf16 %v4243_v24  ;;  %v4244_v28 = vunpack.i.l.bf16 %v4243_v24  ;;  %4537 = vrot.lane.b32.xlu1 %v6029_v58, %s5739_s25  ;;  %v3583_v38 = vpack.c.bf16 %v8738_v47, %v8737_v36  ;;  %v3377_v24 = vld [vmem:[%s8643_s1 + $0x90] sm:$0xff] }
  0xb9   :  { %4532 = vrot.lane.b32.xlu0 %v6035_v59, %s5739_s25  ;;  %v369_v61 = vsel %vm324_vm1, %v4249_v3, %v4250_v29  ;;  %v8756_v36 = vld [vmem:[#allocation32_spill] sm:$0xff] }
  0xba   :  { %v4258_v53 = vpop.permute.xlu1 %4257  ;;  %v368_v32 = vsel %vm324_vm1, %v4244_v28, %v4245_v10  ;;  %v367_v30 = vsel %vm324_vm1, %v4240_v56, %v4244_v28  ;;  %v8740_v10 = vld [vmem:[#allocation16_spill] sm:$0xff] }
  0xbb   :  { %v4260_v14 = vunpack.i.h.bf16 %v4258_v53  ;;  %v4259_v44 = vunpack.i.l.bf16 %v4258_v53  ;;  %v4253_v34 = vpop.permute.xlu0 %4252  ;;  %v3561_v48 = vpack.c.bf16 %v368_v32, %v366_v52  ;;  %v3563_v16 = vpack.c.bf16 %v367_v30, %v365_v57  ;;  %v8741_v57 = vld [vmem:[#allocation12_spill] sm:$0xff]  ;;  %v3379_v53 = vld [vmem:[%s8643_s1 + $0xa0] sm:$0xff]  ;;  %v8744_v30 = vld [vmem:[#allocation17_spill] sm:$0xff] }
  0xbc   :  { %v4255_v58 = vunpack.i.h.bf16 %v4253_v34  ;;  %v4254_v54 = vunpack.i.l.bf16 %v4253_v34  ;;  %4547 = vrot.lane.b32.xlu1 %v6059_v1, %s5739_s25  ;;  %v3569_v1 = vpack.c.bf16 %v5763_v0, %v5779_v4  ;;  %v3573_v0 = vpack.c.bf16 %v5817_v12, %v5789_v6  ;;  %v3374_v4 = vld [vmem:[%s8643_s1 + $0x78] sm:$0xff]  ;;  %v3373_v6 = vld [vmem:[%s8643_s1 + $0x70] sm:$0xff]  ;;  %v8745_v34 = vld [vmem:[#allocation14_spill] sm:$0xff] }
  0xbd   :  { %4542 = vrot.lane.b32.xlu0 %v6064_v9, %s5739_s25  ;;  %3562 = vmatprep.subr.bf16.mxu1 %v3561_v48  ;;  %v372_v59 = vsel %vm324_vm1, %v4259_v44, %v4260_v14  ;;  %v8746_v48 = vld [vmem:[#allocation18_spill] sm:$0xff] }
  0xbe   :  { %3564 = vmatpush1.bf16.msra.mxu1 %v3563_v16  ;;  %v6429_v35 = vpop.permute.xlu1 %4267  ;;  %v370_v62 = vsel %vm324_vm1, %v4250_v29, %v4254_v54  ;;  %v371_v17 = vsel %vm324_vm1, %v4255_v58, %v4259_v44  ;;  %v8742_v29 = vld [vmem:[#allocation11_spill] sm:$0xff]  ;;  %v3591_v16 = vpack.c.bf16 %v8746_v48, %v8745_v34  ;;  %v3381_v58 = vld [vmem:[%s8643_s1 + $0xb0] sm:$0xff]  ;;  %v5533_v34 = vld [vmem:[%s8642_s0 + $0x78] sm:$0xff] }
  0xbf   :  { %v6434_v20 = vpop.permute.xlu0 %4262  ;;  %v3565_v25 = vpack.c.bf16 %v372_v59, %v370_v62  ;;  %v3567_v26 = vpack.c.bf16 %v371_v17, %v369_v61  ;;  %v3587_v3 = vpack.c.bf16 %v8742_v29, %v8741_v57  ;;  %v8748_v59 = vld [vmem:[#allocation24_spill] sm:$0xff]  ;;  %v5521_v61 = vld [vmem:[%s8642_s0 + $0x18] sm:$0xff] }
  0xc0   :  { %4557 = vrot.lane.b32.xlu1 %v6085_v31, %s5739_s25  ;;  %v5522_v17 = vld [vmem:[%s8642_s0 + $0x10] sm:$0xff] }
  0xc1   :  { %4552 = vrot.lane.b32.xlu0 %v6090_v33, %s5739_s25  ;;  %3566 = vmatprep.subr.bf16.mxu1 %v3565_v25  ;;  %v8731_v33 = vld [vmem:[#allocation5_spill] sm:$0xff]  ;;  %v6559_v25 = vpack.i.bf16 %v5521_v61, %v5522_v17  ;;  %v8757_v29 = vld [vmem:[#allocation28_spill] sm:$0xff]  ;;  %v8762_v61 = vld [vmem:[#allocation34_spill] sm:$0xff] }
  0xc2   :  { %3568 = vmatpush1.bf16.msra.mxu1 %v3567_v26  ;;  %v6442_v9 = vpop.permute.xlu1 %4277  ;;  %v5523_v26 = vld [vmem:[%s8642_s0] sm:$0xff]  ;;  %v5534_v48 = vld [vmem:[%s8642_s0 + $0x70] sm:$0xff] }
  0xc3   :  { %v6449_v11 = vpop.permute.xlu0 %4272  ;;  %3570 = vmatprep.subr.bf16.mxu1 %v3569_v1 }
  0xc4   :  { %4567 = vrot.lane.b32.xlu1 %v6113_v55, %s5739_s25  ;;  %v8732_v55 = vld [vmem:[#allocation8_spill] sm:$0xff] }
  0xc5   :  { %4562 = vrot.lane.b32.xlu0 %v6119_v63, %s5739_s25  ;;  %505 = vmatmul.mubr.f32.vlgmr.msra.gmra.mrb[0].mxu1 %v3371_v39  ;;  %v3577_v41 = vpack.c.bf16 %v8732_v55, %v8731_v33  ;;  %v3376_v63 = vld [vmem:[%s8643_s1 + $0x88] sm:$0xff]  ;;  %v5525_v33 = vld [vmem:[%s8642_s0 + $0x30] sm:$0xff]  ;;  %v5526_v55 = vld [vmem:[%s8642_s0 + $0x38] sm:$0xff] }
  0xc6   :  { %3572 = vmatpush1.bf16.msra.mxu1 %v3571_v40  ;;  %v6460_v31 = vpop.permute.xlu1 %4287  ;;  %3384 = vmatprep.mubr.msk.f32.mxu1 %vm421_vm0, %v3374_v4  ;;  %v8749_v40 = vld [vmem:[#allocation20_spill] sm:$0xff] }
  0xc7   :  { %v6468_v12 = vpop.permute.xlu0 %4282  ;;  %3574 = vmatprep.subr.bf16.mxu1 %v3573_v0  ;;  %v8750_v0 = vld [vmem:[#allocation19_spill] sm:$0xff] }
  0xc8   :  { %4577 = vrot.lane.b32.xlu1 %v6143_v49, %s5739_s25  ;;  %v8735_v49 = vld [vmem:[#allocation7_spill] sm:$0xff]  ;;  %v3595_v4 = vpack.c.bf16 %v8750_v0, %v8749_v40  ;;  %v8764_v40 = vld [vmem:[#allocation40_spill] sm:$0xff] }
  0xc9   :  { %4572 = vrot.lane.b32.xlu0 %v6148_v51, %s5739_s25  ;;  %511 = vmatmul.mubr.f32.gmra.mrb[2].mxu1 %v3373_v6  ;;  %v3581_v42 = vpack.c.bf16 %v8736_v43, %v8735_v49  ;;  %v3378_v51 = vld [vmem:[%s8643_s1 + $0x98] sm:$0xff]  ;;  %v8754_v49 = vld [vmem:[#allocation26_spill] sm:$0xff] }
  0xca   :  { %3576 = vmatpush1.bf16.msra.mxu1 %v3575_v8  ;;  %v6479_v5 = vpop.permute.xlu1 %4297  ;;  %3385 = vmatprep.mubr.msk.f32.mxu1 %vm421_vm0, %v3376_v63  ;;  %v8752_v8 = vld [vmem:[#allocation25_spill] sm:$0xff]  ;;  %v5527_v63 = vld [vmem:[%s8642_s0 + $0x20] sm:$0xff] }
  0xcb   :  { %v6487_v23 = vpop.permute.xlu0 %4292  ;;  %3578 = vmatprep.subr.bf16.mxu1 %v3577_v41  ;;  %v3597_v6 = vpack.c.bf16 %v8752_v8, %v8751_v2  ;;  %v6588_v41 = vpack.i.bf16 %v5526_v55, %v5525_v33  ;;  %v6598_v7 = vpack.i.bf16 %v5528_v18, %v5527_v63  ;;  %v5538_v2 = vld [vmem:[%s8642_s0 + $0x98] sm:$0xff]  ;;  %v5540_v33 = vld [vmem:[%s8642_s0 + $0x88] sm:$0xff]  ;;  %v4275_v63 = vunpack.i.h.bf16 %v6449_v11 }
  0xcc   :  { %4587 = vrot.lane.b32.xlu1 %v6169_v37, %s5739_s25  ;;  %v8739_v37 = vld [vmem:[#allocation13_spill] sm:$0xff]  ;;  %v4274_v18 = vunpack.i.l.bf16 %v6449_v11  ;;  %v5541_v11 = vld [vmem:[%s8642_s0 + $0xb0] sm:$0xff] }
  0xcd   :  { %4582 = vrot.lane.b32.xlu0 %v6174_v45, %s5739_s25  ;;  %517 = vmatmul.mubr.f32.gmra.mrb[4].mxu1 %v3375_v21  ;;  %v3585_v28 = vpack.c.bf16 %v8740_v10, %v8739_v37  ;;  %v3380_v45 = vld [vmem:[%s8643_s1 + $0xa8] sm:$0xff]  ;;  %v8753_v21 = vld [vmem:[#allocation22_spill] sm:$0xff] }
  0xce   :  { %3580 = vmatpush1.bf16.msra.mxu1 %v3579_v22  ;;  %v6498_v46 = vpop.permute.xlu1 %4307  ;;  %3386 = vmatprep.mubr.msk.f32.mxu1 %vm421_vm0, %v3378_v51  ;;  %v3599_v43 = vpack.c.bf16 %v8754_v49, %v8753_v21  ;;  %v8755_v51 = vld [vmem:[#allocation29_spill] sm:$0xff]  ;;  %v5531_v10 = vld [vmem:[%s8642_s0 + $0x48] sm:$0xff]  ;;  %v8765_v49 = vld [vmem:[#allocation36_spill] sm:$0xff] }
  0xcf   :  { %v6506_v56 = vpop.permute.xlu0 %4302  ;;  %3582 = vmatprep.subr.bf16.mxu1 %v3581_v42  ;;  %v3601_v47 = vpack.c.bf16 %v8756_v36, %v8755_v51 }
  0xd0   :  { %4597 = vrot.lane.b32.xlu1 %v6197_v27, %s5739_s25  ;;  %v8743_v27 = vld [vmem:[#allocation15_spill] sm:$0xff] }
  0xd1   :  { %4592 = vrot.lane.b32.xlu0 %v6203_v15, %s5739_s25  ;;  %523 = vmatmul.mubr.f32.gmra.mrb[6].mxu1 %v3377_v24  ;;  %v3589_v14 = vpack.c.bf16 %v8744_v30, %v8743_v27  ;;  %v3382_v15 = vld [vmem:[%s8643_s1 + $0xb8] sm:$0xff]  ;;  %v8759_v30 = vld [vmem:[#allocation31_spill] sm:$0xff] }
  0xd2   :  { %3584 = vmatpush1.bf16.msra.mxu1 %v3583_v38  ;;  %v6517_v52 = vpop.permute.xlu1 %4317  ;;  %3387 = vmatprep.mubr.msk.f32.mxu1 %vm421_vm0, %v3380_v45  ;;  %v5529_v38 = vld [vmem:[%s8642_s0 + $0x50] sm:$0xff]  ;;  %v5530_v24 = vld [vmem:[%s8642_s0 + $0x58] sm:$0xff] }
  0xd3   :  { %v6525_v32 = vpop.permute.xlu0 %4312  ;;  %3586 = vmatprep.subr.bf16.mxu1 %v3585_v28  ;;  %v6616_v37 = vpack.i.bf16 %v5530_v24, %v5529_v38  ;;  %v5532_v28 = vld [vmem:[%s8642_s0 + $0x40] sm:$0xff]  ;;  %v8768_v38 = vld [vmem:[#allocation41_spill] sm:$0xff] }
  0xd4   :  { %4607 = vrot.lane.b32.xlu1 %v6227_v60, %s5739_s25  ;;  %v8747_v60 = vld [vmem:[#allocation21_spill] sm:$0xff]  ;;  %v6626_v45 = vpack.i.bf16 %v5531_v10, %v5532_v28  ;;  %v4269_v10 = vunpack.i.l.bf16 %v6429_v35  ;;  %v4265_v28 = vunpack.i.h.bf16 %v6434_v20 }
  0xd5   :  { %4602 = vrot.lane.b32.xlu0 %v6232_v19, %s5739_s25  ;;  %529 = vmatmul.mubr.f32.gmra.mrb[8].mxu1 %v3379_v53  ;;  %v3593_v62 = vpack.c.bf16 %v8748_v59, %v8747_v60  ;;  %v12_v19 = vld [vmem:[%s8643_s1 + $0x8] sm:$0xff] }
  0xd6   :  { %3588 = vmatpush1.bf16.msra.mxu1 %v3587_v3  ;;  %v6536_v44 = vpop.permute.xlu1 %4327  ;;  %3388 = vmatprep.mubr.msk.f32.mxu1 %vm421_vm0, %v3382_v15  ;;  %v8758_v3 = vld [vmem:[#allocation27_spill] sm:$0xff] }
  0xd7   :  { %v6544_v54 = vpop.permute.xlu0 %4322  ;;  %3590 = vmatprep.subr.bf16.mxu1 %v3589_v14  ;;  %v3603_v53 = vpack.c.bf16 %v8758_v3, %v8757_v29  ;;  %v8760_v14 = vld [vmem:[#allocation33_spill] sm:$0xff]  ;;  %v5536_v60 = vld [vmem:[%s8642_s0 + $0x68] sm:$0xff] }
  0xd8   :  { %4617 = vrot.lane.b32.xlu1 %v6253_v13, %s5739_s25  ;;  %v5524_v13 = vld [vmem:[%s8642_s0 + $0x8] sm:$0xff]  ;;  %v3605_v15 = vpack.c.bf16 %v8760_v14, %v8759_v30  ;;  %v5542_v29 = vld [vmem:[%s8642_s0 + $0xb8] sm:$0xff]  ;;  %v5544_v30 = vld [vmem:[%s8642_s0 + $0xa0] sm:$0xff] }
  0xd9   :  { %4612 = vrot.lane.b32.xlu0 %v6261_v50, %s5739_s25  ;;  %v6569_v1 = vpack.i.bf16 %v5524_v13, %v5523_v26  ;;  %535 = vmatmul.mubr.f32.gmra.mrb[10].mxu1 %v3381_v58  ;;  %s5740_s25 = smov 111   ;;  %v5535_v58 = vld [vmem:[%s8642_s0 + $0x60] sm:$0xff]  ;;  %v8763_v13 = vld [vmem:[#allocation37_spill] sm:$0xff]  ;;  %v6704_v3 = vpack.i.bf16 %v5542_v29, %v5541_v11  ;;  %v4279_v29 = vunpack.i.l.bf16 %v6442_v9 }
  0xda   :  { %3592 = vmatpush1.bf16.msra.mxu1 %v3591_v16  ;;  %v6571_v39 = vpop.permute.xlu1 %4337  ;;  %3389 = vmatprep.mubr.msk.f32.mxu1 %vm421_vm0, %v12_v19  ;;  %v6644_v16 = vpack.i.bf16 %v5533_v34, %v5534_v48  ;;  %v6654_v59 = vpack.i.bf16 %v5536_v60, %v5535_v58  ;;  %v8761_v19 = vld [vmem:[#allocation30_spill] sm:$0xff]  ;;  %v3609_v0 = vpack.c.bf16 %v8764_v40, %v8763_v13  ;;  %v4290_v58 = vunpack.i.h.bf16 %v6460_v31 }
  0xdb   :  { %v6576_v50 = vpop.permute.xlu0 %4332  ;;  %3594 = vmatprep.subr.bf16.mxu1 %v3593_v62  ;;  %v3607_v17 = vpack.c.bf16 %v8762_v61, %v8761_v19  ;;  %v8770_v34 = vld [vmem:[#allocation42_spill] sm:$0xff]  ;;  %v4289_v60 = vunpack.i.l.bf16 %v6460_v31  ;;  %v4284_v19 = vunpack.i.l.bf16 %v6468_v12  ;;  %v4270_v13 = vunpack.i.h.bf16 %v6429_v35  ;;  %v5546_v35 = vld [vmem:[%s8642_s0 + $0xd0] sm:$0xff] }
  0xdc   :  { %4627 = vrot.lane.b32.xlu1 %v6559_v25, %s5740_s25  ;;  %v4264_v40 = vunpack.i.l.bf16 %v6434_v20  ;;  %v819_v31 = vsel %vm817_vm2, %v4265_v28, %v4269_v10 }
  0xdd   :  { %4622 = vrot.lane.b32.xlu0 %v6569_v1, %s5740_s25  ;;  %v820_v20 = vsel %vm817_vm2, %v4270_v13, %v4274_v18  ;;  %v825_v10 = vsel %vm817_vm2, %v4289_v60, %v4290_v58  ;;  %v5552_v13 = vld [vmem:[%s8642_s0 + $0xe8] sm:$0xff] }
  0xde   :  { %3596 = vmatpush1.bf16.msra.mxu1 %v3595_v4  ;;  %v6600_v22 = vpop.permute.xlu1 %4347  ;;  %v5537_v4 = vld [vmem:[%s8642_s0 + $0x90] sm:$0xff]  ;;  %v818_v11 = vsel %vm817_vm2, %v4264_v40, %v4265_v28 }
  0xdf   :  { %v6604_v42 = vpop.permute.xlu0 %4342  ;;  %3598 = vmatprep.subr.bf16.mxu1 %v3597_v6  ;;  %v6672_v8 = vpack.i.bf16 %v5538_v2, %v5537_v4  ;;  %v5539_v6 = vld [vmem:[%s8642_s0 + $0x80] sm:$0xff]  ;;  %v4280_v4 = vunpack.i.h.bf16 %v6442_v9  ;;  %v5545_v2 = vld [vmem:[%s8642_s0 + $0xd8] sm:$0xff]  ;;  %v5549_v28 = vld [vmem:[%s8642_s0 + $0xf0] sm:$0xff] }
  0xe0   :  { %4637 = vrot.lane.b32.xlu1 %v6588_v41, %s5740_s25  ;;  %v6682_v55 = vpack.i.bf16 %v5540_v33, %v5539_v6  ;;  %v6738_v6 = vpack.i.bf16 %v5545_v2, %v5546_v35  ;;  %v4285_v33 = vunpack.i.h.bf16 %v6468_v12  ;;  %v5550_v9 = vld [vmem:[%s8642_s0 + $0xf8] sm:$0xff]  ;;  %v4319_v2 = vunpack.i.l.bf16 %v6517_v52 }
  0xe1   :  { %4632 = vrot.lane.b32.xlu0 %v6598_v7, %s5740_s25 }
  0xe2   :  { %3600 = vmatpush1.bf16.msra.mxu1 %v3599_v43  ;;  %v6628_v57 = vpop.permute.xlu1 %4357  ;;  %v8766_v43 = vld [vmem:[#allocation35_spill] sm:$0xff]  ;;  %v824_v58 = vsel %vm817_vm2, %v4285_v33, %v4289_v60  ;;  %v4314_v60 = vunpack.i.l.bf16 %v6525_v32  ;;  %v13_v33 = vld [vmem:[%s8643_s1 + $0x10] sm:$0xff] }
  0xe3   :  { %v6632_v27 = vpop.permute.xlu0 %4352  ;;  %3602 = vmatprep.subr.bf16.mxu1 %v3601_v47  ;;  %v3611_v51 = vpack.c.bf16 %v8766_v43, %v8765_v49  ;;  %v8767_v47 = vld [vmem:[#allocation39_spill] sm:$0xff]  ;;  %v5547_v49 = vld [vmem:[%s8642_s0 + $0xc0] sm:$0xff] }
  0xe4   :  { %4647 = vrot.lane.b32.xlu1 %v6616_v37, %s5740_s25  ;;  %v3613_v24 = vpack.c.bf16 %v8768_v38, %v8767_v47  ;;  %v5548_v43 = vld [vmem:[%s8642_s0 + $0xc8] sm:$0xff]  ;;  %v4305_v47 = vunpack.i.h.bf16 %v6506_v56  ;;  %v11_v38 = vld [vmem:[%s8643_s1] sm:$0xff] }
  0xe5   :  { %4642 = vrot.lane.b32.xlu0 %v6626_v45, %s5740_s25 }
  0xe6   :  { %3604 = vmatpush1.bf16.msra.mxu1 %v3603_v53  ;;  %v6656_v62 = vpop.permute.xlu1 %4367  ;;  %v5543_v53 = vld [vmem:[%s8642_s0 + $0xa8] sm:$0xff] }
  0xe7   :  { %v6660_v26 = vpop.permute.xlu0 %4362  ;;  %3606 = vmatprep.subr.bf16.mxu1 %v3605_v15  ;;  %v6714_v14 = vpack.i.bf16 %v5543_v53, %v5544_v30  ;;  %v8769_v15 = vld [vmem:[#allocation38_spill] sm:$0xff]  ;;  %v4299_v30 = vunpack.i.l.bf16 %v6479_v5 }
  0xe8   :  { %4657 = vrot.lane.b32.xlu1 %v6644_v16, %s5740_s25  ;;  %v3615_v48 = vpack.c.bf16 %v8770_v34, %v8769_v15  ;;  %v4295_v15 = vunpack.i.h.bf16 %v6487_v23  ;;  %v3619_v34 = vpack.c.bf16 %v820_v20, %v818_v11 }
  0xe9   :  { %4652 = vrot.lane.b32.xlu0 %v6654_v59, %s5740_s25 }
  0xea   :  { %3608 = vmatpush1.bf16.msra.mxu1 %v3607_v17  ;;  %v6686_v21 = vpop.permute.xlu1 %4377  ;;  %v821_v17 = vsel %vm817_vm2, %v4274_v18, %v4275_v63  ;;  %v4304_v18 = vunpack.i.l.bf16 %v6506_v56  ;;  %v14_v56 = vld [vmem:[%s8643_s1 + $0x18] sm:$0xff] }
  0xeb   :  { %v6690_v36 = vpop.permute.xlu0 %4372  ;;  %3610 = vmatprep.subr.bf16.mxu1 %v3609_v0  ;;  %v3617_v63 = vpack.c.bf16 %v821_v17, %v819_v31  ;;  %v5551_v17 = vld [vmem:[%s8642_s0 + $0xe0] sm:$0xff]  ;;  %v4320_v31 = vunpack.i.h.bf16 %v6517_v52 }
  0xec   :  { %4667 = vrot.lane.b32.xlu1 %v6672_v8, %s5740_s25  ;;  %v6789_v40 = vpack.i.bf16 %v5552_v13, %v5551_v17  ;;  %v829_v20 = vsel %vm817_vm2, %v4304_v18, %v4305_v47  ;;  %v4310_v47 = vunpack.i.h.bf16 %v6498_v46  ;;  %v15_v17 = vld [vmem:[%s8643_s1 + $0x20] sm:$0xff] }
  0xed   :  { %4662 = vrot.lane.b32.xlu0 %v6682_v55, %s5740_s25 }
  0xee   :  { %3612 = vmatpush1.bf16.msra.mxu1 %v3611_v51  ;;  %v6721_v61 = vpop.permute.xlu1 %4387  ;;  %v6750_v51 = vpack.i.bf16 %v5548_v43, %v5547_v49  ;;  %v4300_v49 = vunpack.i.h.bf16 %v6479_v5  ;;  %v4294_v43 = vunpack.i.l.bf16 %v6487_v23  ;;  %v5553_v5 = vld [vmem:[%s8642_s0 + $0x110] sm:$0xff]  ;;  %v5554_v23 = vld [vmem:[%s8642_s0 + $0x118] sm:$0xff] }
  0xef   :  { %v6726_v0 = vpop.permute.xlu0 %4382  ;;  %3614 = vmatprep.subr.bf16.mxu1 %v3613_v24  ;;  %v823_v24 = vsel %vm817_vm2, %v4280_v4, %v4284_v19 }
  0xf0   :  { %4677 = vrot.lane.b32.xlu1 %v6704_v3, %s5740_s25  ;;  %v3621_v19 = vpack.c.bf16 %v825_v10, %v823_v24  ;;  %v827_v10 = vsel %vm817_vm2, %v4295_v15, %v4299_v30  ;;  %v828_v11 = vsel %vm817_vm2, %v4300_v49, %v4304_v18  ;;  %v5555_v30 = vld [vmem:[%s8642_s0 + $0x108] sm:$0xff]  ;;  %v4334_v18 = vunpack.i.l.bf16 %v6576_v50 }
  0xf1   :  { %4672 = vrot.lane.b32.xlu0 %v6714_v14, %s5740_s25  ;;  %v826_v13 = vsel %vm817_vm2, %v4294_v43, %v4295_v15  ;;  %v5557_v15 = vld [vmem:[%s8642_s0 + $0x138] sm:$0xff] }
  0xf2   :  { %3616 = vmatpush1.bf16.msra.mxu1 %v3615_v48  ;;  %v6754_v12 = vpop.permute.xlu1 %4397  ;;  %v6778_v48 = vpack.i.bf16 %v5550_v9, %v5549_v28  ;;  %v4335_v9 = vunpack.i.h.bf16 %v6576_v50  ;;  %v18_v50 = vld [vmem:[%s8643_s1 + $0x38] sm:$0xff] }
  0xf3   :  { %v6763_v53 = vpop.permute.xlu0 %4392  ;;  %3618 = vmatprep.subr.bf16.mxu1 %v3617_v63  ;;  %v822_v63 = vsel %vm817_vm2, %v4279_v29, %v4280_v4  ;;  %v6819_v4 = vpack.i.bf16 %v5554_v23, %v5553_v5  ;;  %v4315_v29 = vunpack.i.h.bf16 %v6525_v32  ;;  %v4350_v23 = vunpack.i.h.bf16 %v6600_v22 }
  0xf4   :  { %4687 = vrot.lane.b32.xlu1 %v6738_v6, %s5740_s25  ;;  %v3623_v24 = vpack.c.bf16 %v824_v58, %v822_v63  ;;  %v831_v58 = vsel %vm817_vm2, %v4310_v47, %v4314_v60  ;;  %v4329_v60 = vunpack.i.l.bf16 %v6536_v44  ;;  %v3627_v63 = vpack.c.bf16 %v828_v11, %v826_v13 }
  0xf5   :  { %4682 = vrot.lane.b32.xlu0 %v6750_v51, %s5740_s25  ;;  %624 = vmatmul.mubr.f32.vlgmr.msra.gmra.mrb[0].mxu1 %v11_v38  ;;  %v16_v38 = vld [vmem:[%s8643_s1 + $0x28] sm:$0xff]  ;;  %v832_v43 = vsel %vm817_vm2, %v4315_v29, %v4319_v2  ;;  %v4349_v11 = vunpack.i.l.bf16 %v6600_v22 }
  0xf6   :  { %3620 = vmatpush1.bf16.msra.mxu1 %v3619_v34  ;;  %v6794_v35 = vpop.permute.xlu1 %4407  ;;  %3390 = vmatprep.mubr.msk.f32.mxu1 %vm421_vm0, %v14_v56  ;;  %v3625_v56 = vpack.c.bf16 %v829_v20, %v827_v10  ;;  %v5556_v34 = vld [vmem:[%s8642_s0 + $0x100] sm:$0xff]  ;;  %v4309_v20 = vunpack.i.l.bf16 %v6498_v46  ;;  %v5558_v46 = vld [vmem:[%s8642_s0 + $0x130] sm:$0xff]  ;;  %v5560_v10 = vld [vmem:[%s8642_s0 + $0x128] sm:$0xff] }
  0xf7   :  { %v6804_v52 = vpop.permute.xlu0 %4402  ;;  %3622 = vmatprep.subr.bf16.mxu1 %v3621_v19  ;;  %v6831_v28 = vpack.i.bf16 %v5555_v30, %v5556_v34  ;;  %v833_v19 = vsel %vm817_vm2, %v4319_v2, %v4320_v31  ;;  %v4325_v31 = vunpack.i.h.bf16 %v6544_v54  ;;  %v6860_v49 = vpack.i.bf16 %v5557_v15, %v5558_v46  ;;  %v17_v30 = vld [vmem:[%s8643_s1 + $0x30] sm:$0xff]  ;;  %v5564_v46 = vld [vmem:[%s8642_s0 + $0x148] sm:$0xff] }
  0xf8   :  { %4697 = vrot.lane.b32.xlu1 %v6778_v48, %s5740_s25  ;;  %v4344_v2 = vunpack.i.l.bf16 %v6604_v42  ;;  %v830_v34 = vsel %vm817_vm2, %v4309_v20, %v4310_v47 }
  0xf9   :  { %4692 = vrot.lane.b32.xlu0 %v6789_v40, %s5740_s25  ;;  %630 = vmatmul.mubr.f32.gmra.mrb[2].mxu1 %v13_v33  ;;  %v3631_v13 = vpack.c.bf16 %v832_v43, %v830_v34 }
  0xfa   :  { %3624 = vmatpush1.bf16.msra.mxu1 %v3623_v24  ;;  %v6835_v32 = vpop.permute.xlu1 %4417  ;;  %3391 = vmatprep.mubr.msk.f32.mxu1 %vm421_vm0, %v16_v38  ;;  %v3629_v38 = vpack.c.bf16 %v833_v19, %v831_v58  ;;  %v5559_v24 = vld [vmem:[%s8642_s0 + $0x120] sm:$0xff]  ;;  %v4330_v58 = vunpack.i.h.bf16 %v6536_v44  ;;  %v4324_v19 = vunpack.i.l.bf16 %v6544_v54  ;;  %v5561_v44 = vld [vmem:[%s8642_s0 + $0x150] sm:$0xff]  ;;  %v5562_v54 = vld [vmem:[%s8642_s0 + $0x158] sm:$0xff] }
  0xfb   :  { %v6845_v33 = vpop.permute.xlu0 %4412  ;;  %3626 = vmatprep.subr.bf16.mxu1 %v3625_v56  ;;  %v6871_v5 = vpack.i.bf16 %v5560_v10, %v5559_v24  ;;  %v837_v56 = vsel %vm817_vm2, %v4334_v18, %v4335_v9  ;;  %v4340_v9 = vunpack.i.h.bf16 %v6571_v39  ;;  %v6901_v47 = vpack.i.bf16 %v5562_v54, %v5561_v44  ;;  %v5567_v44 = vld [vmem:[%s8642_s0 + $0x168] sm:$0xff]  ;;  %v5568_v54 = vld [vmem:[%s8642_s0 + $0x160] sm:$0xff] }
  0xfc   :  { %4707 = vrot.lane.b32.xlu1 %v6819_v4, %s5740_s25  ;;  %v836_v20 = vsel %vm817_vm2, %v4330_v58, %v4334_v18  ;;  %v4364_v18 = vunpack.i.l.bf16 %v6660_v26  ;;  %v841_v10 = vsel %vm817_vm2, %v4349_v11, %v4350_v23  ;;  %v834_v34 = vsel %vm817_vm2, %v4324_v19, %v4325_v31 }
  0xfd   :  { %4702 = vrot.lane.b32.xlu0 %v6831_v28, %s5740_s25  ;;  %636 = vmatmul.mubr.f32.gmra.mrb[4].mxu1 %v15_v17  ;;  %v20_v17 = vld [vmem:[%s8643_s1 + $0x48] sm:$0xff]  ;;  %v839_v24 = vsel %vm817_vm2, %v4340_v9, %v4344_v2  ;;  %v4359_v2 = vunpack.i.l.bf16 %v6628_v57  ;;  %v4355_v23 = vunpack.i.h.bf16 %v6632_v27 }
  0xfe   :  { %3628 = vmatpush1.bf16.msra.mxu1 %v3627_v63  ;;  %v6876_v29 = vpop.permute.xlu1 %4427  ;;  %3392 = vmatprep.mubr.msk.f32.mxu1 %vm421_vm0, %v18_v50  ;;  %v835_v50 = vsel %vm817_vm2, %v4325_v31, %v4329_v60  ;;  %v4345_v63 = vunpack.i.h.bf16 %v6604_v42  ;;  %v5563_v60 = vld [vmem:[%s8642_s0 + $0x140] sm:$0xff]  ;;  %v5565_v31 = vld [vmem:[%s8642_s0 + $0x170] sm:$0xff] }
  0xff   :  { %v6886_v22 = vpop.permute.xlu0 %4422  ;;  %3630 = vmatprep.subr.bf16.mxu1 %v3629_v38  ;;  %v3633_v15 = vpack.c.bf16 %v837_v56, %v835_v50  ;;  %v6913_v43 = vpack.i.bf16 %v5564_v46, %v5563_v60  ;;  %v4365_v38 = vunpack.i.h.bf16 %v6660_v26  ;;  %v19_v56 = vld [vmem:[%s8643_s1 + $0x40] sm:$0xff]  ;;  %v22_v26 = vld [vmem:[%s8643_s1 + $0x58] sm:$0xff]  ;;  %v3637_v50 = vpack.c.bf16 %v841_v10, %v839_v24  ;;  %v21_v24 = vld [vmem:[%s8643_s1 + $0x50] sm:$0xff] }
 0x100   :  { %4717 = vrot.lane.b32.xlu1 %v6860_v49, %s5740_s25  ;;  %v4379_v60 = vunpack.i.l.bf16 %v6686_v21 }
 0x101   :  { %4712 = vrot.lane.b32.xlu0 %v6871_v5, %s5740_s25  ;;  %642 = vmatmul.mubr.f32.gmra.mrb[6].mxu1 %v17_v30  ;;  %v4339_v30 = vunpack.i.l.bf16 %v6571_v39  ;;  %v5566_v39 = vld [vmem:[%s8642_s0 + $0x178] sm:$0xff]  ;;  %v845_v46 = vsel %vm817_vm2, %v4364_v18, %v4365_v38  ;;  %v4370_v38 = vunpack.i.h.bf16 %v6656_v62 }
 0x102   :  { %3632 = vmatpush1.bf16.msra.mxu1 %v3631_v13  ;;  %v6917_v42 = vpop.permute.xlu1 %4437  ;;  %3393 = vmatprep.mubr.msk.f32.mxu1 %vm421_vm0, %v20_v17  ;;  %v3635_v17 = vpack.c.bf16 %v836_v20, %v834_v34  ;;  %v6942_v19 = vpack.i.bf16 %v5566_v39, %v5565_v31  ;;  %v840_v13 = vsel %vm817_vm2, %v4345_v63, %v4349_v11  ;;  %v4374_v11 = vunpack.i.l.bf16 %v6690_v36 }
 0x103   :  { %v6927_v58 = vpop.permute.xlu0 %4432  ;;  %3634 = vmatprep.subr.bf16.mxu1 %v3633_v15  ;;  %v6953_v20 = vpack.i.bf16 %v5567_v44, %v5568_v54  ;;  %v4380_v15 = vunpack.i.h.bf16 %v6686_v21  ;;  %v838_v10 = vsel %vm817_vm2, %v4339_v30, %v4340_v9  ;;  %v4354_v34 = vunpack.i.l.bf16 %v6632_v27  ;;  %v5570_v27 = vld [vmem:[%s8642_s0 + $0x190] sm:$0xff] }
 0x104   :  { %4727 = vrot.lane.b32.xlu1 %v6901_v47, %s5740_s25  ;;  %v843_v31 = vsel %vm817_vm2, %v4355_v23, %v4359_v2  ;;  %v4375_v39 = vunpack.i.h.bf16 %v6690_v36  ;;  %v5571_v2 = vld [vmem:[%s8642_s0 + $0x180] sm:$0xff]  ;;  %v4395_v54 = vunpack.i.h.bf16 %v6763_v53 }
 0x105   :  { %4722 = vrot.lane.b32.xlu0 %v6913_v43, %s5740_s25  ;;  %648 = vmatmul.mubr.f32.gmra.mrb[8].mxu1 %v19_v56  ;;  %v4360_v56 = vunpack.i.h.bf16 %v6628_v57  ;;  %v5569_v57 = vld [vmem:[%s8642_s0 + $0x198] sm:$0xff] }
 0x106   :  { %3636 = vmatpush1.bf16.msra.mxu1 %v3635_v17  ;;  %v6958_v63 = vpop.permute.xlu1 %4447  ;;  %3394 = vmatprep.mubr.msk.f32.mxu1 %vm421_vm0, %v22_v26  ;;  %v3396_v17 = vld [vmem:[%s8643_s1 + $0xc8] sm:$0xff]  ;;  %v3639_v26 = vpack.c.bf16 %v840_v13, %v838_v10  ;;  %v6983_v9 = vpack.i.bf16 %v5569_v57, %v5570_v27  ;;  %v3641_v13 = vpack.c.bf16 %v845_v46, %v843_v31  ;;  %v4369_v31 = vunpack.i.l.bf16 %v6656_v62 }
 0x107   :  { %v6968_v21 = vpop.permute.xlu0 %4442  ;;  %3638 = vmatprep.subr.bf16.mxu1 %v3637_v50  ;;  %v844_v30 = vsel %vm817_vm2, %v4360_v56, %v4364_v18  ;;  %v5572_v50 = vld [vmem:[%s8642_s0 + $0x188] sm:$0xff]  ;;  %v4394_v18 = vunpack.i.l.bf16 %v6763_v53  ;;  %v847_v46 = vsel %vm817_vm2, %v4370_v38, %v4374_v11  ;;  %v849_v10 = vsel %vm817_vm2, %v4379_v60, %v4380_v15  ;;  %v5573_v15 = vld [vmem:[%s8642_s0 + $0x1b0] sm:$0xff] }
 0x108   :  { %4737 = vrot.lane.b32.xlu1 %v6942_v19, %s5740_s25  ;;  %v6995_v44 = vpack.i.bf16 %v5572_v50, %v5571_v2  ;;  %v842_v56 = vsel %vm817_vm2, %v4354_v34, %v4355_v23  ;;  %v4385_v53 = vunpack.i.h.bf16 %v6726_v0  ;;  %v5574_v23 = vld [vmem:[%s8642_s0 + $0x1b8] sm:$0xff]  ;;  %v848_v11 = vsel %vm817_vm2, %v4375_v39, %v4379_v60  ;;  %v5576_v27 = vld [vmem:[%s8642_s0 + $0x1a8] sm:$0xff] }
 0x109   :  { %4732 = vrot.lane.b32.xlu0 %v6953_v20, %s5740_s25  ;;  %654 = vmatmul.mubr.f32.gmra.mrb[10].mxu1 %v21_v24  ;;  %v4389_v24 = vunpack.i.l.bf16 %v6721_v61  ;;  %v7018_v62 = vpack.i.bf16 %v5574_v23, %v5573_v15  ;;  %v3645_v34 = vpack.c.bf16 %v849_v10, %v847_v46  ;;  %v4409_v2 = vunpack.i.l.bf16 %v6794_v35 }
 0x10a   :  { %3640 = vmatpush1.bf16.msra.mxu1 %v3639_v26  ;;  %v6999_v36 = vpop.permute.xlu1 %4457  ;;  %3407 = vmatprep.mubr.msk.f32.mxu1 %vm421_vm0, %v3396_v17  ;;  %v3643_v26 = vpack.c.bf16 %v844_v30, %v842_v56  ;;  %v5575_v17 = vld [vmem:[%s8642_s0 + $0x1a0] sm:$0xff]  ;;  %v4404_v60 = vunpack.i.l.bf16 %v6804_v52  ;;  %v853_v50 = vsel %vm817_vm2, %v4394_v18, %v4395_v54  ;;  %v846_v46 = vsel %vm817_vm2, %v4369_v31, %v4370_v38  ;;  %v5577_v54 = vld [vmem:[%s8642_s0 + $0x1d0] sm:$0xff] }
 0x10b   :  { %v7006_v57 = vpop.permute.xlu0 %4452  ;;  %3642 = vmatprep.subr.bf16.mxu1 %v3641_v13  ;;  %v7029_v30 = vpack.i.bf16 %v5576_v27, %v5575_v17  ;;  %v4410_v13 = vunpack.i.h.bf16 %v6794_v35  ;;  %v4390_v10 = vunpack.i.h.bf16 %v6721_v61  ;;  %v4384_v56 = vunpack.i.l.bf16 %v6726_v0  ;;  %v5578_v61 = vld [vmem:[%s8642_s0 + $0x1d8] sm:$0xff] }
 0x10c   :  { %4747 = vrot.lane.b32.xlu1 %v6983_v9, %s5740_s25  ;;  %v4400_v23 = vunpack.i.h.bf16 %v6754_v12  ;;  %v3647_v35 = vpack.c.bf16 %v848_v11, %v846_v46  ;;  %v7052_v0 = vpack.i.bf16 %v5578_v61, %v5577_v54  ;;  %v4405_v31 = vunpack.i.h.bf16 %v6804_v52 }
 0x10d   :  { %4742 = vrot.lane.b32.xlu0 %v6995_v44, %s5740_s25  ;;  %v852_v38 = vsel %vm817_vm2, %v4390_v10, %v4394_v18  ;;  %v4425_v27 = vunpack.i.h.bf16 %v6886_v22  ;;  %v4424_v18 = vunpack.i.l.bf16 %v6886_v22  ;;  %v850_v10 = vsel %vm817_vm2, %v4384_v56, %v4385_v53 }
 0x10e   :  { %3644 = vmatpush1.bf16.msra.mxu1 %v3643_v26  ;;  %v7034_v39 = vpop.permute.xlu1 %4467  ;;  %v851_v26 = vsel %vm817_vm2, %v4385_v53, %v4389_v24  ;;  %v5579_v24 = vld [vmem:[%s8642_s0 + $0x1c8] sm:$0xff]  ;;  %v855_v46 = vsel %vm817_vm2, %v4400_v23, %v4404_v60  ;;  %v4419_v61 = vunpack.i.l.bf16 %v6835_v32  ;;  %v3651_v22 = vpack.c.bf16 %v852_v38, %v850_v10  ;;  %v5581_v60 = vld [vmem:[%s8642_s0 + $0x1f8] sm:$0xff]  ;;  %v5582_v53 = vld [vmem:[%s8642_s0 + $0x1f0] sm:$0xff] }
 0x10f   :  { %v7040_v15 = vpop.permute.xlu0 %4462  ;;  %3646 = vmatprep.subr.bf16.mxu1 %v3645_v34  ;;  %v3649_v11 = vpack.c.bf16 %v853_v50, %v851_v26  ;;  %v5580_v34 = vld [vmem:[%s8642_s0 + $0x1c0] sm:$0xff]  ;;  %v857_v50 = vsel %vm817_vm2, %v4409_v2, %v4410_v13  ;;  %v4399_v26 = vunpack.i.l.bf16 %v6754_v12  ;;  %v7086_v12 = vpack.i.bf16 %v5581_v60, %v5582_v53  ;;  %v5584_v38 = vld [vmem:[%s8642_s0 + $0x1e8] sm:$0xff] }
 0x110   :  { %4757 = vrot.lane.b32.xlu1 %v7018_v62, %s5740_s25  ;;  %v7064_v17 = vpack.i.bf16 %v5579_v24, %v5580_v34  ;;  %v4415_v24 = vunpack.i.h.bf16 %v6845_v33  ;;  %v856_v13 = vsel %vm817_vm2, %v4405_v31, %v4409_v2  ;;  %v3653_v56 = vpack.c.bf16 %v857_v50, %v855_v46 }
 0x111   :  { %4752 = vrot.lane.b32.xlu0 %v7029_v30, %s5740_s25  ;;  %v4440_v34 = vunpack.i.h.bf16 %v6917_v42  ;;  %v4439_v10 = vunpack.i.l.bf16 %v6917_v42  ;;  %v4434_v2 = vunpack.i.l.bf16 %v6927_v58  ;;  %v861_v46 = vsel %vm817_vm2, %v4424_v18, %v4425_v27  ;;  %v5585_v27 = vld [vmem:[%s8642_s0 + $0x210] sm:$0xff] }
 0x112   :  { %8771 = vst [vmem:[#allocation2_spill] sm:$0xff] %v7064_v17  ;;  %3648 = vmatpush1.bf16.msra.mxu1 %v3647_v35  ;;  %v7068_v52 = vpop.permute.xlu1 %4477  ;;  %v5583_v35 = vld [vmem:[%s8642_s0 + $0x1e0] sm:$0xff]  ;;  %v854_v50 = vsel %vm817_vm2, %v4399_v26, %v4400_v23  ;;  %v4420_v60 = vunpack.i.h.bf16 %v6835_v32  ;;  %v4414_v53 = vunpack.i.l.bf16 %v6845_v33  ;;  %v5586_v32 = vld [vmem:[%s8642_s0 + $0x218] sm:$0xff]  ;;  %v4435_v26 = vunpack.i.h.bf16 %v6927_v58 }
 0x113   :  { %v7074_v54 = vpop.permute.xlu0 %4472  ;;  %3650 = vmatprep.subr.bf16.mxu1 %v3649_v11  ;;  %v7097_v11 = vpack.i.bf16 %v5584_v38, %v5583_v35  ;;  %v4430_v35 = vunpack.i.h.bf16 %v6876_v29  ;;  %v3655_v42 = vpack.c.bf16 %v856_v13, %v854_v50  ;;  %v7120_v33 = vpack.i.bf16 %v5586_v32, %v5585_v27 }
 0x114   :  { %4767 = vrot.lane.b32.xlu1 %v7052_v0, %s5740_s25  ;;  %v860_v23 = vsel %vm817_vm2, %v4420_v60, %v4424_v18  ;;  %v4455_v50 = vunpack.i.h.bf16 %v7006_v57  ;;  %v4454_v18 = vunpack.i.l.bf16 %v7006_v57  ;;  %v4429_v27 = vunpack.i.l.bf16 %v6876_v29 }
 0x115   :  { %4762 = vrot.lane.b32.xlu0 %v7064_v17, %s5740_s25  ;;  %8772 = vst [vmem:[#allocation5_spill] sm:$0xff] %v7120_v33  ;;  %v863_v60 = vsel %vm817_vm2, %v4430_v35, %v4434_v2  ;;  %v5589_v2 = vld [vmem:[%s8642_s0 + $0x230] sm:$0xff] }
 0x116   :  { %3652 = vmatpush1.bf16.msra.mxu1 %v3651_v22  ;;  %v7102_v31 = vpop.permute.xlu1 %4487  ;;  %v859_v22 = vsel %vm817_vm2, %v4415_v24, %v4419_v61  ;;  %v5587_v61 = vld [vmem:[%s8642_s0 + $0x200] sm:$0xff] }
 0x117   :  { %v7108_v17 = vpop.permute.xlu0 %4482  ;;  %3654 = vmatprep.subr.bf16.mxu1 %v3653_v56  ;;  %v3657_v13 = vpack.c.bf16 %v861_v46, %v859_v22  ;;  %v5588_v56 = vld [vmem:[%s8642_s0 + $0x208] sm:$0xff]  ;;  %v865_v46 = vsel %vm817_vm2, %v4439_v10, %v4440_v34  ;;  %v858_v22 = vsel %vm817_vm2, %v4414_v53, %v4415_v24  ;;  %v5590_v24 = vld [vmem:[%s8642_s0 + $0x238] sm:$0xff]  ;;  %v864_v34 = vsel %vm817_vm2, %v4435_v26, %v4439_v10 }
 0x118   :  { %4777 = vrot.lane.b32.xlu1 %v7086_v12, %s5740_s25  ;;  %v7132_v38 = vpack.i.bf16 %v5588_v56, %v5587_v61  ;;  %v4449_v61 = vunpack.i.l.bf16 %v6958_v63  ;;  %v4445_v56 = vunpack.i.h.bf16 %v6968_v21  ;;  %v3659_v57 = vpack.c.bf16 %v860_v23, %v858_v22  ;;  %v5592_v23 = vld [vmem:[%s8642_s0 + $0x220] sm:$0xff] }
 0x119   :  { %4772 = vrot.lane.b32.xlu0 %v7097_v11, %s5740_s25  ;;  %v7154_v29 = vpack.i.bf16 %v5590_v24, %v5589_v2  ;;  %v3661_v53 = vpack.c.bf16 %v865_v46, %v863_v60  ;;  %v4470_v22 = vunpack.i.h.bf16 %v7034_v39  ;;  %v4469_v2 = vunpack.i.l.bf16 %v7034_v39 }
 0x11a   :  { %8773 = vst [vmem:[#allocation8_spill] sm:$0xff] %v7132_v38  ;;  %3656 = vmatpush1.bf16.msra.mxu1 %v3655_v42  ;;  %v7136_v58 = vpop.permute.xlu1 %4497  ;;  %v5591_v42 = vld [vmem:[%s8642_s0 + $0x228] sm:$0xff]  ;;  %v4464_v10 = vunpack.i.l.bf16 %v7040_v15  ;;  %v1206_v60 = vsel %vm1202_vm3, %v4454_v18, %v4455_v50  ;;  %v862_v46 = vsel %vm817_vm2, %v4429_v27, %v4430_v35  ;;  %v4450_v24 = vunpack.i.h.bf16 %v6958_v63 }
 0x11b   :  { %v7142_v32 = vpop.permute.xlu0 %4492  ;;  %3658 = vmatprep.subr.bf16.mxu1 %v3657_v13  ;;  %v7165_v13 = vpack.i.bf16 %v5591_v42, %v5592_v23  ;;  %v4460_v42 = vunpack.i.h.bf16 %v6999_v36  ;;  %v3663_v39 = vpack.c.bf16 %v864_v34, %v862_v46  ;;  %v3432_v50 = vld [vmem:[%s8643_s1 + $0x188] sm:$0xff]  ;;  %v4465_v63 = vunpack.i.h.bf16 %v7040_v15 }
 0x11c   :  { %4787 = vrot.lane.b32.xlu1 %v7120_v33, %s5740_s25  ;;  %v1205_v35 = vsel %vm1202_vm3, %v4450_v24, %v4454_v18  ;;  %3443 = vmatprep.mubr.msk.f32.mxu0 %vm421_vm0, %v3432_v50  ;;  %v4485_v27 = vunpack.i.h.bf16 %v7108_v17  ;;  %v4484_v34 = vunpack.i.l.bf16 %v7108_v17  ;;  %v1210_v15 = vsel %vm1202_vm3, %v4469_v2, %v4470_v22 }
 0x11d   :  { %4782 = vrot.lane.b32.xlu0 %v7132_v38, %s5740_s25  ;;  %v4444_v38 = vunpack.i.l.bf16 %v6968_v21  ;;  %v1208_v18 = vsel %vm1202_vm3, %v4460_v42, %v4464_v10  ;;  %v4479_v17 = vunpack.i.l.bf16 %v7068_v52  ;;  %v4475_v24 = vunpack.i.h.bf16 %v7074_v54 }
 0x11e   :  { %3660 = vmatpush1.bf16.msra.mxu1 %v3659_v57  ;;  %v7170_v26 = vpop.permute.xlu1 %4507  ;;  %v1204_v57 = vsel %vm1202_vm3, %v4445_v56, %v4449_v61  ;;  %v1209_v10 = vsel %vm1202_vm3, %v4465_v63, %v4469_v2  ;;  %v4494_v22 = vunpack.i.l.bf16 %v7142_v32  ;;  %v1214_v50 = vsel %vm1202_vm3, %v4484_v34, %v4485_v27 }
 0x11f   :  { %v7176_v33 = vpop.permute.xlu0 %4502  ;;  %3662 = vmatprep.subr.bf16.mxu1 %v3661_v53  ;;  %v3665_v21 = vpack.c.bf16 %v1206_v60, %v1204_v57  ;;  %v3395_v53 = vld [vmem:[%s8643_s1 + $0xc0] sm:$0xff]  ;;  %v1203_v23 = vsel %vm1202_vm3, %v4444_v38, %v4445_v56  ;;  %v4459_v60 = vunpack.i.l.bf16 %v6999_v36  ;;  %v3669_v38 = vpack.c.bf16 %v1210_v15, %v1208_v18 }
 0x120   :  { %4797 = vrot.lane.b32.xlu1 %v7154_v29, %s5740_s25  ;;  %v4500_v36 = vunpack.i.h.bf16 %v7136_v58  ;;  %v4499_v56 = vunpack.i.l.bf16 %v7136_v58  ;;  %v4480_v2 = vunpack.i.h.bf16 %v7068_v52  ;;  %v4490_v63 = vunpack.i.h.bf16 %v7102_v31 }
 0x121   :  { %4792 = vrot.lane.b32.xlu0 %v7165_v13, %s5740_s25  ;;  %s5741_s25 = smov 110   ;;  %v4495_v27 = vunpack.i.h.bf16 %v7142_v32 }
 0x122   :  { %3664 = vmatpush1.bf16.msra.mxu1 %v3663_v39  ;;  %v7192_v61 = vpop.permute.xlu1 %4517  ;;  %v3667_v39 = vpack.c.bf16 %v1205_v35, %v1203_v23  ;;  %v4474_v35 = vunpack.i.l.bf16 %v7074_v54  ;;  %v1218_v15 = vsel %vm1202_vm3, %v4499_v56, %v4500_v36 }
 0x123   :  { %v7201_v46 = vpop.permute.xlu0 %4512  ;;  %3666 = vmatprep.subr.bf16.mxu1 %v3665_v21  ;;  %v1212_v21 = vsel %vm1202_vm3, %v4475_v24, %v4479_v17  ;;  %v1217_v17 = vsel %vm1202_vm3, %v4495_v27, %v4499_v56  ;;  %v4504_v56 = vunpack.i.l.bf16 %v7176_v33  ;;  %v4519_v27 = vunpack.i.l.bf16 %v7192_v61 }
 0x124   :  { %4807 = vrot.lane.b32.xlu1 %v6559_v25, %s5741_s25  ;;  %v1207_v25 = vsel %vm1202_vm3, %v4459_v60, %v4460_v42  ;;  %v3673_v52 = vpack.c.bf16 %v1214_v50, %v1212_v21  ;;  %v4515_v54 = vunpack.i.h.bf16 %v7201_v46  ;;  %v4514_v42 = vunpack.i.l.bf16 %v7201_v46 }
 0x125   :  { %4802 = vrot.lane.b32.xlu0 %v6569_v1, %s5741_s25  ;;  %997 = vmatmul.mubr.f32.vlgmr.msra.gmra.mrb[0].mxu1 %v3395_v53  ;;  %v3671_v58 = vpack.c.bf16 %v1209_v10, %v1207_v25  ;;  %v1213_v53 = vsel %vm1202_vm3, %v4480_v2, %v4484_v34  ;;  %v1211_v23 = vsel %vm1202_vm3, %v4474_v35, %v4475_v24  ;;  %v4489_v34 = vunpack.i.l.bf16 %v7102_v31 }
 0x126   :  { %3668 = vmatpush1.bf16.msra.mxu1 %v3667_v39  ;;  %v7213_v57 = vpop.permute.xlu1 %4527  ;;  %v4505_v60 = vunpack.i.h.bf16 %v7176_v33  ;;  %v3675_v46 = vpack.c.bf16 %v1213_v53, %v1211_v23  ;;  %v1222_v36 = vsel %vm1202_vm3, %v4514_v42, %v4515_v54 }
 0x127   :  { %v4523_v1 = vpop.permute.xlu0 %4522  ;;  %3670 = vmatprep.subr.bf16.mxu1 %v3669_v38  ;;  %v4530_v24 = vunpack.i.h.bf16 %v7213_v57  ;;  %v4529_v31 = vunpack.i.l.bf16 %v7213_v57 }
 0x128   :  { %4817 = vrot.lane.b32.xlu1 %v6588_v41, %s5741_s25  ;;  %v1216_v41 = vsel %vm1202_vm3, %v4490_v63, %v4494_v22  ;;  %v4524_v10 = vunpack.i.l.bf16 %v4523_v1  ;;  %v1215_v22 = vsel %vm1202_vm3, %v4489_v34, %v4490_v63  ;;  %v4525_v35 = vunpack.i.h.bf16 %v4523_v1 }
 0x129   :  { %4812 = vrot.lane.b32.xlu0 %v6598_v7, %s5741_s25  ;;  %v4509_v7 = vunpack.i.l.bf16 %v7170_v26  ;;  %v3677_v39 = vpack.c.bf16 %v1218_v15, %v1216_v41  ;;  %v3679_v57 = vpack.c.bf16 %v1217_v17, %v1215_v22  ;;  %v1226_v53 = vsel %vm1202_vm3, %v4529_v31, %v4530_v24 }
 0x12a   :  { %3672 = vmatpush1.bf16.msra.mxu1 %v3671_v58  ;;  %v7229_v18 = vpop.permute.xlu1 %4537 }
 0x12b   :  { %v7235_v32 = vpop.permute.xlu0 %4532  ;;  %3674 = vmatprep.subr.bf16.mxu1 %v3673_v52  ;;  %v1220_v25 = vsel %vm1202_vm3, %v4505_v60, %v4509_v7  ;;  %v4539_v1 = vunpack.i.l.bf16 %v7229_v18  ;;  %v4540_v41 = vunpack.i.h.bf16 %v7229_v18 }
 0x12c   :  { %4827 = vrot.lane.b32.xlu1 %v6616_v37, %s5741_s25  ;;  %v4510_v37 = vunpack.i.h.bf16 %v7170_v26  ;;  %v3681_v63 = vpack.c.bf16 %v1222_v36, %v1220_v25  ;;  %v4535_v54 = vunpack.i.h.bf16 %v7235_v32  ;;  %v4534_v15 = vunpack.i.l.bf16 %v7235_v32 }
 0x12d   :  { %4822 = vrot.lane.b32.xlu0 %v6626_v45, %s5741_s25  ;;  %v4520_v45 = vunpack.i.h.bf16 %v7192_v61 }
 0x12e   :  { %3676 = vmatpush1.bf16.msra.mxu1 %v3675_v46  ;;  %v7246_v38 = vpop.permute.xlu1 %4547  ;;  %v1221_v2 = vsel %vm1202_vm3, %v4510_v37, %v4514_v42  ;;  %v1225_v42 = vsel %vm1202_vm3, %v4525_v35, %v4529_v31  ;;  %v1228_v24 = vsel %vm1202_vm3, %v4535_v54, %v4539_v1 }
 0x12f   :  { %v4543_v50 = vpop.permute.xlu0 %4542  ;;  %3678 = vmatprep.subr.bf16.mxu1 %v3677_v39  ;;  %v1224_v21 = vsel %vm1202_vm3, %v4520_v45, %v4524_v10  ;;  %v4550_v18 = vunpack.i.h.bf16 %v7246_v38  ;;  %v1227_v10 = vsel %vm1202_vm3, %v4534_v15, %v4535_v54  ;;  %v4549_v36 = vunpack.i.l.bf16 %v7246_v38 }
 0x130   :  { %4837 = vrot.lane.b32.xlu1 %v6644_v16, %s5741_s25  ;;  %v4545_v26 = vunpack.i.h.bf16 %v4543_v50  ;;  %v4544_v58 = vunpack.i.l.bf16 %v4543_v50  ;;  %v1219_v16 = vsel %vm1202_vm3, %v4504_v56, %v4505_v60  ;;  %v3685_v61 = vpack.c.bf16 %v1226_v53, %v1224_v21 }
 0x131   :  { %4832 = vrot.lane.b32.xlu0 %v6654_v59, %s5741_s25  ;;  %v3683_v59 = vpack.c.bf16 %v1221_v2, %v1219_v16  ;;  %v1231_v35 = vsel %vm1202_vm3, %v4549_v36, %v4550_v18 }
 0x132   :  { %3680 = vmatpush1.bf16.msra.mxu1 %v3679_v57  ;;  %v4558_v33 = vpop.permute.xlu1 %4557  ;;  %v1230_v46 = vsel %vm1202_vm3, %v4544_v58, %v4545_v26  ;;  %v1229_v32 = vsel %vm1202_vm3, %v4540_v41, %v4544_v58 }
 0x133   :  { %v4553_v52 = vpop.permute.xlu0 %4552  ;;  %3682 = vmatprep.subr.bf16.mxu1 %v3681_v63  ;;  %v4560_v23 = vunpack.i.h.bf16 %v4558_v33  ;;  %v4559_v34 = vunpack.i.l.bf16 %v4558_v33  ;;  %v3689_v31 = vpack.c.bf16 %v1230_v46, %v1228_v24 }
 0x134   :  { %4847 = vrot.lane.b32.xlu1 %v6672_v8, %s5741_s25  ;;  %v4554_v7 = vunpack.i.l.bf16 %v4553_v52  ;;  %v1223_v8 = vsel %vm1202_vm3, %v4519_v27, %v4520_v45  ;;  %v4555_v17 = vunpack.i.h.bf16 %v4553_v52  ;;  %v3691_v45 = vpack.c.bf16 %v1229_v32, %v1227_v10 }
 0x135   :  { %4842 = vrot.lane.b32.xlu0 %v6682_v55, %s5741_s25  ;;  %v3687_v55 = vpack.c.bf16 %v1225_v42, %v1223_v8  ;;  %v1234_v56 = vsel %vm1202_vm3, %v4559_v34, %v4560_v23 }
 0x136   :  { %3684 = vmatpush1.bf16.msra.mxu1 %v3683_v59  ;;  %v4568_v60 = vpop.permute.xlu1 %4567  ;;  %v1232_v37 = vsel %vm1202_vm3, %v4550_v18, %v4554_v7  ;;  %v1233_v50 = vsel %vm1202_vm3, %v4555_v17, %v4559_v34 }
 0x137   :  { %v4563_v39 = vpop.permute.xlu0 %4562  ;;  %3686 = vmatprep.subr.bf16.mxu1 %v3685_v61  ;;  %v4569_v57 = vunpack.i.l.bf16 %v4568_v60  ;;  %v3693_v38 = vpack.c.bf16 %v1234_v56, %v1232_v37  ;;  %v4570_v63 = vunpack.i.h.bf16 %v4568_v60  ;;  %v3695_v27 = vpack.c.bf16 %v1233_v50, %v1231_v35 }
 0x138   :  { %4857 = vrot.lane.b32.xlu1 %v6704_v3, %s5741_s25  ;;  %v4565_v25 = vunpack.i.h.bf16 %v4563_v39  ;;  %v4564_v33 = vunpack.i.l.bf16 %v4563_v39 }
 0x139   :  { %4852 = vrot.lane.b32.xlu0 %v6714_v14, %s5741_s25 }
 0x13a   :  { %3688 = vmatpush1.bf16.msra.mxu1 %v3687_v55  ;;  %v4578_v22 = vpop.permute.xlu1 %4577  ;;  %v1235_v61 = vsel %vm1202_vm3, %v4564_v33, %v4565_v25 }
 0x13b   :  { %v4573_v3 = vpop.permute.xlu0 %4572  ;;  %3690 = vmatprep.subr.bf16.mxu1 %v3689_v31  ;;  %v4580_v52 = vunpack.i.h.bf16 %v4578_v22  ;;  %v4579_v23 = vunpack.i.l.bf16 %v4578_v22 }
 0x13c   :  { %v4575_v2 = vunpack.i.h.bf16 %v4573_v3  ;;  %v4574_v14 = vunpack.i.l.bf16 %v4573_v3  ;;  %4867 = vrot.lane.b32.xlu1 %v6738_v6, %s5741_s25 }
 0x13d   :  { %4862 = vrot.lane.b32.xlu0 %v6750_v51, %s5741_s25  ;;  %v1236_v51 = vsel %vm1202_vm3, %v4565_v25, %v4569_v57  ;;  %v1239_v39 = vsel %vm1202_vm3, %v4579_v23, %v4580_v52 }
 0x13e   :  { %3692 = vmatpush1.bf16.msra.mxu1 %v3691_v45  ;;  %v4588_v26 = vpop.permute.xlu1 %4587  ;;  %v1238_v58 = vsel %vm1202_vm3, %v4574_v14, %v4575_v2  ;;  %v1237_v54 = vsel %vm1202_vm3, %v4570_v63, %v4574_v14 }
 0x13f   :  { %v4590_v21 = vunpack.i.h.bf16 %v4588_v26  ;;  %v4589_v53 = vunpack.i.l.bf16 %v4588_v26  ;;  %v4583_v16 = vpop.permute.xlu0 %4582  ;;  %3694 = vmatprep.subr.bf16.mxu1 %v3693_v38  ;;  %v3697_v59 = vpack.c.bf16 %v1238_v58, %v1236_v51  ;;  %v3699_v7 = vpack.c.bf16 %v1237_v54, %v1235_v61 }
 0x140   :  { %v4585_v1 = vunpack.i.h.bf16 %v4583_v16  ;;  %v4584_v6 = vunpack.i.l.bf16 %v4583_v16  ;;  %4877 = vrot.lane.b32.xlu1 %v6778_v48, %s5741_s25 }
 0x141   :  { %4872 = vrot.lane.b32.xlu0 %v6789_v40, %s5741_s25  ;;  %v1242_v15 = vsel %vm1202_vm3, %v4589_v53, %v4590_v21 }
 0x142   :  { %3696 = vmatpush1.bf16.msra.mxu1 %v3695_v27  ;;  %v4598_v42 = vpop.permute.xlu1 %4597  ;;  %v1240_v41 = vsel %vm1202_vm3, %v4580_v52, %v4584_v6  ;;  %v1241_v48 = vsel %vm1202_vm3, %v4585_v1, %v4589_v53 }
 0x143   :  { %v4593_v34 = vpop.permute.xlu0 %4592  ;;  %3698 = vmatprep.subr.bf16.mxu1 %v3697_v59  ;;  %v4599_v60 = vunpack.i.l.bf16 %v4598_v42  ;;  %v3701_v8 = vpack.c.bf16 %v1242_v15, %v1240_v41  ;;  %v4600_v32 = vunpack.i.h.bf16 %v4598_v42 }
 0x144   :  { %4887 = vrot.lane.b32.xlu1 %v6819_v4, %s5741_s25  ;;  %v4595_v40 = vunpack.i.h.bf16 %v4593_v34  ;;  %v4594_v46 = vunpack.i.l.bf16 %v4593_v34  ;;  %v3703_v4 = vpack.c.bf16 %v1241_v48, %v1239_v39 }
 0x145   :  { %4882 = vrot.lane.b32.xlu0 %v6831_v28, %s5741_s25 }
 0x146   :  { %3700 = vmatpush1.bf16.msra.mxu1 %v3699_v7  ;;  %v4608_v17 = vpop.permute.xlu1 %4607  ;;  %v1243_v31 = vsel %vm1202_vm3, %v4594_v46, %v4595_v40  ;;  %v1244_v28 = vsel %vm1202_vm3, %v4595_v40, %v4599_v60 }
 0x147   :  { %v4603_v18 = vpop.permute.xlu0 %4602  ;;  %3702 = vmatprep.subr.bf16.mxu1 %v3701_v8  ;;  %v4610_v10 = vunpack.i.h.bf16 %v4608_v17  ;;  %v4609_v36 = vunpack.i.l.bf16 %v4608_v17 }
 0x148   :  { %v4605_v55 = vunpack.i.h.bf16 %v4603_v18  ;;  %v4604_v24 = vunpack.i.l.bf16 %v4603_v18  ;;  %4897 = vrot.lane.b32.xlu1 %v6860_v49, %s5741_s25 }
 0x149   :  { %4892 = vrot.lane.b32.xlu0 %v6871_v5, %s5741_s25  ;;  %v1247_v14 = vsel %vm1202_vm3, %v4609_v36, %v4610_v10 }
 0x14a   :  { %v1245_v22 = vsel %vm1202_vm3, %v4600_v32, %v4604_v24  ;;  %3704 = vmatpush1.bf16.msra.mxu1 %v3703_v4  ;;  %v4618_v37 = vpop.permute.xlu1 %4617  ;;  %v1246_v56 = vsel %vm1202_vm3, %v4604_v24, %v4605_v55  ;;  %v8774_v32 = vld [vmem:[#allocation2_spill] sm:$0xff] }
 0x14b   :  { %v4620_v50 = vunpack.i.h.bf16 %v4618_v37  ;;  %v4619_v3 = vunpack.i.l.bf16 %v4618_v37  ;;  %v4613_v45 = vpop.permute.xlu0 %4612  ;;  %v3705_v49 = vpack.c.bf16 %v1246_v56, %v1244_v28  ;;  %v3707_v57 = vpack.c.bf16 %v1245_v22, %v1243_v31 }
 0x14c   :  { %v4615_v25 = vunpack.i.h.bf16 %v4613_v45  ;;  %v4614_v2 = vunpack.i.l.bf16 %v4613_v45  ;;  %4907 = vrot.lane.b32.xlu1 %v6901_v47, %s5741_s25 }
 0x14d   :  { %4902 = vrot.lane.b32.xlu0 %v6913_v43, %s5741_s25  ;;  %3706 = vmatprep.subr.bf16.mxu1 %v3705_v49  ;;  %v1250_v5 = vsel %vm1202_vm3, %v4619_v3, %v4620_v50 }
 0x14e   :  { %v1249_v38 = vsel %vm1202_vm3, %v4615_v25, %v4619_v3  ;;  %3708 = vmatpush1.bf16.msra.mxu1 %v3707_v57  ;;  %v4628_v35 = vpop.permute.xlu1 %4627  ;;  %v1248_v63 = vsel %vm1202_vm3, %v4610_v10, %v4614_v2 }
 0x14f   :  { %v4623_v26 = vpop.permute.xlu0 %4622  ;;  %v3709_v58 = vpack.c.bf16 %v1250_v5, %v1248_v63  ;;  %v3711_v33 = vpack.c.bf16 %v1249_v38, %v1247_v14  ;;  %v4629_v47 = vunpack.i.l.bf16 %v4628_v35  ;;  %v4630_v27 = vunpack.i.h.bf16 %v4628_v35  ;;  %v8776_v5 = vld [vmem:[#allocation8_spill] sm:$0xff] }
 0x150   :  { %4917 = vrot.lane.b32.xlu1 %v6942_v19, %s5741_s25  ;;  %v4625_v21 = vunpack.i.h.bf16 %v4623_v26  ;;  %v4624_v43 = vunpack.i.l.bf16 %v4623_v26 }
 0x151   :  { %4912 = vrot.lane.b32.xlu0 %v6953_v20, %s5741_s25  ;;  %3710 = vmatprep.subr.bf16.mxu1 %v3709_v58 }
 0x152   :  { %3712 = vmatpush1.bf16.msra.mxu1 %v3711_v33  ;;  %v4638_v53 = vpop.permute.xlu1 %4637  ;;  %v1589_v19 = vsel %vm1587_vm4, %v4625_v21, %v4629_v47  ;;  %v1588_v6 = vsel %vm1587_vm4, %v4624_v43, %v4625_v21  ;;  %v3398_v21 = vld [vmem:[%s8643_s1 + $0xd8] sm:$0xff]  ;;  %v7371_v43 = vld [vmem:[%s8642_s0 + $0x20] sm:$0xff] }
 0x153   :  { %v4633_v16 = vpop.permute.xlu0 %4632  ;;  %v4640_v51 = vunpack.i.h.bf16 %v4638_v53  ;;  %v4639_v20 = vunpack.i.l.bf16 %v4638_v53  ;;  %v7376_v53 = vld [vmem:[%s8642_s0 + $0x10] sm:$0xff]  ;;  %3408 = vmatprep.mubr.msk.f32.mxu1 %vm421_vm0, %v3398_v21 }
 0x154   :  { %v4635_v52 = vunpack.i.h.bf16 %v4633_v16  ;;  %v4634_v1 = vunpack.i.l.bf16 %v4633_v16  ;;  %4927 = vrot.lane.b32.xlu1 %v6983_v9, %s5741_s25  ;;  %v4986_v16 = vpack.i.bf16 %v7371_v43, %v7376_v53 }
 0x155   :  { %4922 = vrot.lane.b32.xlu0 %v6995_v44, %s5741_s25  ;;  %v1592_v40 = vsel %vm1587_vm4, %v4639_v20, %v4640_v51 }
 0x156   :  { %v4648_v54 = vpop.permute.xlu1 %4647  ;;  %v1591_v59 = vsel %vm1587_vm4, %v4634_v1, %v4635_v52  ;;  %v1590_v42 = vsel %vm1587_vm4, %v4630_v27, %v4634_v1  ;;  %v3397_v27 = vld [vmem:[%s8643_s1 + $0xd0] sm:$0xff] }
 0x157   :  { %v4650_v41 = vunpack.i.h.bf16 %v4648_v54  ;;  %v4649_v15 = vunpack.i.l.bf16 %v4648_v54  ;;  %v4643_v61 = vpop.permute.xlu0 %4642  ;;  %v3713_v23 = vpack.c.bf16 %v1591_v59, %v1589_v19  ;;  %v3715_v34 = vpack.c.bf16 %v1590_v42, %v1588_v6  ;;  %v7389_v19 = vld [vmem:[%s8642_s0] sm:$0xff]  ;;  %v7394_v6 = vld [vmem:[%s8642_s0 + $0x8] sm:$0xff]  ;;  %1003 = vmatmul.mubr.f32.gmra.mrb[2].mxu1 %v3397_v27 }
 0x158   :  { %v4645_v9 = vunpack.i.h.bf16 %v4643_v61  ;;  %v4644_v48 = vunpack.i.l.bf16 %v4643_v61  ;;  %4937 = vrot.lane.b32.xlu1 %v7018_v62, %s5741_s25  ;;  %v5598_v61 = vld [vmem:[%s8642_s0 + $0x40] sm:$0xff] }
 0x159   :  { %4932 = vrot.lane.b32.xlu0 %v7029_v30, %s5741_s25  ;;  %3714 = vmatprep.subr.bf16.mxu0 %v3713_v23  ;;  %v1595_v44 = vsel %vm1587_vm4, %v4649_v15, %v4650_v41 }
 0x15a   :  { %3716 = vmatpush1.bf16.msra.mxu0 %v3715_v34  ;;  %v4658_v7 = vpop.permute.xlu1 %4657  ;;  %v1593_v60 = vsel %vm1587_vm4, %v4640_v51, %v4644_v48  ;;  %v1594_v46 = vsel %vm1587_vm4, %v4645_v9, %v4649_v15  ;;  %v4981_v51 = vpack.i.bf16 %v7394_v6, %v7389_v19  ;;  %v5597_v15 = vld [vmem:[%s8642_s0 + $0x38] sm:$0xff]  ;;  %v3399_v34 = vld [vmem:[%s8643_s1 + $0xe0] sm:$0xff]  ;;  %v7418_v9 = vld [vmem:[%s8642_s0 + $0x28] sm:$0xff] }
 0x15b   :  { %v4653_v8 = vpop.permute.xlu0 %4652  ;;  %v3717_v17 = vpack.c.bf16 %v1595_v44, %v1593_v60  ;;  %v3719_v39 = vpack.c.bf16 %v1594_v46, %v1592_v40  ;;  %v4659_v62 = vunpack.i.l.bf16 %v4658_v7  ;;  %v4660_v4 = vunpack.i.h.bf16 %v4658_v7  ;;  %v7423_v48 = vld [vmem:[%s8642_s0 + $0x18] sm:$0xff] }
 0x15c   :  { %4947 = vrot.lane.b32.xlu1 %v7052_v0, %s5741_s25  ;;  %v4655_v18 = vunpack.i.h.bf16 %v4653_v8  ;;  %v4654_v30 = vunpack.i.l.bf16 %v4653_v8  ;;  %v7408_v23 = vpack.i.bf16 %v5598_v61, %v5597_v15  ;;  %v4991_v44 = vpack.i.bf16 %v7423_v48, %v7418_v9 }
 0x15d   :  { %4942 = vrot.lane.b32.xlu0 %v8774_v32, %s5741_s25  ;;  %3718 = vmatprep.subr.bf16.mxu0 %v3717_v17 }
 0x15e   :  { %3720 = vmatpush1.bf16.msra.mxu0 %v3719_v39  ;;  %v4668_v55 = vpop.permute.xlu1 %4667  ;;  %v1597_v0 = vsel %vm1587_vm4, %v4655_v18, %v4659_v62  ;;  %v1596_v10 = vsel %vm1587_vm4, %v4654_v30, %v4655_v18 }
 0x15f   :  { %v4663_v24 = vpop.permute.xlu0 %4662  ;;  %v4670_v36 = vunpack.i.h.bf16 %v4668_v55  ;;  %v4669_v22 = vunpack.i.l.bf16 %v4668_v55 }
 0x160   :  { %v4665_v31 = vunpack.i.h.bf16 %v4663_v24  ;;  %v4664_v28 = vunpack.i.l.bf16 %v4663_v24  ;;  %4957 = vrot.lane.b32.xlu1 %v7086_v12, %s5741_s25  ;;  %v3402_v24 = vld [vmem:[%s8643_s1 + $0xf8] sm:$0xff] }
 0x161   :  { %4952 = vrot.lane.b32.xlu0 %v7097_v11, %s5741_s25  ;;  %v8775_v11 = vld [vmem:[#allocation5_spill] sm:$0xff]  ;;  %v1600_v63 = vsel %vm1587_vm4, %v4669_v22, %v4670_v36  ;;  %v5603_v22 = vld [vmem:[%s8642_s0 + $0x50] sm:$0xff] }
 0x162   :  { %v4678_v37 = vpop.permute.xlu1 %4677  ;;  %v1599_v56 = vsel %vm1587_vm4, %v4664_v28, %v4665_v31  ;;  %v1598_v50 = vsel %vm1587_vm4, %v4660_v4, %v4664_v28  ;;  %v5601_v28 = vld [vmem:[%s8642_s0 + $0x30] sm:$0xff] }
 0x163   :  { %v4680_v3 = vunpack.i.h.bf16 %v4678_v37  ;;  %v4679_v45 = vunpack.i.l.bf16 %v4678_v37  ;;  %v4673_v49 = vpop.permute.xlu0 %4672  ;;  %v3721_v57 = vpack.c.bf16 %v1599_v56, %v1597_v0  ;;  %v3723_v25 = vpack.c.bf16 %v1598_v50, %v1596_v10  ;;  %v5602_v0 = vld [vmem:[%s8642_s0 + $0x48] sm:$0xff]  ;;  %v5604_v37 = vld [vmem:[%s8642_s0 + $0x58] sm:$0xff] }
 0x164   :  { %v4675_v12 = vunpack.i.h.bf16 %v4673_v49  ;;  %v4674_v2 = vunpack.i.l.bf16 %v4673_v49  ;;  %4967 = vrot.lane.b32.xlu1 %v8775_v11, %s5741_s25  ;;  %v7442_v10 = vpack.i.bf16 %v5602_v0, %v5601_v28  ;;  %v7455_v56 = vpack.i.bf16 %v5604_v37, %v5603_v22  ;;  %v3404_v11 = vld [vmem:[%s8643_s1 + $0x108] sm:$0xff]  ;;  %v3413_v28 = vld [vmem:[%s8643_s1 + $0x120] sm:$0xff]  ;;  %v5615_v0 = vld [vmem:[%s8642_s0 + $0xb0] sm:$0xff] }
 0x165   :  { %4962 = vrot.lane.b32.xlu0 %v8776_v5, %s5741_s25  ;;  %3722 = vmatprep.subr.bf16.mxu0 %v3721_v57  ;;  %v1603_v14 = vsel %vm1587_vm4, %v4679_v45, %v4680_v3  ;;  %v5605_v5 = vld [vmem:[%s8642_s0 + $0x80] sm:$0xff] }
 0x166   :  { %3724 = vmatpush1.bf16.msra.mxu0 %v3723_v25  ;;  %v4688_v38 = vpop.permute.xlu1 %4687  ;;  %v1601_v35 = vsel %vm1587_vm4, %v4670_v36, %v4674_v2  ;;  %v1602_v26 = vsel %vm1587_vm4, %v4675_v12, %v4679_v45  ;;  %v3401_v36 = vld [vmem:[%s8643_s1 + $0xf0] sm:$0xff] }
 0x167   :  { %v4683_v58 = vpop.permute.xlu0 %4682  ;;  %v3725_v33 = vpack.c.bf16 %v1603_v14, %v1601_v35  ;;  %v3727_v47 = vpack.c.bf16 %v1602_v26, %v1600_v63  ;;  %v4690_v59 = vunpack.i.h.bf16 %v4688_v38  ;;  %v5606_v14 = vld [vmem:[%s8642_s0 + $0x88] sm:$0xff]  ;;  %v3403_v35 = vld [vmem:[%s8643_s1 + $0x100] sm:$0xff] }
 0x168   :  { %4977 = vrot.lane.b32.xlu1 %v7154_v29, %s5741_s25  ;;  %v4689_v29 = vunpack.i.l.bf16 %v4688_v38  ;;  %v4685_v52 = vunpack.i.h.bf16 %v4683_v58  ;;  %v4684_v1 = vunpack.i.l.bf16 %v4683_v58  ;;  %v7472_v38 = vpack.i.bf16 %v5606_v14, %v5605_v5 }
 0x169   :  { %4972 = vrot.lane.b32.xlu0 %v7165_v13, %s5741_s25  ;;  %3726 = vmatprep.subr.bf16.mxu0 %v3725_v33  ;;  %v3400_v13 = vld [vmem:[%s8643_s1 + $0xe8] sm:$0xff]  ;;  %v5607_v33 = vld [vmem:[%s8642_s0 + $0x70] sm:$0xff] }
 0x16a   :  { %3728 = vmatpush1.bf16.msra.mxu0 %v3727_v47  ;;  %v4698_v20 = vpop.permute.xlu1 %4697  ;;  %3409 = vmatprep.mubr.msk.f32.mxu1 %vm421_vm0, %v3400_v13  ;;  %v1605_v7 = vsel %vm1587_vm4, %v4685_v52, %v4689_v29  ;;  %v1604_v60 = vsel %vm1587_vm4, %v4684_v1, %v4685_v52  ;;  %v5608_v47 = vld [vmem:[%s8642_s0 + $0x68] sm:$0xff]  ;;  %v3406_v29 = vld [vmem:[%s8643_s1 + $0x118] sm:$0xff] }
 0x16b   :  { %v4693_v54 = vpop.permute.xlu0 %4692  ;;  %v4700_v40 = vunpack.i.h.bf16 %v4698_v20  ;;  %v4699_v46 = vunpack.i.l.bf16 %v4698_v20  ;;  %1009 = vmatmul.mubr.f32.gmra.mrb[4].mxu1 %v3399_v34  ;;  %v7486_v21 = vpack.i.bf16 %v5607_v33, %v5608_v47  ;;  %v5609_v20 = vld [vmem:[%s8642_s0 + $0x98] sm:$0xff] }
 0x16c   :  { %v4695_v42 = vunpack.i.h.bf16 %v4693_v54  ;;  %v4694_v41 = vunpack.i.l.bf16 %v4693_v54  ;;  %4987 = vrot.lane.b32.xlu1 %v4986_v16, %s5742_s15  ;;  %3410 = vmatprep.mubr.msk.f32.mxu1 %vm421_vm0, %v3402_v24  ;;  %v5610_v54 = vld [vmem:[%s8642_s0 + $0xa0] sm:$0xff]  ;;  %v5613_v24 = vld [vmem:[%s8642_s0 + $0x90] sm:$0xff] }
 0x16d   :  { %4982 = vrot.lane.b32.xlu0 %v4981_v51, %s5742_s15  ;;  %v1608_v49 = vsel %vm1587_vm4, %v4699_v46, %v4700_v40  ;;  %v7499_v13 = vpack.i.bf16 %v5610_v54, %v5609_v20  ;;  %v5623_v54 = vld [vmem:[%s8642_s0 + $0xd8] sm:$0xff] }
 0x16e   :  { %v4708_v8 = vpop.permute.xlu1 %4707  ;;  %v1607_v17 = vsel %vm1587_vm4, %v4694_v41, %v4695_v42  ;;  %v1606_v39 = vsel %vm1587_vm4, %v4690_v59, %v4694_v41  ;;  %v3405_v59 = vld [vmem:[%s8643_s1 + $0x110] sm:$0xff]  ;;  %v5611_v42 = vld [vmem:[%s8642_s0 + $0x78] sm:$0xff]  ;;  %v5612_v41 = vld [vmem:[%s8642_s0 + $0x60] sm:$0xff] }
 0x16f   :  { %v4710_v62 = vunpack.i.h.bf16 %v4708_v8  ;;  %v4709_v18 = vunpack.i.l.bf16 %v4708_v8  ;;  %v4703_v30 = vpop.permute.xlu0 %4702  ;;  %v3729_v32 = vpack.c.bf16 %v1607_v17, %v1605_v7  ;;  %v3731_v55 = vpack.c.bf16 %v1606_v39, %v1604_v60  ;;  %1015 = vmatmul.mubr.f32.gmra.mrb[6].mxu1 %v3401_v36  ;;  %v5616_v36 = vld [vmem:[%s8642_s0 + $0xb8] sm:$0xff] }
 0x170   :  { %v4705_v4 = vunpack.i.h.bf16 %v4703_v30  ;;  %v4704_v31 = vunpack.i.l.bf16 %v4703_v30  ;;  %4997 = vrot.lane.b32.xlu1 %v7408_v23, %s5742_s15  ;;  %3411 = vmatprep.mubr.msk.f32.mxu1 %vm421_vm0, %v3404_v11  ;;  %v7513_v15 = vpack.i.bf16 %v5611_v42, %v5612_v41  ;;  %v3414_v30 = vld [vmem:[%s8643_s1 + $0x128] sm:$0xff]  ;;  %v7544_v22 = vpack.i.bf16 %v5616_v36, %v5615_v0 }
 0x171   :  { %4992 = vrot.lane.b32.xlu0 %v4991_v44, %s5742_s15  ;;  %3730 = vmatprep.subr.bf16.mxu0 %v3729_v32  ;;  %v1611_v50 = vsel %vm1587_vm4, %v4709_v18, %v4710_v62  ;;  %v5618_v11 = vld [vmem:[%s8642_s0 + $0xe8] sm:$0xff] }
 0x172   :  { %3732 = vmatpush1.bf16.msra.mxu0 %v3731_v55  ;;  %v4718_v3 = vpop.permute.xlu1 %4717  ;;  %v1609_v45 = vsel %vm1587_vm4, %v4700_v40, %v4704_v31  ;;  %v1610_v57 = vsel %vm1587_vm4, %v4705_v4, %v4709_v18  ;;  %v5614_v4 = vld [vmem:[%s8642_s0 + $0xa8] sm:$0xff] }
 0x173   :  { %v4713_v25 = vpop.permute.xlu0 %4712  ;;  %v3733_v12 = vpack.c.bf16 %v1611_v50, %v1609_v45  ;;  %v3735_v2 = vpack.c.bf16 %v1610_v57, %v1608_v49  ;;  %v4719_v63 = vunpack.i.l.bf16 %v4718_v3  ;;  %1021 = vmatmul.mubr.f32.gmra.mrb[8].mxu1 %v3403_v35  ;;  %v4720_v52 = vunpack.i.h.bf16 %v4718_v3 }
 0x174   :  { %5007 = vrot.lane.b32.xlu1 %v7442_v10, %s5742_s15  ;;  %v4715_v26 = vunpack.i.h.bf16 %v4713_v25  ;;  %v4714_v58 = vunpack.i.l.bf16 %v4713_v25  ;;  %3412 = vmatprep.mubr.msk.f32.mxu1 %vm421_vm0, %v3406_v29  ;;  %v7530_v31 = vpack.i.bf16 %v5614_v4, %v5613_v24  ;;  %v5627_v4 = vld [vmem:[%s8642_s0 + $0x110] sm:$0xff] }
 0x175   :  { %5002 = vrot.lane.b32.xlu0 %v7455_v56, %s5742_s15  ;;  %3734 = vmatprep.subr.bf16.mxu0 %v3733_v12 }
 0x176   :  { %3736 = vmatpush1.bf16.msra.mxu0 %v3735_v2  ;;  %v4728_v16 = vpop.permute.xlu1 %4727  ;;  %v1613_v61 = vsel %vm1587_vm4, %v4715_v26, %v4719_v63  ;;  %v1612_v34 = vsel %vm1587_vm4, %v4714_v58, %v4715_v26  ;;  %v5617_v2 = vld [vmem:[%s8642_s0 + $0xe0] sm:$0xff]  ;;  %v5619_v26 = vld [vmem:[%s8642_s0 + $0xd0] sm:$0xff]  ;;  %v5620_v58 = vld [vmem:[%s8642_s0 + $0xc8] sm:$0xff] }
 0x177   :  { %v4723_v27 = vpop.permute.xlu0 %4722  ;;  %v4730_v44 = vunpack.i.h.bf16 %v4728_v16  ;;  %v4729_v7 = vunpack.i.l.bf16 %v4728_v16  ;;  %1027 = vmatmul.mubr.f32.gmra.mrb[10].mxu1 %v3405_v59  ;;  %v7558_v5 = vpack.i.bf16 %v5618_v11, %v5617_v2  ;;  %v7568_v33 = vpack.i.bf16 %v5619_v26, %v5620_v58  ;;  %v5624_v59 = vld [vmem:[%s8642_s0 + $0xc0] sm:$0xff]  ;;  %v5630_v2 = vld [vmem:[%s8642_s0 + $0x148] sm:$0xff]  ;;  %v5631_v26 = vld [vmem:[%s8642_s0 + $0x130] sm:$0xff] }
 0x178   :  { %v4725_v1 = vunpack.i.h.bf16 %v4723_v27  ;;  %v4724_v51 = vunpack.i.l.bf16 %v4723_v27  ;;  %5017 = vrot.lane.b32.xlu1 %v7472_v38, %s5742_s15  ;;  %3425 = vmatprep.mubr.msk.f32.mxu1 %vm421_vm0, %v3414_v30  ;;  %v7588_v42 = vpack.i.bf16 %v5623_v54, %v5624_v59  ;;  %v5632_v58 = vld [vmem:[%s8642_s0 + $0x128] sm:$0xff]  ;;  %v5634_v54 = vld [vmem:[%s8642_s0 + $0x160] sm:$0xff] }
 0x179   :  { %5012 = vrot.lane.b32.xlu0 %v7486_v21, %s5742_s15  ;;  %v1616_v45 = vsel %vm1587_vm4, %v4729_v7, %v4730_v44 }
 0x17a   :  { %v4738_v60 = vpop.permute.xlu1 %4737  ;;  %v1615_v40 = vsel %vm1587_vm4, %v4724_v51, %v4725_v1  ;;  %v1614_v46 = vsel %vm1587_vm4, %v4720_v52, %v4724_v51  ;;  %v5621_v1 = vld [vmem:[%s8642_s0 + $0xf8] sm:$0xff]  ;;  %v5622_v51 = vld [vmem:[%s8642_s0 + $0x100] sm:$0xff] }
 0x17b   :  { %v4740_v8 = vunpack.i.h.bf16 %v4738_v60  ;;  %v4739_v17 = vunpack.i.l.bf16 %v4738_v60  ;;  %v4733_v39 = vpop.permute.xlu0 %4732  ;;  %v3737_v62 = vpack.c.bf16 %v1615_v40, %v1613_v61  ;;  %v3739_v18 = vpack.c.bf16 %v1614_v46, %v1612_v34  ;;  %1382 = vmatmul.mubr.f32.vlgmr.msra.gmra.mrb[0].mxu1 %v3413_v28  ;;  %v5628_v28 = vld [vmem:[%s8642_s0 + $0x118] sm:$0xff] }
 0x17c   :  { %v4735_v32 = vunpack.i.h.bf16 %v4733_v39  ;;  %v4734_v55 = vunpack.i.l.bf16 %v4733_v39  ;;  %5027 = vrot.lane.b32.xlu1 %v7499_v13, %s5742_s15  ;;  %v7578_v20 = vpack.i.bf16 %v5622_v51, %v5621_v1  ;;  %v7612_v0 = vpack.i.bf16 %v5628_v28, %v5627_v4  ;;  %v5633_v51 = vld [vmem:[%s8642_s0 + $0x158] sm:$0xff]  ;;  %v5637_v28 = vld [vmem:[%s8642_s0 + $0x150] sm:$0xff] }
 0x17d   :  { %5022 = vrot.lane.b32.xlu0 %v7513_v15, %s5742_s15  ;;  %3738 = vmatprep.subr.bf16.mxu0 %v3737_v62  ;;  %v1619_v37 = vsel %vm1587_vm4, %v4739_v17, %v4740_v8  ;;  %v7646_v59 = vpack.i.bf16 %v5634_v54, %v5633_v51  ;;  %v5643_v54 = vld [vmem:[%s8642_s0 + $0x190] sm:$0xff] }
 0x17e   :  { %3740 = vmatpush1.bf16.msra.mxu0 %v3739_v18  ;;  %v4748_v50 = vpop.permute.xlu1 %4747  ;;  %v1617_v3 = vsel %vm1587_vm4, %v4730_v44, %v4734_v55  ;;  %v1618_v49 = vsel %vm1587_vm4, %v4735_v32, %v4739_v17  ;;  %v5625_v32 = vld [vmem:[%s8642_s0 + $0xf0] sm:$0xff]  ;;  %v5626_v55 = vld [vmem:[%s8642_s0 + $0x108] sm:$0xff] }
 0x17f   :  { %v4743_v57 = vpop.permute.xlu0 %4742  ;;  %v3741_v25 = vpack.c.bf16 %v1619_v37, %v1617_v3  ;;  %v3743_v12 = vpack.c.bf16 %v1618_v49, %v1616_v45  ;;  %v4749_v14 = vunpack.i.l.bf16 %v4748_v50  ;;  %v4750_v27 = vunpack.i.h.bf16 %v4748_v50 }
 0x180   :  { %5037 = vrot.lane.b32.xlu1 %v7530_v31, %s5742_s15  ;;  %v4745_v35 = vunpack.i.h.bf16 %v4743_v57  ;;  %v4744_v63 = vunpack.i.l.bf16 %v4743_v57  ;;  %v7602_v24 = vpack.i.bf16 %v5626_v55, %v5625_v32 }
 0x181   :  { %5032 = vrot.lane.b32.xlu0 %v7544_v22, %s5742_s15  ;;  %3742 = vmatprep.subr.bf16.mxu0 %v3741_v25 }
 0x182   :  { %3744 = vmatpush1.bf16.msra.mxu0 %v3743_v12  ;;  %v4758_v47 = vpop.permute.xlu1 %4757  ;;  %v1621_v41 = vsel %vm1587_vm4, %v4745_v35, %v4749_v14  ;;  %v1620_v61 = vsel %vm1587_vm4, %v4744_v63, %v4745_v35  ;;  %v5629_v12 = vld [vmem:[%s8642_s0 + $0x140] sm:$0xff] }
 0x183   :  { %v4753_v16 = vpop.permute.xlu0 %4752  ;;  %v4760_v34 = vunpack.i.h.bf16 %v4758_v47  ;;  %v4759_v44 = vunpack.i.l.bf16 %v4758_v47  ;;  %v7626_v11 = vpack.i.bf16 %v5630_v2, %v5629_v12  ;;  %v7636_v47 = vpack.i.bf16 %v5631_v26, %v5632_v58  ;;  %v3416_v26 = vld [vmem:[%s8643_s1 + $0x138] sm:$0xff]  ;;  %v5641_v58 = vld [vmem:[%s8642_s0 + $0x1a0] sm:$0xff] }
 0x184   :  { %v4755_v29 = vunpack.i.h.bf16 %v4753_v16  ;;  %v4754_v52 = vunpack.i.l.bf16 %v4753_v16  ;;  %5047 = vrot.lane.b32.xlu1 %v7558_v5, %s5742_s15  ;;  %3426 = vmatprep.mubr.msk.f32.mxu1 %vm421_vm0, %v3416_v26 }
 0x185   :  { %5042 = vrot.lane.b32.xlu0 %v7568_v33, %s5742_s15  ;;  %v1624_v3 = vsel %vm1587_vm4, %v4759_v44, %v4760_v34 }
 0x186   :  { %v4768_v7 = vpop.permute.xlu1 %4767  ;;  %v1623_v60 = vsel %vm1587_vm4, %v4754_v52, %v4755_v29  ;;  %v1622_v40 = vsel %vm1587_vm4, %v4750_v27, %v4754_v52 }
 0x187   :  { %v4770_v46 = vunpack.i.h.bf16 %v4768_v7  ;;  %v4769_v8 = vunpack.i.l.bf16 %v4768_v7  ;;  %v4763_v17 = vpop.permute.xlu0 %4762  ;;  %v3745_v39 = vpack.c.bf16 %v1623_v60, %v1621_v41  ;;  %v3747_v62 = vpack.c.bf16 %v1622_v40, %v1620_v61  ;;  %v5635_v41 = vld [vmem:[%s8642_s0 + $0x138] sm:$0xff]  ;;  %v5636_v61 = vld [vmem:[%s8642_s0 + $0x120] sm:$0xff] }
 0x188   :  { %v4765_v18 = vunpack.i.h.bf16 %v4763_v17  ;;  %v4764_v30 = vunpack.i.l.bf16 %v4763_v17  ;;  %5057 = vrot.lane.b32.xlu1 %v7578_v20, %s5742_s15 }
 0x189   :  { %5052 = vrot.lane.b32.xlu0 %v7588_v42, %s5742_s15  ;;  %3746 = vmatprep.subr.bf16.mxu0 %v3745_v39  ;;  %v1627_v36 = vsel %vm1587_vm4, %v4769_v8, %v4770_v46 }
 0x18a   :  { %3748 = vmatpush1.bf16.msra.mxu0 %v3747_v62  ;;  %v4778_v37 = vpop.permute.xlu1 %4777  ;;  %v1625_v50 = vsel %vm1587_vm4, %v4760_v34, %v4764_v30  ;;  %v1626_v45 = vsel %vm1587_vm4, %v4765_v18, %v4769_v8  ;;  %v7656_v34 = vpack.i.bf16 %v5635_v41, %v5636_v61  ;;  %v5644_v41 = vld [vmem:[%s8642_s0 + $0x188] sm:$0xff] }
 0x18b   :  { %v4773_v49 = vpop.permute.xlu0 %4772  ;;  %v3749_v57 = vpack.c.bf16 %v1627_v36, %v1625_v50  ;;  %v3751_v25 = vpack.c.bf16 %v1626_v45, %v1624_v3  ;;  %v4779_v14 = vunpack.i.l.bf16 %v4778_v37  ;;  %v4780_v29 = vunpack.i.h.bf16 %v4778_v37  ;;  %v5638_v36 = vld [vmem:[%s8642_s0 + $0x168] sm:$0xff]  ;;  %v5639_v50 = vld [vmem:[%s8642_s0 + $0x170] sm:$0xff]  ;;  %v5640_v3 = vld [vmem:[%s8642_s0 + $0x178] sm:$0xff] }
 0x18c   :  { %5067 = vrot.lane.b32.xlu1 %v7602_v24, %s5742_s15  ;;  %v4775_v35 = vunpack.i.h.bf16 %v4773_v49  ;;  %v4774_v63 = vunpack.i.l.bf16 %v4773_v49  ;;  %v7670_v37 = vpack.i.bf16 %v5638_v36, %v5637_v28  ;;  %v7680_v45 = vpack.i.bf16 %v5640_v3, %v5639_v50  ;;  %v5648_v28 = vld [vmem:[%s8642_s0 + $0x180] sm:$0xff] }
 0x18d   :  { %5062 = vrot.lane.b32.xlu0 %v7612_v0, %s5742_s15  ;;  %3750 = vmatprep.subr.bf16.mxu0 %v3749_v57  ;;  %v7711_v61 = vpack.i.bf16 %v5643_v54, %v5644_v41  ;;  %v3433_v54 = vld [vmem:[%s8643_s1 + $0x190] sm:$0xff] }
 0x18e   :  { %3752 = vmatpush1.bf16.msra.mxu0 %v3751_v25  ;;  %v4788_v16 = vpop.permute.xlu1 %4787  ;;  %v1629_v44 = vsel %vm1587_vm4, %v4775_v35, %v4779_v14  ;;  %v1628_v7 = vsel %vm1587_vm4, %v4774_v63, %v4775_v35  ;;  %v3419_v41 = vld [vmem:[%s8643_s1 + $0x150] sm:$0xff] }
 0x18f   :  { %v4783_v27 = vpop.permute.xlu0 %4782  ;;  %v4790_v60 = vunpack.i.h.bf16 %v4788_v16  ;;  %v4789_v40 = vunpack.i.l.bf16 %v4788_v16  ;;  %v5642_v16 = vld [vmem:[%s8642_s0 + $0x1a8] sm:$0xff] }
 0x190   :  { %v4785_v52 = vunpack.i.h.bf16 %v4783_v27  ;;  %v4784_v1 = vunpack.i.l.bf16 %v4783_v27  ;;  %5077 = vrot.lane.b32.xlu1 %v7626_v11, %s5742_s15  ;;  %v7697_v27 = vpack.i.bf16 %v5642_v16, %v5641_v58  ;;  %v3420_v58 = vld [vmem:[%s8643_s1 + $0x158] sm:$0xff] }
 0x191   :  { %5072 = vrot.lane.b32.xlu0 %v7636_v47, %s5742_s15  ;;  %v1632_v12 = vsel %vm1587_vm4, %v4789_v40, %v4790_v60  ;;  %v3434_v40 = vld [vmem:[%s8643_s1 + $0x198] sm:$0xff] }
 0x192   :  { %v4798_v46 = vpop.permute.xlu1 %4797  ;;  %v1631_v8 = vsel %vm1587_vm4, %v4784_v1, %v4785_v52  ;;  %v1630_v17 = vsel %vm1587_vm4, %v4780_v29, %v4784_v1  ;;  %v3415_v29 = vld [vmem:[%s8643_s1 + $0x130] sm:$0xff] }
 0x193   :  { %v4800_v39 = vunpack.i.h.bf16 %v4798_v46  ;;  %v4799_v62 = vunpack.i.l.bf16 %v4798_v46  ;;  %v4793_v18 = vpop.permute.xlu0 %4792  ;;  %v3753_v30 = vpack.c.bf16 %v1631_v8, %v1629_v44  ;;  %v3755_v32 = vpack.c.bf16 %v1630_v17, %v1628_v7  ;;  %v3431_v7 = vld [vmem:[%s8643_s1 + $0x180] sm:$0xff]  ;;  %1388 = vmatmul.mubr.f32.gmra.mrb[2].mxu1 %v3415_v29  ;;  %v3418_v46 = vld [vmem:[%s8643_s1 + $0x148] sm:$0xff] }
 0x194   :  { %v4795_v55 = vunpack.i.h.bf16 %v4793_v18  ;;  %v4794_v4 = vunpack.i.l.bf16 %v4793_v18  ;;  %5087 = vrot.lane.b32.xlu1 %v7646_v59, %s5742_s15  ;;  %v5646_v18 = vld [vmem:[%s8642_s0 + $0x1c0] sm:$0xff]  ;;  %3427 = vmatprep.mubr.msk.f32.mxu1 %vm421_vm0, %v3418_v46  ;;  %v3436_v46 = vld [vmem:[%s8643_s1 + $0x1a8] sm:$0xff] }
 0x195   :  { %5082 = vrot.lane.b32.xlu0 %v7656_v34, %s5742_s15  ;;  %3754 = vmatprep.subr.bf16.mxu0 %v3753_v30  ;;  %v1635_v49 = vsel %vm1587_vm4, %v4799_v62, %v4800_v39 }
 0x196   :  { %3756 = vmatpush1.bf16.msra.mxu0 %v3755_v32  ;;  %v4808_v57 = vpop.permute.xlu1 %4807  ;;  %v1633_v25 = vsel %vm1587_vm4, %v4790_v60, %v4794_v4  ;;  %v1634_v2 = vsel %vm1587_vm4, %v4795_v55, %v4799_v62  ;;  %v5645_v62 = vld [vmem:[%s8642_s0 + $0x1b8] sm:$0xff]  ;;  %v3417_v32 = vld [vmem:[%s8643_s1 + $0x140] sm:$0xff] }
 0x197   :  { %v4803_v14 = vpop.permute.xlu0 %4802  ;;  %v3757_v35 = vpack.c.bf16 %v1635_v49, %v1633_v25  ;;  %v3759_v63 = vpack.c.bf16 %v1634_v2, %v1632_v12  ;;  %v4809_v52 = vunpack.i.l.bf16 %v4808_v57  ;;  %v4810_v8 = vunpack.i.h.bf16 %v4808_v57  ;;  %v5647_v4 = vld [vmem:[%s8642_s0 + $0x198] sm:$0xff]  ;;  %1394 = vmatmul.mubr.f32.gmra.mrb[4].mxu1 %v3417_v32 }
 0x198   :  { %5097 = vrot.lane.b32.xlu1 %v7670_v37, %s5742_s15  ;;  %v4805_v1 = vunpack.i.h.bf16 %v4803_v14  ;;  %v4804_v51 = vunpack.i.l.bf16 %v4803_v14  ;;  %v7730_v30 = vpack.i.bf16 %v5646_v18, %v5645_v62  ;;  %v7745_v36 = vpack.i.bf16 %v5647_v4, %v5648_v28  ;;  %3428 = vmatprep.mubr.msk.f32.mxu1 %vm421_vm0, %v3420_v58  ;;  %v3422_v4 = vld [vmem:[%s8643_s1 + $0x168] sm:$0xff]  ;;  %v5653_v28 = vld [vmem:[%s8642_s0 + $0x200] sm:$0xff] }
 0x199   :  { %5092 = vrot.lane.b32.xlu0 %v7680_v45, %s5742_s15  ;;  %3758 = vmatprep.subr.bf16.mxu0 %v3757_v35 }
 0x19a   :  { %3760 = vmatpush1.bf16.msra.mxu0 %v3759_v63  ;;  %v4818_v44 = vpop.permute.xlu1 %4817  ;;  %v1973_v55 = vsel %vm1972_vm5, %v4804_v51, %v4805_v1  ;;  %v1974_v50 = vsel %vm1972_vm5, %v4805_v1, %v4809_v52  ;;  %v5649_v52 = vld [vmem:[%s8642_s0 + $0x1b0] sm:$0xff]  ;;  %v5650_v1 = vld [vmem:[%s8642_s0 + $0x1c8] sm:$0xff] }
 0x19b   :  { %v4813_v60 = vpop.permute.xlu0 %4812  ;;  %v4820_v3 = vunpack.i.h.bf16 %v4818_v44  ;;  %v4819_v49 = vunpack.i.l.bf16 %v4818_v44  ;;  %v7762_v51 = vpack.i.bf16 %v5650_v1, %v5649_v52  ;;  %v5651_v44 = vld [vmem:[%s8642_s0 + $0x1d0] sm:$0xff]  ;;  %1400 = vmatmul.mubr.f32.gmra.mrb[6].mxu1 %v3419_v41  ;;  %v5657_v41 = vld [vmem:[%s8642_s0 + $0x218] sm:$0xff] }
 0x19c   :  { %v4815_v17 = vunpack.i.h.bf16 %v4813_v60  ;;  %v4814_v39 = vunpack.i.l.bf16 %v4813_v60  ;;  %5107 = vrot.lane.b32.xlu1 %v7697_v27, %s5742_s15  ;;  %3429 = vmatprep.mubr.msk.f32.mxu1 %vm421_vm0, %v3422_v4 }
 0x19d   :  { %5102 = vrot.lane.b32.xlu0 %v7711_v61, %s5742_s15  ;;  %1767 = vmatmul.mubr.f32.vlgmr.msra.gmra.mrb[0].mxu0 %v3431_v7  ;;  %v5652_v7 = vld [vmem:[%s8642_s0 + $0x1d8] sm:$0xff] }
 0x19e   :  { %v1975_v57 = vsel %vm1972_vm5, %v4810_v8, %v4814_v39  ;;  %v4828_v25 = vpop.permute.xlu1 %4827  ;;  %v1976_v12 = vsel %vm1972_vm5, %v4814_v39, %v4815_v17  ;;  %3444 = vmatprep.mubr.msk.f32.mxu0 %vm421_vm0, %v3434_v40  ;;  %v7779_v60 = vpack.i.bf16 %v5652_v7, %v5651_v44  ;;  %v1977_v8 = vsel %vm1972_vm5, %v4819_v49, %v4820_v3  ;;  %v3435_v49 = vld [vmem:[%s8643_s1 + $0x1a0] sm:$0xff] }
 0x19f   :  { %v4830_v2 = vunpack.i.h.bf16 %v4828_v25  ;;  %v4829_v14 = vunpack.i.l.bf16 %v4828_v25  ;;  %v4823_v35 = vpop.permute.xlu0 %4822  ;;  %v3761_v63 = vpack.c.bf16 %v1976_v12, %v1974_v50  ;;  %v3763_v26 = vpack.c.bf16 %v1975_v57, %v1973_v55  ;;  %v5654_v50 = vld [vmem:[%s8642_s0 + $0x208] sm:$0xff]  ;;  %v3421_v57 = vld [vmem:[%s8643_s1 + $0x160] sm:$0xff] }
 0x1a0   :  { %v4825_v16 = vunpack.i.h.bf16 %v4823_v35  ;;  %v4824_v29 = vunpack.i.l.bf16 %v4823_v35  ;;  %5117 = vrot.lane.b32.xlu1 %v7730_v30, %s5742_s15  ;;  %v5656_v35 = vld [vmem:[%s8642_s0 + $0x1e8] sm:$0xff]  ;;  %1406 = vmatmul.mubr.f32.gmra.mrb[8].mxu1 %v3421_v57  ;;  %v5658_v44 = vld [vmem:[%s8642_s0 + $0x220] sm:$0xff] }
 0x1a1   :  { %5112 = vrot.lane.b32.xlu0 %v7745_v36, %s5742_s15  ;;  %3762 = vmatprep.subr.bf16.mxu0 %v3761_v63  ;;  %v1980_v40 = vsel %vm1972_vm5, %v4829_v14, %v4830_v2  ;;  %v7833_v7 = vpack.i.bf16 %v5658_v44, %v5657_v41 }
 0x1a2   :  { %v1979_v17 = vsel %vm1972_vm5, %v4825_v16, %v4829_v14  ;;  %3764 = vmatpush1.bf16.msra.mxu0 %v3763_v26  ;;  %v4838_v39 = vpop.permute.xlu1 %4837  ;;  %v1978_v62 = vsel %vm1972_vm5, %v4820_v3, %v4824_v29  ;;  %v7799_v3 = vpack.i.bf16 %v5654_v50, %v5653_v28  ;;  %v5655_v14 = vld [vmem:[%s8642_s0 + $0x1f0] sm:$0xff]  ;;  %v3438_v26 = vld [vmem:[%s8643_s1 + $0x1b8] sm:$0xff] }
 0x1a3   :  { %v4833_v18 = vpop.permute.xlu0 %4832  ;;  %v3765_v32 = vpack.c.bf16 %v1980_v40, %v1978_v62  ;;  %v3767_v55 = vpack.c.bf16 %v1979_v17, %v1977_v8  ;;  %1773 = vmatmul.mubr.f32.gmra.mrb[2].mxu0 %v3433_v54  ;;  %v4839_v25 = vunpack.i.l.bf16 %v4838_v39  ;;  %v7816_v63 = vpack.i.bf16 %v5655_v14, %v5656_v35  ;;  %v3424_v29 = vld [vmem:[%s8643_s1 + $0x178] sm:$0xff]  ;;  %v3437_v40 = vld [vmem:[%s8643_s1 + $0x1b0] sm:$0xff] }
 0x1a4   :  { %5127 = vrot.lane.b32.xlu1 %v7762_v51, %s5742_s15  ;;  %3445 = vmatprep.mubr.msk.f32.mxu0 %vm421_vm0, %v3436_v46  ;;  %v4835_v12 = vunpack.i.h.bf16 %v4833_v18  ;;  %v4834_v2 = vunpack.i.l.bf16 %v4833_v18  ;;  %v4840_v52 = vunpack.i.h.bf16 %v4838_v39  ;;  %v3423_v46 = vld [vmem:[%s8643_s1 + $0x170] sm:$0xff]  ;;  %v5659_v17 = vld [vmem:[%s8642_s0 + $0x1f8] sm:$0xff]  ;;  %v5660_v39 = vld [vmem:[%s8642_s0 + $0x1e0] sm:$0xff] }
 0x1a5   :  { %5122 = vrot.lane.b32.xlu0 %v7779_v60, %s5742_s15  ;;  %3766 = vmatprep.subr.bf16.mxu0 %v3765_v32  ;;  %v7851_v62 = vpack.i.bf16 %v5659_v17, %v5660_v39  ;;  %v3440_v32 = vld [vmem:[%s8643_s1 + $0x1c8] sm:$0xff] }
 0x1a6   :  { %3768 = vmatpush1.bf16.msra.mxu0 %v3767_v55  ;;  %v4848_v58 = vpop.permute.xlu1 %4847  ;;  %v1981_v8 = vsel %vm1972_vm5, %v4834_v2, %v4835_v12  ;;  %v1982_v18 = vsel %vm1972_vm5, %v4835_v12, %v4839_v25  ;;  %3430 = vmatprep.mubr.msk.f32.mxu1 %vm421_vm0, %v3424_v29 }
 0x1a7   :  { %v4843_v16 = vpop.permute.xlu0 %4842  ;;  %1779 = vmatmul.mubr.f32.gmra.mrb[4].mxu0 %v3435_v49  ;;  %v4850_v55 = vunpack.i.h.bf16 %v4848_v58  ;;  %v4849_v4 = vunpack.i.l.bf16 %v4848_v58  ;;  %1412 = vmatmul.mubr.f32.gmra.mrb[10].mxu1 %v3423_v46  ;;  %v5661_v58 = vld [vmem:[%s8642_s0 + $0x210] sm:$0xff] }
 0x1a8   :  { %v4845_v1 = vunpack.i.h.bf16 %v4843_v16  ;;  %v4844_v54 = vunpack.i.l.bf16 %v4843_v16  ;;  %5137 = vrot.lane.b32.xlu1 %v7799_v3, %s5742_s15  ;;  %3446 = vmatprep.mubr.msk.f32.mxu0 %vm421_vm0, %v3438_v26  ;;  %v5662_v16 = vld [vmem:[%s8642_s0 + $0x228] sm:$0xff] }
 0x1a9   :  { %5132 = vrot.lane.b32.xlu0 %v7816_v63, %s5742_s15  ;;  %v7868_v29 = vpack.i.bf16 %v5662_v16, %v5661_v58  ;;  %v1985_v46 = vsel %vm1972_vm5, %v4849_v4, %v4850_v55  ;;  %v3441_v4 = vld [vmem:[%s8643_s1 + $0x1d0] sm:$0xff] }
 0x1aa   :  { %v1983_v28 = vsel %vm1972_vm5, %v4840_v52, %v4844_v54  ;;  %v4858_v50 = vpop.permute.xlu1 %4857  ;;  %v1984_v49 = vsel %vm1972_vm5, %v4844_v54, %v4845_v1  ;;  %v3439_v52 = vld [vmem:[%s8643_s1 + $0x1c0] sm:$0xff]  ;;  %v5663_v1 = vld [vmem:[%s8642_s0 + $0x230] sm:$0xff]  ;;  %v5664_v54 = vld [vmem:[%s8642_s0 + $0x238] sm:$0xff] }
 0x1ab   :  { %v4860_v57 = vunpack.i.h.bf16 %v4858_v50  ;;  %v4859_v2 = vunpack.i.l.bf16 %v4858_v50  ;;  %v4853_v14 = vpop.permute.xlu0 %4852  ;;  %v3769_v35 = vpack.c.bf16 %v1984_v49, %v1982_v18  ;;  %v3771_v26 = vpack.c.bf16 %v1983_v28, %v1981_v8  ;;  %1785 = vmatmul.mubr.f32.gmra.mrb[6].mxu0 %v3437_v40  ;;  %v3442_v40 = vld [vmem:[%s8643_s1 + $0x1d8] sm:$0xff] }
 0x1ac   :  { %v4855_v25 = vunpack.i.h.bf16 %v4853_v14  ;;  %v4854_v12 = vunpack.i.l.bf16 %v4853_v14  ;;  %5147 = vrot.lane.b32.xlu1 %v7833_v7, %s5742_s15  ;;  %3447 = vmatprep.mubr.msk.f32.mxu0 %vm421_vm0, %v3440_v32  ;;  %v7882_v41 = vpack.i.bf16 %v5664_v54, %v5663_v1  ;;  %v5166_v50 = vpack.i.bf16 %v7418_v9, %v7371_v43  ;;  %v3450_v43 = vld [vmem:[%s8643_s1 + $0x1e8] sm:$0xff] }
 0x1ad   :  { %5142 = vrot.lane.b32.xlu0 %v7851_v62, %s5742_s15  ;;  %3770 = vmatprep.subr.bf16.mxu0 %v3769_v35  ;;  %v1988_v44 = vsel %vm1972_vm5, %v4859_v2, %v4860_v57 }
 0x1ae   :  { %v1987_v8 = vsel %vm1972_vm5, %v4855_v25, %v4859_v2  ;;  %3772 = vmatpush1.bf16.msra.mxu0 %v3771_v26  ;;  %v4868_v17 = vpop.permute.xlu1 %4867  ;;  %v1986_v39 = vsel %vm1972_vm5, %v4850_v55, %v4854_v12  ;;  %v5161_v55 = vpack.i.bf16 %v7376_v53, %v7394_v6  ;;  %v5171_v53 = vpack.i.bf16 %v7423_v48, %v7389_v19 }
 0x1af   :  { %v4863_v18 = vpop.permute.xlu0 %4862  ;;  %v3773_v32 = vpack.c.bf16 %v1988_v44, %v1986_v39  ;;  %v3775_v28 = vpack.c.bf16 %v1987_v8, %v1985_v46  ;;  %1791 = vmatmul.mubr.f32.gmra.mrb[8].mxu0 %v3439_v52  ;;  %v4869_v49 = vunpack.i.l.bf16 %v4868_v17  ;;  %v4870_v35 = vunpack.i.h.bf16 %v4868_v17 }
 0x1b0   :  { %5157 = vrot.lane.b32.xlu1 %v7868_v29, %s5742_s15  ;;  %3448 = vmatprep.mubr.msk.f32.mxu0 %vm421_vm0, %v3442_v40  ;;  %v4865_v57 = vunpack.i.h.bf16 %v4863_v18  ;;  %v4864_v2 = vunpack.i.l.bf16 %v4863_v18 }
 0x1b1   :  { %5152 = vrot.lane.b32.xlu0 %v7882_v41, %s5742_s15  ;;  %3774 = vmatprep.subr.bf16.mxu0 %v3773_v32 }
 0x1b2   :  { %3776 = vmatpush1.bf16.msra.mxu0 %v3775_v28  ;;  %v4878_v9 = vpop.permute.xlu1 %4877  ;;  %v1989_v12 = vsel %vm1972_vm5, %v4864_v2, %v4865_v57  ;;  %v1990_v6 = vsel %vm1972_vm5, %v4865_v57, %v4869_v49 }
 0x1b3   :  { %v4873_v14 = vpop.permute.xlu0 %4872  ;;  %1797 = vmatmul.mubr.f32.gmra.mrb[10].mxu0 %v3441_v4  ;;  %v4880_v58 = vunpack.i.h.bf16 %v4878_v9  ;;  %v4879_v16 = vunpack.i.l.bf16 %v4878_v9 }
 0x1b4   :  { %v4875_v26 = vunpack.i.h.bf16 %v4873_v14  ;;  %v4874_v25 = vunpack.i.l.bf16 %v4873_v14  ;;  %5167 = vrot.lane.b32.xlu1 %v5166_v50, %s5743_s26  ;;  %3461 = vmatprep.mubr.msk.f32.mxu0 %vm421_vm0, %v3450_v43 }
 0x1b5   :  { %5162 = vrot.lane.b32.xlu0 %v5161_v55, %s5743_s26  ;;  %v1993_v48 = vsel %vm1972_vm5, %v4879_v16, %v4880_v58 }
 0x1b6   :  { %v1991_v52 = vsel %vm1972_vm5, %v4870_v35, %v4874_v25  ;;  %v4888_v1 = vpop.permute.xlu1 %4887  ;;  %v1992_v54 = vsel %vm1972_vm5, %v4874_v25, %v4875_v26 }
 0x1b7   :  { %v4890_v44 = vunpack.i.h.bf16 %v4888_v1  ;;  %v4889_v40 = vunpack.i.l.bf16 %v4888_v1  ;;  %v4883_v46 = vpop.permute.xlu0 %4882  ;;  %v3777_v8 = vpack.c.bf16 %v1992_v54, %v1990_v6  ;;  %v3779_v17 = vpack.c.bf16 %v1991_v52, %v1989_v12 }
 0x1b8   :  { %v4885_v39 = vunpack.i.h.bf16 %v4883_v46  ;;  %v4884_v18 = vunpack.i.l.bf16 %v4883_v46  ;;  %5177 = vrot.lane.b32.xlu1 %v7408_v23, %s5743_s26 }
 0x1b9   :  { %5172 = vrot.lane.b32.xlu0 %v5171_v53, %s5743_s26  ;;  %3778 = vmatprep.subr.bf16.mxu0 %v3777_v8  ;;  %v1996_v19 = vsel %vm1972_vm5, %v4889_v40, %v4890_v44 }
 0x1ba   :  { %v1995_v32 = vsel %vm1972_vm5, %v4885_v39, %v4889_v40  ;;  %3780 = vmatpush1.bf16.msra.mxu0 %v3779_v17  ;;  %v4898_v28 = vpop.permute.xlu1 %4897  ;;  %v1994_v50 = vsel %vm1972_vm5, %v4880_v58, %v4884_v18 }
 0x1bb   :  { %v4893_v4 = vpop.permute.xlu0 %4892  ;;  %v3781_v49 = vpack.c.bf16 %v1996_v19, %v1994_v50  ;;  %v3783_v57 = vpack.c.bf16 %v1995_v32, %v1993_v48  ;;  %v4899_v23 = vunpack.i.l.bf16 %v4898_v28  ;;  %v4900_v14 = vunpack.i.h.bf16 %v4898_v28 }
 0x1bc   :  { %5187 = vrot.lane.b32.xlu1 %v7442_v10, %s5743_s26  ;;  %v4895_v2 = vunpack.i.h.bf16 %v4893_v4  ;;  %v4894_v55 = vunpack.i.l.bf16 %v4893_v4 }
 0x1bd   :  { %5182 = vrot.lane.b32.xlu0 %v7455_v56, %s5743_s26  ;;  %3782 = vmatprep.subr.bf16.mxu0 %v3781_v49 }
 0x1be   :  { %3784 = vmatpush1.bf16.msra.mxu0 %v3783_v57  ;;  %v4908_v43 = vpop.permute.xlu1 %4907  ;;  %v1997_v25 = vsel %vm1972_vm5, %v4894_v55, %v4895_v2  ;;  %v1998_v10 = vsel %vm1972_vm5, %v4895_v2, %v4899_v23 }
 0x1bf   :  { %v4903_v9 = vpop.permute.xlu0 %4902  ;;  %v4910_v12 = vunpack.i.h.bf16 %v4908_v43  ;;  %v4909_v53 = vunpack.i.l.bf16 %v4908_v43 }
 0x1c0   :  { %v4905_v35 = vunpack.i.h.bf16 %v4903_v9  ;;  %v4904_v26 = vunpack.i.l.bf16 %v4903_v9  ;;  %5197 = vrot.lane.b32.xlu1 %v7472_v38, %s5743_s26 }
 0x1c1   :  { %5192 = vrot.lane.b32.xlu0 %v7486_v21, %s5743_s26  ;;  %v2001_v46 = vsel %vm1972_vm5, %v4909_v53, %v4910_v12 }
 0x1c2   :  { %v1999_v56 = vsel %vm1972_vm5, %v4900_v14, %v4904_v26  ;;  %v4918_v6 = vpop.permute.xlu1 %4917  ;;  %v2000_v58 = vsel %vm1972_vm5, %v4904_v26, %v4905_v35 }
 0x1c3   :  { %v4920_v16 = vunpack.i.h.bf16 %v4918_v6  ;;  %v4919_v52 = vunpack.i.l.bf16 %v4918_v6  ;;  %v4913_v1 = vpop.permute.xlu0 %4912  ;;  %v3785_v54 = vpack.c.bf16 %v2000_v58, %v1998_v10  ;;  %v3787_v44 = vpack.c.bf16 %v1999_v56, %v1997_v25 }
 0x1c4   :  { %v4915_v38 = vunpack.i.h.bf16 %v4913_v1  ;;  %v4914_v40 = vunpack.i.l.bf16 %v4913_v1  ;;  %5207 = vrot.lane.b32.xlu1 %v7499_v13, %s5743_s26 }
 0x1c5   :  { %5202 = vrot.lane.b32.xlu0 %v7513_v15, %s5743_s26  ;;  %3786 = vmatprep.subr.bf16.mxu0 %v3785_v54  ;;  %v2004_v21 = vsel %vm1972_vm5, %v4919_v52, %v4920_v16 }
 0x1c6   :  { %v2003_v8 = vsel %vm1972_vm5, %v4915_v38, %v4919_v52  ;;  %3788 = vmatpush1.bf16.msra.mxu0 %v3787_v44  ;;  %v4928_v17 = vpop.permute.xlu1 %4927  ;;  %v2002_v39 = vsel %vm1972_vm5, %v4910_v12, %v4914_v40 }
 0x1c7   :  { %v4923_v18 = vpop.permute.xlu0 %4922  ;;  %v3789_v19 = vpack.c.bf16 %v2004_v21, %v2002_v39  ;;  %v3791_v48 = vpack.c.bf16 %v2003_v8, %v2001_v46  ;;  %v4929_v13 = vunpack.i.l.bf16 %v4928_v17  ;;  %v4930_v4 = vunpack.i.h.bf16 %v4928_v17 }
 0x1c8   :  { %5217 = vrot.lane.b32.xlu1 %v7530_v31, %s5743_s26  ;;  %v4925_v32 = vunpack.i.h.bf16 %v4923_v18  ;;  %v4924_v15 = vunpack.i.l.bf16 %v4923_v18 }
 0x1c9   :  { %5212 = vrot.lane.b32.xlu0 %v7544_v22, %s5743_s26  ;;  %3790 = vmatprep.subr.bf16.mxu0 %v3789_v19 }
 0x1ca   :  { %3792 = vmatpush1.bf16.msra.mxu0 %v3791_v48  ;;  %v4938_v28 = vpop.permute.xlu1 %4937  ;;  %v2005_v23 = vsel %vm1972_vm5, %v4924_v15, %v4925_v32  ;;  %v2006_v31 = vsel %vm1972_vm5, %v4925_v32, %v4929_v13 }
 0x1cb   :  { %v4933_v50 = vpop.permute.xlu0 %4932  ;;  %v4940_v2 = vunpack.i.h.bf16 %v4938_v28  ;;  %v4939_v55 = vunpack.i.l.bf16 %v4938_v28 }
 0x1cc   :  { %v4935_v49 = vunpack.i.h.bf16 %v4933_v50  ;;  %v4934_v57 = vunpack.i.l.bf16 %v4933_v50  ;;  %5227 = vrot.lane.b32.xlu1 %v7558_v5, %s5743_s26 }
 0x1cd   :  { %5222 = vrot.lane.b32.xlu0 %v7568_v33, %s5743_s26  ;;  %v2009_v53 = vsel %vm1972_vm5, %v4939_v55, %v4940_v2 }
 0x1ce   :  { %v2007_v22 = vsel %vm1972_vm5, %v4930_v4, %v4934_v57  ;;  %v4948_v43 = vpop.permute.xlu1 %4947  ;;  %v2008_v9 = vsel %vm1972_vm5, %v4934_v57, %v4935_v49 }
 0x1cf   :  { %v4950_v14 = vunpack.i.h.bf16 %v4948_v43  ;;  %v4949_v35 = vunpack.i.l.bf16 %v4948_v43  ;;  %v4943_v26 = vpop.permute.xlu0 %4942  ;;  %v3793_v25 = vpack.c.bf16 %v2008_v9, %v2006_v31  ;;  %v3795_v10 = vpack.c.bf16 %v2007_v22, %v2005_v23  ;;  %v3449_v9 = vld [vmem:[%s8643_s1 + $0x1e0] sm:$0xff] }
 0x1d0   :  { %v4945_v5 = vunpack.i.h.bf16 %v4943_v26  ;;  %v4944_v12 = vunpack.i.l.bf16 %v4943_v26  ;;  %5237 = vrot.lane.b32.xlu1 %v7578_v20, %s5743_s26 }
 0x1d1   :  { %5232 = vrot.lane.b32.xlu0 %v7588_v42, %s5743_s26  ;;  %3794 = vmatprep.subr.bf16.mxu0 %v3793_v25  ;;  %v2012_v33 = vsel %vm1972_vm5, %v4949_v35, %v4950_v14 }
 0x1d2   :  { %v2011_v56 = vsel %vm1972_vm5, %v4945_v5, %v4949_v35  ;;  %3796 = vmatpush1.bf16.msra.mxu0 %v3795_v10  ;;  %v4958_v6 = vpop.permute.xlu1 %4957  ;;  %v2010_v58 = vsel %vm1972_vm5, %v4940_v2, %v4944_v12  ;;  %v3452_v35 = vld [vmem:[%s8643_s1 + $0x1f8] sm:$0xff] }
 0x1d3   :  { %v4953_v16 = vpop.permute.xlu0 %4952  ;;  %v3797_v52 = vpack.c.bf16 %v2012_v33, %v2010_v58  ;;  %v3799_v1 = vpack.c.bf16 %v2011_v56, %v2009_v53  ;;  %v4959_v20 = vunpack.i.l.bf16 %v4958_v6  ;;  %v4960_v40 = vunpack.i.h.bf16 %v4958_v6 }
 0x1d4   :  { %5247 = vrot.lane.b32.xlu1 %v7602_v24, %s5743_s26  ;;  %v4955_v54 = vunpack.i.h.bf16 %v4953_v16  ;;  %v4954_v42 = vunpack.i.l.bf16 %v4953_v16 }
 0x1d5   :  { %5242 = vrot.lane.b32.xlu0 %v7612_v0, %s5743_s26  ;;  %3798 = vmatprep.subr.bf16.mxu0 %v3797_v52 }
 0x1d6   :  { %3800 = vmatpush1.bf16.msra.mxu0 %v3799_v1  ;;  %v4968_v44 = vpop.permute.xlu1 %4967  ;;  %v2013_v8 = vsel %vm1972_vm5, %v4954_v42, %v4955_v54  ;;  %v2014_v24 = vsel %vm1972_vm5, %v4955_v54, %v4959_v20  ;;  %v3454_v42 = vld [vmem:[%s8643_s1 + $0x208] sm:$0xff] }
 0x1d7   :  { %v4963_v38 = vpop.permute.xlu0 %4962  ;;  %v4970_v17 = vunpack.i.h.bf16 %v4968_v44  ;;  %v4969_v39 = vunpack.i.l.bf16 %v4968_v44 }
 0x1d8   :  { %v4965_v21 = vunpack.i.h.bf16 %v4963_v38  ;;  %v4964_v46 = vunpack.i.l.bf16 %v4963_v38  ;;  %5257 = vrot.lane.b32.xlu1 %v7626_v11, %s5743_s26 }
 0x1d9   :  { %5252 = vrot.lane.b32.xlu0 %v7636_v47, %s5743_s26  ;;  %v2017_v4 = vsel %vm1972_vm5, %v4969_v39, %v4970_v17 }
 0x1da   :  { %v2015_v0 = vsel %vm1972_vm5, %v4960_v40, %v4964_v46  ;;  %v4978_v18 = vpop.permute.xlu1 %4977  ;;  %v2016_v19 = vsel %vm1972_vm5, %v4964_v46, %v4965_v21 }
 0x1db   :  { %v4980_v48 = vunpack.i.h.bf16 %v4978_v18  ;;  %v4979_v13 = vunpack.i.l.bf16 %v4978_v18  ;;  %v4973_v32 = vpop.permute.xlu0 %4972  ;;  %v3801_v15 = vpack.c.bf16 %v2016_v19, %v2014_v24  ;;  %v3803_v28 = vpack.c.bf16 %v2015_v0, %v2013_v8  ;;  %v3453_v0 = vld [vmem:[%s8643_s1 + $0x200] sm:$0xff]  ;;  %v3456_v19 = vld [vmem:[%s8643_s1 + $0x218] sm:$0xff] }
 0x1dc   :  { %v4975_v11 = vunpack.i.h.bf16 %v4973_v32  ;;  %v4974_v50 = vunpack.i.l.bf16 %v4973_v32  ;;  %5267 = vrot.lane.b32.xlu1 %v7646_v59, %s5743_s26 }
 0x1dd   :  { %5262 = vrot.lane.b32.xlu0 %v7656_v34, %s5743_s26  ;;  %3802 = vmatprep.subr.bf16.mxu0 %v3801_v15  ;;  %v2020_v47 = vsel %vm1972_vm5, %v4979_v13, %v4980_v48 }
 0x1de   :  { %v2019_v49 = vsel %vm1972_vm5, %v4975_v11, %v4979_v13  ;;  %3804 = vmatpush1.bf16.msra.mxu0 %v3803_v28  ;;  %v4988_v57 = vpop.permute.xlu1 %4987  ;;  %v2018_v23 = vsel %vm1972_vm5, %v4970_v17, %v4974_v50  ;;  %v3458_v11 = vld [vmem:[%s8643_s1 + $0x228] sm:$0xff] }
 0x1df   :  { %v4983_v31 = vpop.permute.xlu0 %4982  ;;  %v3805_v2 = vpack.c.bf16 %v2020_v47, %v2018_v23  ;;  %v3807_v55 = vpack.c.bf16 %v2019_v49, %v2017_v4  ;;  %v4989_v59 = vunpack.i.l.bf16 %v4988_v57 }
 0x1e0   :  { %5277 = vrot.lane.b32.xlu1 %v7670_v37, %s5743_s26  ;;  %v4985_v22 = vunpack.i.h.bf16 %v4983_v31  ;;  %v4984_v34 = vunpack.i.l.bf16 %v4983_v31  ;;  %v4990_v37 = vunpack.i.h.bf16 %v4988_v57 }
 0x1e1   :  { %5272 = vrot.lane.b32.xlu0 %v7680_v45, %s5743_s26  ;;  %3806 = vmatprep.subr.bf16.mxu0 %v3805_v2 }
 0x1e2   :  { %3808 = vmatpush1.bf16.msra.mxu0 %v3807_v55  ;;  %v4998_v43 = vpop.permute.xlu1 %4997  ;;  %v2358_v45 = vsel %vm2357_vm6, %v4984_v34, %v4985_v22  ;;  %v2359_v10 = vsel %vm2357_vm6, %v4985_v22, %v4989_v59  ;;  %v3460_v34 = vld [vmem:[%s8643_s1 + $0x238] sm:$0xff] }
 0x1e3   :  { %v4993_v14 = vpop.permute.xlu0 %4992  ;;  %v5000_v5 = vunpack.i.h.bf16 %v4998_v43  ;;  %v4999_v12 = vunpack.i.l.bf16 %v4998_v43 }
 0x1e4   :  { %v4995_v26 = vunpack.i.h.bf16 %v4993_v14  ;;  %v4994_v25 = vunpack.i.l.bf16 %v4993_v14  ;;  %5287 = vrot.lane.b32.xlu1 %v7697_v27, %s5743_s26 }
 0x1e5   :  { %5282 = vrot.lane.b32.xlu0 %v7711_v61, %s5743_s26  ;;  %2152 = vmatmul.mubr.f32.vlgmr.msra.gmra.mrb[0].mxu0 %v3449_v9  ;;  %v3451_v61 = vld [vmem:[%s8643_s1 + $0x1f0] sm:$0xff] }
 0x1e6   :  { %v2360_v33 = vsel %vm2357_vm6, %v4995_v26, %v4990_v37  ;;  %v5008_v53 = vpop.permute.xlu1 %5007  ;;  %v2361_v56 = vsel %vm2357_vm6, %v4990_v37, %v4994_v25  ;;  %3462 = vmatprep.mubr.msk.f32.mxu0 %vm421_vm0, %v3452_v35 }
 0x1e7   :  { %v5010_v6 = vunpack.i.h.bf16 %v5008_v53  ;;  %v5009_v58 = vunpack.i.l.bf16 %v5008_v53  ;;  %v5003_v27 = vpop.permute.xlu0 %5002  ;;  %v3809_v16 = vpack.c.bf16 %v2361_v56, %v2359_v10  ;;  %v3811_v52 = vpack.c.bf16 %v2360_v33, %v2358_v45  ;;  %v3459_v53 = vld [vmem:[%s8643_s1 + $0x230] sm:$0xff] }
 0x1e8   :  { %v5005_v1 = vunpack.i.h.bf16 %v5003_v27  ;;  %v5004_v20 = vunpack.i.l.bf16 %v5003_v27  ;;  %5297 = vrot.lane.b32.xlu1 %v7730_v30, %s5743_s26  ;;  %v2363_v30 = vsel %vm2357_vm6, %v4999_v12, %v5000_v5  ;;  %v5665_v5 = vld [vmem:[%s8642_s0 + $0x20] sm:$0xff]  ;;  %v5668_v56 = vld [vmem:[%s8642_s0 + $0x10] sm:$0xff]  ;;  %v3468_v27 = vld [vmem:[%s8643_s1 + $0x248] sm:$0xff] }
 0x1e9   :  { %v2362_v54 = vsel %vm2357_vm6, %v5009_v58, %v4999_v12  ;;  %5292 = vrot.lane.b32.xlu0 %v7745_v36, %s5743_s26  ;;  %3810 = vmatprep.subr.bf16.mxu0 %v3809_v16  ;;  %v5666_v12 = vld [vmem:[%s8642_s0 + $0x28] sm:$0xff] }
 0x1ea   :  { %v2364_v44 = vsel %vm2357_vm6, %v5010_v6, %v5004_v20  ;;  %3812 = vmatpush1.bf16.msra.mxu0 %v3811_v52  ;;  %v5018_v38 = vpop.permute.xlu1 %5017  ;;  %v2365_v40 = vsel %vm2357_vm6, %v5004_v20, %v5005_v1  ;;  %v5346_v33 = vpack.i.bf16 %v5666_v12, %v5665_v5  ;;  %v5682_v5 = vld [vmem:[%s8642_s0 + $0xa0] sm:$0xff] }
 0x1eb   :  { %v5020_v21 = vunpack.i.h.bf16 %v5018_v38  ;;  %v5019_v46 = vunpack.i.l.bf16 %v5018_v38  ;;  %v5013_v8 = vpop.permute.xlu0 %5012  ;;  %v3813_v24 = vpack.c.bf16 %v2365_v40, %v2363_v30  ;;  %v3815_v17 = vpack.c.bf16 %v2364_v44, %v2362_v54  ;;  %2158 = vmatmul.mubr.f32.gmra.mrb[2].mxu0 %v3451_v61  ;;  %v5669_v54 = vld [vmem:[%s8642_s0 + $0x38] sm:$0xff]  ;;  %v5671_v38 = vld [vmem:[%s8642_s0] sm:$0xff] }
 0x1ec   :  { %v5015_v36 = vunpack.i.h.bf16 %v5013_v8  ;;  %v5014_v39 = vunpack.i.l.bf16 %v5013_v8  ;;  %5307 = vrot.lane.b32.xlu1 %v7762_v51, %s5743_s26  ;;  %3463 = vmatprep.mubr.msk.f32.mxu0 %vm421_vm0, %v3454_v42  ;;  %v5670_v42 = vld [vmem:[%s8642_s0 + $0x40] sm:$0xff]  ;;  %v5672_v30 = vld [vmem:[%s8642_s0 + $0x18] sm:$0xff] }
 0x1ed   :  { %5302 = vrot.lane.b32.xlu0 %v7779_v60, %s5743_s26  ;;  %3814 = vmatprep.subr.bf16.mxu0 %v3813_v24  ;;  %v2369_v18 = vsel %vm2357_vm6, %v5019_v46, %v5020_v21  ;;  %v3455_v60 = vld [vmem:[%s8643_s1 + $0x210] sm:$0xff]  ;;  %v5356_v44 = vpack.i.bf16 %v5670_v42, %v5669_v54  ;;  %v5351_v40 = vpack.i.bf16 %v5672_v30, %v5671_v38 }
 0x1ee   :  { %3816 = vmatpush1.bf16.msra.mxu0 %v3815_v17  ;;  %v5028_v48 = vpop.permute.xlu1 %5027  ;;  %v2367_v51 = vsel %vm2357_vm6, %v5014_v39, %v5015_v36  ;;  %v5685_v42 = vld [vmem:[%s8642_s0 + $0x90] sm:$0xff] }
 0x1ef   :  { %v5023_v13 = vpop.permute.xlu0 %5022  ;;  %v3817_v32 = vpack.c.bf16 %v2369_v18, %v2367_v51  ;;  %2164 = vmatmul.mubr.f32.gmra.mrb[4].mxu0 %v3453_v0  ;;  %v5030_v50 = vunpack.i.h.bf16 %v5028_v48  ;;  %v5029_v47 = vunpack.i.l.bf16 %v5028_v48  ;;  %v5673_v51 = vld [vmem:[%s8642_s0 + $0x30] sm:$0xff] }
 0x1f0   :  { %v5025_v15 = vunpack.i.h.bf16 %v5023_v13  ;;  %v5024_v28 = vunpack.i.l.bf16 %v5023_v13  ;;  %5317 = vrot.lane.b32.xlu1 %v7799_v3, %s5743_s26  ;;  %3464 = vmatprep.mubr.msk.f32.mxu0 %vm421_vm0, %v3456_v19  ;;  %v5674_v13 = vld [vmem:[%s8642_s0 + $0x48] sm:$0xff] }
 0x1f1   :  { %5312 = vrot.lane.b32.xlu0 %v7816_v63, %s5743_s26  ;;  %3818 = vmatprep.subr.bf16.mxu0 %v3817_v32  ;;  %v3457_v63 = vld [vmem:[%s8643_s1 + $0x220] sm:$0xff]  ;;  %v5366_v32 = vpack.i.bf16 %v5674_v13, %v5673_v51 }
 0x1f2   :  { %v2368_v4 = vsel %vm2357_vm6, %v5025_v15, %v5019_v46  ;;  %v2366_v3 = vsel %vm2357_vm6, %v5024_v28, %v5014_v39  ;;  %v5038_v49 = vpop.permute.xlu1 %5037  ;;  %v5675_v28 = vld [vmem:[%s8642_s0 + $0x50] sm:$0xff] }
 0x1f3   :  { %v5040_v57 = vunpack.i.h.bf16 %v5038_v49  ;;  %v5039_v23 = vunpack.i.l.bf16 %v5038_v49  ;;  %v5033_v31 = vpop.permute.xlu0 %5032  ;;  %v3819_v2 = vpack.c.bf16 %v2368_v4, %v2366_v3  ;;  %2170 = vmatmul.mubr.f32.gmra.mrb[6].mxu0 %v3455_v60  ;;  %v5676_v60 = vld [vmem:[%s8642_s0 + $0x58] sm:$0xff] }
 0x1f4   :  { %v5035_v55 = vunpack.i.h.bf16 %v5033_v31  ;;  %v5034_v59 = vunpack.i.l.bf16 %v5033_v31  ;;  %5327 = vrot.lane.b32.xlu1 %v7833_v7, %s5743_s26  ;;  %3465 = vmatprep.mubr.msk.f32.mxu0 %vm421_vm0, %v3458_v11  ;;  %v2371_v7 = vsel %vm2357_vm6, %v5029_v47, %v5030_v50  ;;  %v5361_v11 = vpack.i.bf16 %v5676_v60, %v5675_v28  ;;  %v5691_v60 = vld [vmem:[%s8642_s0 + $0xd0] sm:$0xff] }
 0x1f5   :  { %v2370_v22 = vsel %vm2357_vm6, %v5039_v23, %v5029_v47  ;;  %5322 = vrot.lane.b32.xlu0 %v7851_v62, %s5743_s26  ;;  %3820 = vmatpush1.bf16.msra.mxu0 %v3819_v2 }
 0x1f6   :  { %v2372_v43 = vsel %vm2357_vm6, %v5040_v57, %v5034_v59  ;;  %v5048_v9 = vpop.permute.xlu1 %5047  ;;  %v2373_v14 = vsel %vm2357_vm6, %v5034_v59, %v5035_v55 }
 0x1f7   :  { %v3823_v35 = vpack.c.bf16 %v2372_v43, %v2370_v22  ;;  %v5050_v37 = vunpack.i.h.bf16 %v5048_v9  ;;  %v5049_v26 = vunpack.i.l.bf16 %v5048_v9  ;;  %v5043_v25 = vpop.permute.xlu0 %5042  ;;  %v3821_v45 = vpack.c.bf16 %v2373_v14, %v2371_v7  ;;  %2176 = vmatmul.mubr.f32.gmra.mrb[8].mxu0 %v3457_v63  ;;  %v5677_v63 = vld [vmem:[%s8642_s0 + $0x80] sm:$0xff]  ;;  %v5678_v22 = vld [vmem:[%s8642_s0 + $0x88] sm:$0xff]  ;;  %v5679_v43 = vld [vmem:[%s8642_s0 + $0x70] sm:$0xff] }
 0x1f8   :  { %v5045_v10 = vunpack.i.h.bf16 %v5043_v25  ;;  %v5044_v62 = vunpack.i.l.bf16 %v5043_v25  ;;  %5337 = vrot.lane.b32.xlu1 %v7868_v29, %s5743_s26  ;;  %3466 = vmatprep.mubr.msk.f32.mxu0 %vm421_vm0, %v3460_v34  ;;  %v5667_v29 = vld [vmem:[%s8642_s0 + $0x8] sm:$0xff]  ;;  %v5376_v34 = vpack.i.bf16 %v5678_v22, %v5677_v63  ;;  %v5695_v63 = vld [vmem:[%s8642_s0 + $0xd8] sm:$0xff]  ;;  %v5696_v22 = vld [vmem:[%s8642_s0 + $0xc0] sm:$0xff] }
 0x1f9   :  { %5332 = vrot.lane.b32.xlu0 %v7882_v41, %s5743_s26  ;;  %3822 = vmatprep.subr.bf16.mxu0 %v3821_v45  ;;  %v5341_v6 = vpack.i.bf16 %v5668_v56, %v5667_v29  ;;  %v2377_v58 = vsel %vm2357_vm6, %v5049_v26, %v5050_v37  ;;  %s5744_s26 = smov 94   ;;  %v5680_v9 = vld [vmem:[%s8642_s0 + $0x68] sm:$0xff] }
 0x1fa   :  { %3824 = vmatpush1.bf16.msra.mxu0 %v3823_v35  ;;  %v5058_v16 = vpop.permute.xlu1 %5057  ;;  %v2375_v41 = vsel %vm2357_vm6, %v5044_v62, %v5045_v10  ;;  %v5371_v7 = vpack.i.bf16 %v5679_v43, %v5680_v9 }
 0x1fb   :  { %v5053_v52 = vpop.permute.xlu0 %5052  ;;  %v3825_v1 = vpack.c.bf16 %v2377_v58, %v2375_v41  ;;  %2182 = vmatmul.mubr.f32.gmra.mrb[10].mxu0 %v3459_v53  ;;  %v5060_v21 = vunpack.i.h.bf16 %v5058_v16  ;;  %v5059_v46 = vunpack.i.l.bf16 %v5058_v16  ;;  %v5684_v53 = vld [vmem:[%s8642_s0 + $0x60] sm:$0xff] }
 0x1fc   :  { %v5055_v20 = vunpack.i.h.bf16 %v5053_v52  ;;  %v5054_v61 = vunpack.i.l.bf16 %v5053_v52  ;;  %5347 = vrot.lane.b32.xlu1 %v5346_v33, %s5744_s26  ;;  %3479 = vmatprep.mubr.msk.f32.mxu0 %vm421_vm0, %v3468_v27  ;;  %v5683_v33 = vld [vmem:[%s8642_s0 + $0x78] sm:$0xff] }
 0x1fd   :  { %5342 = vrot.lane.b32.xlu0 %v5341_v6, %s5744_s26  ;;  %3826 = vmatprep.subr.bf16.mxu0 %v3825_v1  ;;  %v2379_v4 = vsel %vm2357_vm6, %v5059_v46, %v5060_v21  ;;  %v5381_v29 = vpack.i.bf16 %v5683_v33, %v5684_v53  ;;  %v5688_v21 = vld [vmem:[%s8642_s0 + $0xb8] sm:$0xff] }
 0x1fe   :  { %v2376_v8 = vsel %vm2357_vm6, %v5055_v20, %v5049_v26  ;;  %v2374_v24 = vsel %vm2357_vm6, %v5054_v61, %v5044_v62  ;;  %v5068_v17 = vpop.permute.xlu1 %5067  ;;  %v5681_v62 = vld [vmem:[%s8642_s0 + $0x98] sm:$0xff] }
 0x1ff   :  { %v3827_v36 = vpack.c.bf16 %v2376_v8, %v2374_v24  ;;  %v5070_v39 = vunpack.i.h.bf16 %v5068_v17  ;;  %v5069_v0 = vunpack.i.l.bf16 %v5068_v17  ;;  %v5063_v18 = vpop.permute.xlu0 %5062  ;;  %v5386_v12 = vpack.i.bf16 %v5682_v5, %v5681_v62  ;;  %v5697_v5 = vld [vmem:[%s8642_s0 + $0xf0] sm:$0xff] }
 0x200   :  { %v5065_v19 = vunpack.i.h.bf16 %v5063_v18  ;;  %v5064_v48 = vunpack.i.l.bf16 %v5063_v18  ;;  %5357 = vrot.lane.b32.xlu1 %v5356_v44, %s5744_s26  ;;  %v5686_v44 = vld [vmem:[%s8642_s0 + $0xa8] sm:$0xff] }
 0x201   :  { %v2378_v15 = vsel %vm2357_vm6, %v5069_v0, %v5059_v46  ;;  %5352 = vrot.lane.b32.xlu0 %v5351_v40, %s5744_s26  ;;  %3828 = vmatpush1.bf16.msra.mxu0 %v3827_v36  ;;  %v5396_v38 = vpack.i.bf16 %v5686_v44, %v5685_v42  ;;  %v5687_v40 = vld [vmem:[%s8642_s0 + $0xb0] sm:$0xff] }
 0x202   :  { %v2380_v50 = vsel %vm2357_vm6, %v5070_v39, %v5064_v48  ;;  %v5078_v47 = vpop.permute.xlu1 %5077  ;;  %v2381_v3 = vsel %vm2357_vm6, %v5064_v48, %v5065_v19  ;;  %v5391_v46 = vpack.i.bf16 %v5688_v21, %v5687_v40  ;;  %v5703_v21 = vld [vmem:[%s8642_s0 + $0x130] sm:$0xff] }
 0x203   :  { %v3831_v49 = vpack.c.bf16 %v2380_v50, %v2378_v15  ;;  %v5080_v57 = vunpack.i.h.bf16 %v5078_v47  ;;  %v5079_v23 = vunpack.i.l.bf16 %v5078_v47  ;;  %v5073_v31 = vpop.permute.xlu0 %5072  ;;  %v3829_v2 = vpack.c.bf16 %v2381_v3, %v2379_v4  ;;  %v5690_v15 = vld [vmem:[%s8642_s0 + $0xe8] sm:$0xff] }
 0x204   :  { %v5075_v55 = vunpack.i.h.bf16 %v5073_v31  ;;  %v5074_v59 = vunpack.i.l.bf16 %v5073_v31  ;;  %5367 = vrot.lane.b32.xlu1 %v5366_v32, %s5744_s26  ;;  %v5689_v32 = vld [vmem:[%s8642_s0 + $0xe0] sm:$0xff] }
 0x205   :  { %5362 = vrot.lane.b32.xlu0 %v5361_v11, %s5744_s26  ;;  %3830 = vmatprep.subr.bf16.mxu0 %v3829_v2  ;;  %v2385_v14 = vsel %vm2357_vm6, %v5079_v23, %v5080_v57  ;;  %v5406_v28 = vpack.i.bf16 %v5690_v15, %v5689_v32  ;;  %v5692_v11 = vld [vmem:[%s8642_s0 + $0xc8] sm:$0xff]  ;;  %v5693_v2 = vld [vmem:[%s8642_s0 + $0xf8] sm:$0xff]  ;;  %v5708_v15 = vld [vmem:[%s8642_s0 + $0x120] sm:$0xff] }
 0x206   :  { %3832 = vmatpush1.bf16.msra.mxu0 %v3831_v49  ;;  %v5088_v35 = vpop.permute.xlu1 %5087  ;;  %v2383_v37 = vsel %vm2357_vm6, %v5074_v59, %v5075_v55  ;;  %v5401_v50 = vpack.i.bf16 %v5691_v60, %v5692_v11  ;;  %v5694_v55 = vld [vmem:[%s8642_s0 + $0x100] sm:$0xff]  ;;  %v5707_v32 = vld [vmem:[%s8642_s0 + $0x138] sm:$0xff] }
 0x207   :  { %v5083_v26 = vpop.permute.xlu0 %5082  ;;  %v3833_v25 = vpack.c.bf16 %v2385_v14, %v2383_v37  ;;  %v5090_v56 = vunpack.i.h.bf16 %v5088_v35  ;;  %v5089_v6 = vunpack.i.l.bf16 %v5088_v35 }
 0x208   :  { %v5085_v45 = vunpack.i.h.bf16 %v5083_v26  ;;  %v5084_v10 = vunpack.i.l.bf16 %v5083_v26  ;;  %5377 = vrot.lane.b32.xlu1 %v5376_v34, %s5744_s26  ;;  %v5411_v34 = vpack.i.bf16 %v5695_v63, %v5696_v22 }
 0x209   :  { %5372 = vrot.lane.b32.xlu0 %v5371_v7, %s5744_s26  ;;  %3834 = vmatprep.subr.bf16.mxu0 %v3833_v25  ;;  %v2387_v17 = vsel %vm2357_vm6, %v5089_v6, %v5090_v56  ;;  %v5700_v56 = vld [vmem:[%s8642_s0 + $0x118] sm:$0xff] }
 0x20a   :  { %v2384_v58 = vsel %vm2357_vm6, %v5085_v45, %v5079_v23  ;;  %v2382_v27 = vsel %vm2357_vm6, %v5084_v10, %v5074_v59  ;;  %v5098_v16 = vpop.permute.xlu1 %5097  ;;  %v5416_v59 = vpack.i.bf16 %v5694_v55, %v5693_v2  ;;  %v5709_v55 = vld [vmem:[%s8642_s0 + $0x150] sm:$0xff] }
 0x20b   :  { %v3835_v41 = vpack.c.bf16 %v2384_v58, %v2382_v27  ;;  %v5100_v52 = vunpack.i.h.bf16 %v5098_v16  ;;  %v5099_v1 = vunpack.i.l.bf16 %v5098_v16  ;;  %v5093_v20 = vpop.permute.xlu0 %5092 }
 0x20c   :  { %v5095_v61 = vunpack.i.h.bf16 %v5093_v20  ;;  %v5094_v54 = vunpack.i.l.bf16 %v5093_v20  ;;  %5387 = vrot.lane.b32.xlu1 %v5386_v12, %s5744_s26  ;;  %v5698_v12 = vld [vmem:[%s8642_s0 + $0x108] sm:$0xff] }
 0x20d   :  { %v2386_v30 = vsel %vm2357_vm6, %v5099_v1, %v5089_v6  ;;  %5382 = vrot.lane.b32.xlu0 %v5381_v29, %s5744_s26  ;;  %3836 = vmatpush1.bf16.msra.mxu0 %v3835_v41  ;;  %v5426_v33 = vpack.i.bf16 %v5698_v12, %v5697_v5  ;;  %v5699_v29 = vld [vmem:[%s8642_s0 + $0x110] sm:$0xff] }
 0x20e   :  { %v2388_v8 = vsel %vm2357_vm6, %v5100_v52, %v5094_v54  ;;  %v5108_v24 = vpop.permute.xlu1 %5107  ;;  %v2389_v36 = vsel %vm2357_vm6, %v5094_v54, %v5095_v61  ;;  %v5421_v6 = vpack.i.bf16 %v5700_v56, %v5699_v29  ;;  %v5715_v56 = vld [vmem:[%s8642_s0 + $0x190] sm:$0xff] }
 0x20f   :  { %v3839_v39 = vpack.c.bf16 %v2388_v8, %v2386_v30  ;;  %v5110_v0 = vunpack.i.h.bf16 %v5108_v24  ;;  %v5109_v18 = vunpack.i.l.bf16 %v5108_v24  ;;  %v5103_v19 = vpop.permute.xlu0 %5102  ;;  %v3837_v48 = vpack.c.bf16 %v2389_v36, %v2387_v17  ;;  %v5702_v30 = vld [vmem:[%s8642_s0 + $0x148] sm:$0xff] }
 0x210   :  { %v5105_v51 = vunpack.i.h.bf16 %v5103_v19  ;;  %v5104_v13 = vunpack.i.l.bf16 %v5103_v19  ;;  %5397 = vrot.lane.b32.xlu1 %v5396_v38, %s5744_s26  ;;  %v5701_v38 = vld [vmem:[%s8642_s0 + $0x140] sm:$0xff] }
 0x211   :  { %5392 = vrot.lane.b32.xlu0 %v5391_v46, %s5744_s26  ;;  %3838 = vmatprep.subr.bf16.mxu0 %v3837_v48  ;;  %v2393_v47 = vsel %vm2357_vm6, %v5109_v18, %v5110_v0  ;;  %v5436_v40 = vpack.i.bf16 %v5702_v30, %v5701_v38  ;;  %v5704_v46 = vld [vmem:[%s8642_s0 + $0x128] sm:$0xff]  ;;  %v5705_v48 = vld [vmem:[%s8642_s0 + $0x158] sm:$0xff] }
 0x212   :  { %3840 = vmatpush1.bf16.msra.mxu0 %v3839_v39  ;;  %v5118_v4 = vpop.permute.xlu1 %5117  ;;  %v2391_v3 = vsel %vm2357_vm6, %v5104_v13, %v5105_v51  ;;  %v5431_v8 = vpack.i.bf16 %v5703_v21, %v5704_v46  ;;  %v5706_v51 = vld [vmem:[%s8642_s0 + $0x160] sm:$0xff]  ;;  %v3470_v30 = vld [vmem:[%s8643_s1 + $0x258] sm:$0xff] }
 0x213   :  { %v5113_v49 = vpop.permute.xlu0 %5112  ;;  %v3841_v57 = vpack.c.bf16 %v2393_v47, %v2391_v3  ;;  %v5120_v43 = vunpack.i.h.bf16 %v5118_v4  ;;  %v5119_v9 = vunpack.i.l.bf16 %v5118_v4  ;;  %v5720_v21 = vld [vmem:[%s8642_s0 + $0x180] sm:$0xff] }
 0x214   :  { %v5115_v23 = vunpack.i.h.bf16 %v5113_v49  ;;  %v5114_v31 = vunpack.i.l.bf16 %v5113_v49  ;;  %5407 = vrot.lane.b32.xlu1 %v5406_v28, %s5744_s26  ;;  %v5441_v28 = vpack.i.bf16 %v5707_v32, %v5708_v15  ;;  %v5721_v15 = vld [vmem:[%s8642_s0 + $0x1b0] sm:$0xff] }
 0x215   :  { %5402 = vrot.lane.b32.xlu0 %v5401_v50, %s5744_s26  ;;  %3842 = vmatprep.subr.bf16.mxu0 %v3841_v57  ;;  %v2395_v16 = vsel %vm2357_vm6, %v5119_v9, %v5120_v43  ;;  %v5712_v43 = vld [vmem:[%s8642_s0 + $0x178] sm:$0xff] }
 0x216   :  { %v2392_v7 = vsel %vm2357_vm6, %v5115_v23, %v5109_v18  ;;  %v2390_v14 = vsel %vm2357_vm6, %v5114_v31, %v5104_v13  ;;  %v5128_v35 = vpop.permute.xlu1 %5127  ;;  %v5446_v13 = vpack.i.bf16 %v5706_v51, %v5705_v48  ;;  %v3469_v51 = vld [vmem:[%s8643_s1 + $0x250] sm:$0xff] }
 0x217   :  { %v3843_v37 = vpack.c.bf16 %v2392_v7, %v2390_v14  ;;  %v5130_v26 = vunpack.i.h.bf16 %v5128_v35  ;;  %v5129_v25 = vunpack.i.l.bf16 %v5128_v35  ;;  %v5123_v45 = vpop.permute.xlu0 %5122 }
 0x218   :  { %v5125_v10 = vunpack.i.h.bf16 %v5123_v45  ;;  %v5124_v62 = vunpack.i.l.bf16 %v5123_v45  ;;  %5417 = vrot.lane.b32.xlu1 %v5416_v59, %s5744_s26  ;;  %v5710_v59 = vld [vmem:[%s8642_s0 + $0x168] sm:$0xff] }
 0x219   :  { %v2394_v53 = vsel %vm2357_vm6, %v5129_v25, %v5119_v9  ;;  %5412 = vrot.lane.b32.xlu0 %v5411_v34, %s5744_s26  ;;  %3844 = vmatpush1.bf16.msra.mxu0 %v3843_v37  ;;  %v5456_v63 = vpack.i.bf16 %v5710_v59, %v5709_v55  ;;  %v5711_v34 = vld [vmem:[%s8642_s0 + $0x170] sm:$0xff] }
 0x21a   :  { %v2396_v58 = vsel %vm2357_vm6, %v5130_v26, %v5124_v62  ;;  %v5138_v27 = vpop.permute.xlu1 %5137  ;;  %v2397_v41 = vsel %vm2357_vm6, %v5124_v62, %v5125_v10  ;;  %v5451_v9 = vpack.i.bf16 %v5712_v43, %v5711_v34 }
 0x21b   :  { %v3847_v52 = vpack.c.bf16 %v2396_v58, %v2394_v53  ;;  %v5140_v1 = vunpack.i.h.bf16 %v5138_v27  ;;  %v5139_v20 = vunpack.i.l.bf16 %v5138_v27  ;;  %v5133_v61 = vpop.permute.xlu0 %5132  ;;  %v3845_v54 = vpack.c.bf16 %v2397_v41, %v2395_v16  ;;  %v5714_v53 = vld [vmem:[%s8642_s0 + $0x1a8] sm:$0xff] }
 0x21c   :  { %v5135_v42 = vunpack.i.h.bf16 %v5133_v61  ;;  %v5134_v44 = vunpack.i.l.bf16 %v5133_v61  ;;  %5427 = vrot.lane.b32.xlu1 %v5426_v33, %s5744_s26  ;;  %v5713_v33 = vld [vmem:[%s8642_s0 + $0x1a0] sm:$0xff] }
 0x21d   :  { %5422 = vrot.lane.b32.xlu0 %v5421_v6, %s5744_s26  ;;  %3846 = vmatprep.subr.bf16.mxu0 %v3845_v54  ;;  %v2401_v24 = vsel %vm2357_vm6, %v5139_v20, %v5140_v1  ;;  %v5466_v29 = vpack.i.bf16 %v5714_v53, %v5713_v33  ;;  %v5716_v6 = vld [vmem:[%s8642_s0 + $0x188] sm:$0xff] }
 0x21e   :  { %3848 = vmatpush1.bf16.msra.mxu0 %v3847_v52  ;;  %v5148_v17 = vpop.permute.xlu1 %5147  ;;  %v2399_v36 = vsel %vm2357_vm6, %v5134_v44, %v5135_v42  ;;  %v5461_v58 = vpack.i.bf16 %v5715_v56, %v5716_v6  ;;  %v5717_v42 = vld [vmem:[%s8642_s0 + $0x1b8] sm:$0xff]  ;;  %v5730_v6 = vld [vmem:[%s8642_s0 + $0x220] sm:$0xff] }
 0x21f   :  { %v5143_v39 = vpop.permute.xlu0 %5142  ;;  %v3849_v0 = vpack.c.bf16 %v2401_v24, %v2399_v36  ;;  %v5150_v60 = vunpack.i.h.bf16 %v5148_v17  ;;  %v5149_v11 = vunpack.i.l.bf16 %v5148_v17  ;;  %v5729_v56 = vld [vmem:[%s8642_s0 + $0x218] sm:$0xff] }
 0x220   :  { %v5145_v18 = vunpack.i.h.bf16 %v5143_v39  ;;  %v5144_v19 = vunpack.i.l.bf16 %v5143_v39  ;;  %5437 = vrot.lane.b32.xlu1 %v5436_v40, %s5744_s26  ;;  %v5719_v40 = vld [vmem:[%s8642_s0 + $0x198] sm:$0xff] }
 0x221   :  { %5432 = vrot.lane.b32.xlu0 %v5431_v8, %s5744_s26  ;;  %3850 = vmatprep.subr.bf16.mxu0 %v3849_v0  ;;  %v2403_v35 = vsel %vm2357_vm6, %v5149_v11, %v5150_v60  ;;  %v5471_v46 = vpack.i.bf16 %v5719_v40, %v5720_v21 }
 0x222   :  { %v2400_v50 = vsel %vm2357_vm6, %v5145_v18, %v5139_v20  ;;  %v2398_v47 = vsel %vm2357_vm6, %v5144_v19, %v5134_v44  ;;  %v5158_v4 = vpop.permute.xlu1 %5157  ;;  %v3467_v20 = vld [vmem:[%s8643_s1 + $0x240] sm:$0xff] }
 0x223   :  { %v3851_v3 = vpack.c.bf16 %v2400_v50, %v2398_v47  ;;  %v5160_v49 = vunpack.i.h.bf16 %v5158_v4  ;;  %v5159_v57 = vunpack.i.l.bf16 %v5158_v4  ;;  %v5153_v23 = vpop.permute.xlu0 %5152  ;;  %v5718_v44 = vld [vmem:[%s8642_s0 + $0x1c0] sm:$0xff]  ;;  %v5723_v47 = vld [vmem:[%s8642_s0 + $0x1d0] sm:$0xff]  ;;  %v5724_v4 = vld [vmem:[%s8642_s0 + $0x1d8] sm:$0xff] }
 0x224   :  { %v5155_v31 = vunpack.i.h.bf16 %v5153_v23  ;;  %v5154_v2 = vunpack.i.l.bf16 %v5153_v23  ;;  %5447 = vrot.lane.b32.xlu1 %v5446_v13, %s5744_s26  ;;  %v5476_v38 = vpack.i.bf16 %v5718_v44, %v5717_v42 }
 0x225   :  { %v2402_v22 = vsel %vm2357_vm6, %v5159_v57, %v5149_v11  ;;  %5442 = vrot.lane.b32.xlu0 %v5441_v28, %s5744_s26  ;;  %3852 = vmatpush1.bf16.msra.mxu0 %v3851_v3  ;;  %v5722_v28 = vld [vmem:[%s8642_s0 + $0x1c8] sm:$0xff]  ;;  %v5481_v3 = vpack.i.bf16 %v5724_v4, %v5723_v47 }
 0x226   :  { %v2404_v7 = vsel %vm2357_vm6, %v5160_v49, %v5154_v2  ;;  %v5168_v14 = vpop.permute.xlu1 %5167  ;;  %v2405_v37 = vsel %vm2357_vm6, %v5154_v2, %v5155_v31  ;;  %v5486_v60 = vpack.i.bf16 %v5722_v28, %v5721_v15  ;;  %v3472_v11 = vld [vmem:[%s8643_s1 + $0x268] sm:$0xff] }
 0x227   :  { %v3855_v26 = vpack.c.bf16 %v2404_v7, %v2402_v22  ;;  %v5170_v25 = vunpack.i.h.bf16 %v5168_v14  ;;  %v5169_v45 = vunpack.i.l.bf16 %v5168_v14  ;;  %v5163_v10 = vpop.permute.xlu0 %5162  ;;  %v3853_v62 = vpack.c.bf16 %v2405_v37, %v2403_v35  ;;  %v5726_v7 = vld [vmem:[%s8642_s0 + $0x208] sm:$0xff]  ;;  %v3471_v35 = vld [vmem:[%s8643_s1 + $0x260] sm:$0xff]  ;;  %v5727_v37 = vld [vmem:[%s8642_s0 + $0x1f0] sm:$0xff] }
 0x228   :  { %v5165_v5 = vunpack.i.h.bf16 %v5163_v10  ;;  %v5164_v12 = vunpack.i.l.bf16 %v5163_v10  ;;  %5457 = vrot.lane.b32.xlu1 %v5456_v63, %s5744_s26  ;;  %v3474_v10 = vld [vmem:[%s8643_s1 + $0x278] sm:$0xff] }
 0x229   :  { %5452 = vrot.lane.b32.xlu0 %v5451_v9, %s5744_s26  ;;  %3854 = vmatprep.subr.bf16.mxu0 %v3853_v62  ;;  %v2746_v27 = vsel %vm2742_vm7, %v5169_v45, %v5170_v25  ;;  %v5725_v9 = vld [vmem:[%s8642_s0 + $0x200] sm:$0xff] }
 0x22a   :  { %3856 = vmatpush1.bf16.msra.mxu0 %v3855_v26  ;;  %v5178_v16 = vpop.permute.xlu1 %5177  ;;  %v2744_v41 = vsel %vm2742_vm7, %v5164_v12, %v5165_v5  ;;  %v5496_v14 = vpack.i.bf16 %v5726_v7, %v5725_v9  ;;  %v5728_v26 = vld [vmem:[%s8642_s0 + $0x1e8] sm:$0xff] }
 0x22b   :  { %v5173_v52 = vpop.permute.xlu0 %5172  ;;  %v3857_v1 = vpack.c.bf16 %v2746_v27, %v2744_v41  ;;  %v5180_v8 = vunpack.i.h.bf16 %v5178_v16  ;;  %v5179_v24 = vunpack.i.l.bf16 %v5178_v16  ;;  %v5491_v25 = vpack.i.bf16 %v5727_v37, %v5728_v26  ;;  %v3473_v27 = vld [vmem:[%s8643_s1 + $0x270] sm:$0xff]  ;;  %v5731_v16 = vld [vmem:[%s8642_s0 + $0x1f8] sm:$0xff]  ;;  %v5732_v41 = vld [vmem:[%s8642_s0 + $0x1e0] sm:$0xff] }
 0x22c   :  { %v5175_v61 = vunpack.i.h.bf16 %v5173_v52  ;;  %v5174_v54 = vunpack.i.l.bf16 %v5173_v52  ;;  %5467 = vrot.lane.b32.xlu1 %v5466_v29, %s5744_s26  ;;  %v5501_v52 = vpack.i.bf16 %v5731_v16, %v5732_v41 }
 0x22d   :  { %5462 = vrot.lane.b32.xlu0 %v5461_v58, %s5744_s26  ;;  %3858 = vmatprep.subr.bf16.mxu0 %v3857_v1  ;;  %v2748_v23 = vsel %vm2742_vm7, %v5179_v24, %v5180_v8  ;;  %v5506_v58 = vpack.i.bf16 %v5730_v6, %v5729_v56  ;;  %v3476_v1 = vld [vmem:[%s8643_s1 + $0x288] sm:$0xff] }
 0x22e   :  { %v2745_v17 = vsel %vm2742_vm7, %v5175_v61, %v5169_v45  ;;  %v2743_v36 = vsel %vm2742_vm7, %v5174_v54, %v5164_v12  ;;  %v5188_v39 = vpop.permute.xlu1 %5187  ;;  %2537 = vmatmul.mubr.f32.vlgmr.msra.gmra.mrb[0].mxu0 %v3467_v20 }
 0x22f   :  { %v3859_v0 = vpack.c.bf16 %v2745_v17, %v2743_v36  ;;  %v5190_v18 = vunpack.i.h.bf16 %v5188_v39  ;;  %v5189_v19 = vunpack.i.l.bf16 %v5188_v39  ;;  %v5183_v48 = vpop.permute.xlu0 %5182  ;;  %3480 = vmatprep.mubr.msk.f32.mxu0 %vm421_vm0, %v3470_v30  ;;  %v5733_v17 = vld [vmem:[%s8642_s0 + $0x210] sm:$0xff]  ;;  %v5734_v36 = vld [vmem:[%s8642_s0 + $0x228] sm:$0xff] }
 0x230   :  { %v5185_v13 = vunpack.i.h.bf16 %v5183_v48  ;;  %v5184_v32 = vunpack.i.l.bf16 %v5183_v48  ;;  %5477 = vrot.lane.b32.xlu1 %v5476_v38, %s5744_s26  ;;  %v3510_v38 = vld [vmem:[%s8643_s1 + $0x338] sm:$0xff]  ;;  %v5516_v39 = vpack.i.bf16 %v5734_v36, %v5733_v17 }
 0x231   :  { %v2747_v50 = vsel %vm2742_vm7, %v5189_v19, %v5179_v24  ;;  %5472 = vrot.lane.b32.xlu0 %v5471_v46, %s5744_s26  ;;  %3860 = vmatpush1.bf16.msra.mxu0 %v3859_v0  ;;  %v3475_v0 = vld [vmem:[%s8643_s1 + $0x280] sm:$0xff]  ;;  %v5735_v19 = vld [vmem:[%s8642_s0 + $0x230] sm:$0xff]  ;;  %v5736_v48 = vld [vmem:[%s8642_s0 + $0x238] sm:$0xff] }
 0x232   :  { %v2749_v49 = vsel %vm2742_vm7, %v5190_v18, %v5184_v32  ;;  %v5198_v57 = vpop.permute.xlu1 %5197  ;;  %v2750_v31 = vsel %vm2742_vm7, %v5184_v32, %v5185_v13  ;;  %2543 = vmatmul.mubr.f32.gmra.mrb[2].mxu0 %v3469_v51  ;;  %3518 = vmatprep.mubr.msk.f32.mxu1 %vm421_vm0, %v3510_v38  ;;  %v5511_v51 = vpack.i.bf16 %v5736_v48, %v5735_v19  ;;  %v3478_v13 = vld [vmem:[%s8643_s1 + $0x298] sm:$0xff] }
 0x233   :  { %v3863_v2 = vpack.c.bf16 %v2749_v49, %v2747_v50  ;;  %v5200_v55 = vunpack.i.h.bf16 %v5198_v57  ;;  %v5199_v59 = vunpack.i.l.bf16 %v5198_v57  ;;  %v5193_v63 = vpop.permute.xlu0 %5192  ;;  %v3861_v22 = vpack.c.bf16 %v2750_v31, %v2748_v23  ;;  %3481 = vmatprep.mubr.msk.f32.mxu0 %vm421_vm0, %v3472_v11  ;;  %v3477_v23 = vld [vmem:[%s8643_s1 + $0x290] sm:$0xff] }
 0x234   :  { %v5195_v34 = vunpack.i.h.bf16 %v5193_v63  ;;  %v5194_v43 = vunpack.i.l.bf16 %v5193_v63  ;;  %5487 = vrot.lane.b32.xlu1 %v5486_v60, %s5744_s26 }
 0x235   :  { %5482 = vrot.lane.b32.xlu0 %v5481_v3, %s5744_s26  ;;  %3862 = vmatprep.subr.bf16.mxu0 %v3861_v22  ;;  %v2754_v45 = vsel %vm2742_vm7, %v5199_v59, %v5200_v55 }
 0x236   :  { %3864 = vmatpush1.bf16.msra.mxu0 %v3863_v2  ;;  %v5208_v62 = vpop.permute.xlu1 %5207  ;;  %v2752_v5 = vsel %vm2742_vm7, %v5194_v43, %v5195_v34  ;;  %v3486_v2 = vld [vmem:[%s8643_s1 + $0x2a8] sm:$0xff] }
 0x237   :  { %v5203_v12 = vpop.permute.xlu0 %5202  ;;  %v3865_v33 = vpack.c.bf16 %v2754_v45, %v2752_v5  ;;  %2549 = vmatmul.mubr.f32.gmra.mrb[4].mxu0 %v3471_v35  ;;  %v5210_v20 = vunpack.i.h.bf16 %v5208_v62  ;;  %v5209_v61 = vunpack.i.l.bf16 %v5208_v62 }
 0x238   :  { %v5205_v53 = vunpack.i.h.bf16 %v5203_v12  ;;  %v5204_v29 = vunpack.i.l.bf16 %v5203_v12  ;;  %5497 = vrot.lane.b32.xlu1 %v5496_v14, %s5744_s26  ;;  %3482 = vmatprep.mubr.msk.f32.mxu0 %vm421_vm0, %v3474_v10 }
 0x239   :  { %5492 = vrot.lane.b32.xlu0 %v5491_v25, %s5744_s26  ;;  %3866 = vmatprep.subr.bf16.mxu0 %v3865_v33  ;;  %v2756_v28 = vsel %vm2742_vm7, %v5209_v61, %v5210_v20 }
 0x23a   :  { %v2753_v54 = vsel %vm2742_vm7, %v5205_v53, %v5199_v59  ;;  %v2751_v42 = vsel %vm2742_vm7, %v5204_v29, %v5194_v43  ;;  %v5218_v44 = vpop.permute.xlu1 %5217 }
 0x23b   :  { %v3867_v30 = vpack.c.bf16 %v2753_v54, %v2751_v42  ;;  %v5220_v40 = vunpack.i.h.bf16 %v5218_v44  ;;  %v5219_v21 = vunpack.i.l.bf16 %v5218_v44  ;;  %v5213_v46 = vpop.permute.xlu0 %5212  ;;  %2555 = vmatmul.mubr.f32.gmra.mrb[6].mxu0 %v3473_v27 }
 0x23c   :  { %v5215_v8 = vunpack.i.h.bf16 %v5213_v46  ;;  %v5214_v24 = vunpack.i.l.bf16 %v5213_v46  ;;  %5507 = vrot.lane.b32.xlu1 %v5506_v58, %s5744_s26  ;;  %3483 = vmatprep.mubr.msk.f32.mxu0 %vm421_vm0, %v3476_v1 }
 0x23d   :  { %v2755_v18 = vsel %vm2742_vm7, %v5219_v21, %v5209_v61  ;;  %5502 = vrot.lane.b32.xlu0 %v5501_v52, %s5744_s26  ;;  %3868 = vmatpush1.bf16.msra.mxu0 %v3867_v30 }
 0x23e   :  { %v2757_v32 = vsel %vm2742_vm7, %v5220_v40, %v5214_v24  ;;  %v5228_v15 = vpop.permute.xlu1 %5227  ;;  %v2758_v60 = vsel %vm2742_vm7, %v5214_v24, %v5215_v8 }
 0x23f   :  { %v3871_v11 = vpack.c.bf16 %v2757_v32, %v2755_v18  ;;  %v5230_v50 = vunpack.i.h.bf16 %v5228_v15  ;;  %v5229_v47 = vunpack.i.l.bf16 %v5228_v15  ;;  %v5223_v4 = vpop.permute.xlu0 %5222  ;;  %v3869_v3 = vpack.c.bf16 %v2758_v60, %v2756_v28  ;;  %2561 = vmatmul.mubr.f32.gmra.mrb[8].mxu0 %v3475_v0 }
 0x240   :  { %v5225_v49 = vunpack.i.h.bf16 %v5223_v4  ;;  %v5224_v57 = vunpack.i.l.bf16 %v5223_v4  ;;  %5517 = vrot.lane.b32.xlu1 %v5516_v39, %s5744_s26  ;;  %3484 = vmatprep.mubr.msk.f32.mxu0 %vm421_vm0, %v3478_v13 }
 0x241   :  { %5512 = vrot.lane.b32.xlu0 %v5511_v51, %s5744_s26  ;;  %3870 = vmatprep.subr.bf16.mxu0 %v3869_v3  ;;  %v2762_v31 = vsel %vm2742_vm7, %v5229_v47, %v5230_v50 }
 0x242   :  { %3872 = vmatpush1.bf16.msra.mxu0 %v3871_v11  ;;  %v5238_v55 = vpop.permute.xlu1 %5237  ;;  %v2760_v59 = vsel %vm2742_vm7, %v5224_v57, %v5225_v49 }
 0x243   :  { %v5233_v63 = vpop.permute.xlu0 %5232  ;;  %v3873_v22 = vpack.c.bf16 %v2762_v31, %v2760_v59  ;;  %2567 = vmatmul.mubr.f32.gmra.mrb[10].mxu0 %v3477_v23  ;;  %v5240_v9 = vunpack.i.h.bf16 %v5238_v55  ;;  %v5239_v7 = vunpack.i.l.bf16 %v5238_v55 }
 0x244   :  { %v5235_v34 = vunpack.i.h.bf16 %v5233_v63  ;;  %v5234_v43 = vunpack.i.l.bf16 %v5233_v63  ;;  %3497 = vmatprep.mubr.msk.f32.mxu0 %vm421_vm0, %v3486_v2 }
 0x245   :  { %3874 = vmatprep.subr.bf16.mxu0 %v3873_v22  ;;  %v2764_v29 = vsel %vm2742_vm7, %v5239_v7, %v5240_v9 }
 0x246   :  { %v2761_v14 = vsel %vm2742_vm7, %v5235_v34, %v5229_v47  ;;  %v2759_v35 = vsel %vm2742_vm7, %v5234_v43, %v5224_v57  ;;  %v5248_v37 = vpop.permute.xlu1 %5247 }
 0x247   :  { %v3875_v26 = vpack.c.bf16 %v2761_v14, %v2759_v35  ;;  %v5250_v25 = vunpack.i.h.bf16 %v5248_v37  ;;  %v5249_v45 = vunpack.i.l.bf16 %v5248_v37  ;;  %v5243_v10 = vpop.permute.xlu0 %5242 }
 0x248   :  { %v5245_v62 = vunpack.i.h.bf16 %v5243_v10  ;;  %v5244_v5 = vunpack.i.l.bf16 %v5243_v10 }
 0x249   :  { %v2763_v12 = vsel %vm2742_vm7, %v5249_v45, %v5239_v7  ;;  %3876 = vmatpush1.bf16.msra.mxu0 %v3875_v26 }
 0x24a   :  { %v2765_v33 = vsel %vm2742_vm7, %v5250_v25, %v5244_v5  ;;  %v5258_v53 = vpop.permute.xlu1 %5257  ;;  %v2766_v56 = vsel %vm2742_vm7, %v5244_v5, %v5245_v62 }
 0x24b   :  { %v3879_v6 = vpack.c.bf16 %v2765_v33, %v2763_v12  ;;  %v5260_v58 = vunpack.i.h.bf16 %v5258_v53  ;;  %v5259_v27 = vunpack.i.l.bf16 %v5258_v53  ;;  %v5253_v16 = vpop.permute.xlu0 %5252  ;;  %v3877_v41 = vpack.c.bf16 %v2766_v56, %v2764_v29 }
 0x24c   :  { %v5255_v52 = vunpack.i.h.bf16 %v5253_v16  ;;  %v5254_v1 = vunpack.i.l.bf16 %v5253_v16 }
 0x24d   :  { %3878 = vmatprep.subr.bf16.mxu0 %v3877_v41  ;;  %v2770_v20 = vsel %vm2742_vm7, %v5259_v27, %v5260_v58 }
 0x24e   :  { %3880 = vmatpush1.bf16.msra.mxu0 %v3879_v6  ;;  %v5268_v61 = vpop.permute.xlu1 %5267  ;;  %v2768_v54 = vsel %vm2742_vm7, %v5254_v1, %v5255_v52  ;;  %v8424_v40 = vpop.f32.mrb[0].mxu1 }
 0x24f   :  { %v5263_v42 = vpop.permute.xlu0 %5262  ;;  %v3881_v44 = vpack.c.bf16 %v2770_v20, %v2768_v54  ;;  %v5270_v21 = vunpack.i.h.bf16 %v5268_v61  ;;  %v5269_v46 = vunpack.i.l.bf16 %v5268_v61  ;;  %v8428_v36 = vpop.f32.mrb[1].mxu1 }
 0x250   :  { %v5265_v38 = vunpack.i.h.bf16 %v5263_v42  ;;  %v5264_v30 = vunpack.i.l.bf16 %v5263_v42 }
 0x251   :  { %3882 = vmatprep.subr.bf16.mxu0 %v3881_v44  ;;  %v2772_v28 = vsel %vm2742_vm7, %v5269_v46, %v5270_v21 }
 0x252   :  { %v2769_v8 = vsel %vm2742_vm7, %v5265_v38, %v5259_v27  ;;  %v2767_v24 = vsel %vm2742_vm7, %v5264_v30, %v5254_v1  ;;  %v5278_v17 = vpop.permute.xlu1 %5277 }
 0x253   :  { %v3883_v39 = vpack.c.bf16 %v2769_v8, %v2767_v24  ;;  %v5280_v0 = vunpack.i.h.bf16 %v5278_v17  ;;  %v5279_v18 = vunpack.i.l.bf16 %v5278_v17  ;;  %v5273_v19 = vpop.permute.xlu0 %5272 }
 0x254   :  { %v5275_v48 = vunpack.i.h.bf16 %v5273_v19  ;;  %v5274_v51 = vunpack.i.l.bf16 %v5273_v19 }
 0x255   :  { %v2771_v13 = vsel %vm2742_vm7, %v5279_v18, %v5269_v46  ;;  %3884 = vmatpush1.bf16.msra.mxu0 %v3883_v39 }
 0x256   :  { %v2773_v32 = vsel %vm2742_vm7, %v5280_v0, %v5274_v51  ;;  %v5288_v15 = vpop.permute.xlu1 %5287  ;;  %v2774_v60 = vsel %vm2742_vm7, %v5274_v51, %v5275_v48 }
 0x257   :  { %v3887_v11 = vpack.c.bf16 %v2773_v32, %v2771_v13  ;;  %v5290_v50 = vunpack.i.h.bf16 %v5288_v15  ;;  %v5289_v47 = vunpack.i.l.bf16 %v5288_v15  ;;  %v5283_v4 = vpop.permute.xlu0 %5282  ;;  %v3885_v3 = vpack.c.bf16 %v2774_v60, %v2772_v28 }
 0x258   :  { %v5285_v49 = vunpack.i.h.bf16 %v5283_v4  ;;  %v5284_v57 = vunpack.i.l.bf16 %v5283_v4 }
 0x259   :  { %3886 = vmatprep.subr.bf16.mxu0 %v3885_v3  ;;  %v2778_v23 = vsel %vm2742_vm7, %v5289_v47, %v5290_v50 }
 0x25a   :  { %3888 = vmatpush1.bf16.msra.mxu0 %v3887_v11  ;;  %v5298_v31 = vpop.permute.xlu1 %5297  ;;  %v2776_v2 = vsel %vm2742_vm7, %v5284_v57, %v5285_v49 }
 0x25b   :  { %v5293_v55 = vpop.permute.xlu0 %5292  ;;  %v3889_v59 = vpack.c.bf16 %v2778_v23, %v2776_v2  ;;  %v5300_v34 = vunpack.i.h.bf16 %v5298_v31  ;;  %v5299_v43 = vunpack.i.l.bf16 %v5298_v31 }
 0x25c   :  { %v5295_v63 = vunpack.i.h.bf16 %v5293_v55  ;;  %v5294_v22 = vunpack.i.l.bf16 %v5293_v55  ;;  %v3485_v55 = vld [vmem:[%s8643_s1 + $0x2a0] sm:$0xff] }
 0x25d   :  { %3890 = vmatprep.subr.bf16.mxu0 %v3889_v59  ;;  %v2780_v33 = vsel %vm2742_vm7, %v5299_v43, %v5300_v34 }
 0x25e   :  { %v2777_v9 = vsel %vm2742_vm7, %v5295_v63, %v5289_v47  ;;  %v2775_v7 = vsel %vm2742_vm7, %v5294_v22, %v5284_v57  ;;  %v5308_v14 = vpop.permute.xlu1 %5307 }
 0x25f   :  { %v3891_v35 = vpack.c.bf16 %v2777_v9, %v2775_v7  ;;  %v5310_v37 = vunpack.i.h.bf16 %v5308_v14  ;;  %v5309_v26 = vunpack.i.l.bf16 %v5308_v14  ;;  %v5303_v25 = vpop.permute.xlu0 %5302 }
 0x260   :  { %v5305_v45 = vunpack.i.h.bf16 %v5303_v25  ;;  %v5304_v10 = vunpack.i.l.bf16 %v5303_v25 }
 0x261   :  { %v2779_v62 = vsel %vm2742_vm7, %v5309_v26, %v5299_v43  ;;  %3892 = vmatpush1.bf16.msra.mxu0 %v3891_v35  ;;  %v3488_v43 = vld [vmem:[%s8643_s1 + $0x2b8] sm:$0xff] }
 0x262   :  { %v2781_v5 = vsel %vm2742_vm7, %v5310_v37, %v5304_v10  ;;  %v5318_v12 = vpop.permute.xlu1 %5317  ;;  %v2782_v53 = vsel %vm2742_vm7, %v5304_v10, %v5305_v45  ;;  %v3487_v10 = vld [vmem:[%s8643_s1 + $0x2b0] sm:$0xff] }
 0x263   :  { %v3895_v29 = vpack.c.bf16 %v2781_v5, %v2779_v62  ;;  %v5320_v56 = vunpack.i.h.bf16 %v5318_v12  ;;  %v5319_v6 = vunpack.i.l.bf16 %v5318_v12  ;;  %v5313_v58 = vpop.permute.xlu0 %5312  ;;  %v3893_v27 = vpack.c.bf16 %v2782_v53, %v2780_v33 }
 0x264   :  { %v5315_v16 = vunpack.i.h.bf16 %v5313_v58  ;;  %v5314_v41 = vunpack.i.l.bf16 %v5313_v58 }
 0x265   :  { %3894 = vmatprep.subr.bf16.mxu0 %v3893_v27  ;;  %v2786_v52 = vsel %vm2742_vm7, %v5319_v6, %v5320_v56 }
 0x266   :  { %3896 = vmatpush1.bf16.msra.mxu0 %v3895_v29  ;;  %v5328_v1 = vpop.permute.xlu1 %5327  ;;  %v2784_v20 = vsel %vm2742_vm7, %v5314_v41, %v5315_v16  ;;  %v8447_v51 = vpop.f32.mrb[2].mxu1  ;;  %v3490_v29 = vld [vmem:[%s8643_s1 + $0x2c8] sm:$0xff] }
 0x267   :  { %v5323_v61 = vpop.permute.xlu0 %5322  ;;  %v3897_v54 = vpack.c.bf16 %v2786_v52, %v2784_v20  ;;  %v5330_v38 = vunpack.i.h.bf16 %v5328_v1  ;;  %v5329_v30 = vunpack.i.l.bf16 %v5328_v1  ;;  %v8452_v60 = vpop.f32.mrb[3].mxu1 }
 0x268   :  { %v5325_v42 = vunpack.i.h.bf16 %v5323_v61  ;;  %v5324_v44 = vunpack.i.l.bf16 %v5323_v61 }
 0x269   :  { %3898 = vmatprep.subr.bf16.mxu0 %v3897_v54  ;;  %v2788_v15 = vsel %vm2742_vm7, %v5329_v30, %v5330_v38 }
 0x26a   :  { %v2785_v21 = vsel %vm2742_vm7, %v5325_v42, %v5319_v6  ;;  %v2783_v46 = vsel %vm2742_vm7, %v5324_v44, %v5314_v41  ;;  %v5338_v8 = vpop.permute.xlu1 %5337  ;;  %v8455_v31 = vpop.f32.mrb[4].mxu1  ;;  %v3489_v41 = vld [vmem:[%s8643_s1 + $0x2c0] sm:$0xff] }
 0x26b   :  { %v3899_v24 = vpack.c.bf16 %v2785_v21, %v2783_v46  ;;  %v5340_v17 = vunpack.i.h.bf16 %v5338_v8  ;;  %v5339_v39 = vunpack.i.l.bf16 %v5338_v8  ;;  %v5333_v0 = vpop.permute.xlu0 %5332  ;;  %v8461_v63 = vpop.f32.mrb[5].mxu1  ;;  %v3492_v8 = vld [vmem:[%s8643_s1 + $0x2d8] sm:$0xff] }
 0x26c   :  { %v5335_v18 = vunpack.i.h.bf16 %v5333_v0  ;;  %v5334_v19 = vunpack.i.l.bf16 %v5333_v0 }
 0x26d   :  { %v2787_v48 = vsel %vm2742_vm7, %v5339_v39, %v5329_v30  ;;  %3900 = vmatpush1.bf16.msra.mxu0 %v3899_v24  ;;  %v3491_v39 = vld [vmem:[%s8643_s1 + $0x2d0] sm:$0xff] }
 0x26e   :  { %v2789_v13 = vsel %vm2742_vm7, %v5340_v17, %v5334_v19  ;;  %v5348_v32 = vpop.permute.xlu1 %5347  ;;  %v2790_v28 = vsel %vm2742_vm7, %v5334_v19, %v5335_v18  ;;  %v8466_v14 = vpop.f32.mrb[6].mxu1 }
 0x26f   :  { %v3903_v11 = vpack.c.bf16 %v2789_v13, %v2787_v48  ;;  %v5350_v50 = vunpack.i.h.bf16 %v5348_v32  ;;  %v5349_v47 = vunpack.i.l.bf16 %v5348_v32  ;;  %v5343_v4 = vpop.permute.xlu0 %5342  ;;  %v3901_v3 = vpack.c.bf16 %v2790_v28, %v2788_v15  ;;  %v8474_v62 = vpop.f32.mrb[7].mxu1  ;;  %v3494_v13 = vld [vmem:[%s8643_s1 + $0x2e8] sm:$0xff] }
 0x270   :  { %v5345_v49 = vunpack.i.h.bf16 %v5343_v4  ;;  %v5344_v57 = vunpack.i.l.bf16 %v5343_v4 }
 0x271   :  { %3902 = vmatprep.subr.bf16.mxu0 %v3901_v3  ;;  %v3131_v23 = vsel %vm3127_vm8, %v5349_v47, %v5350_v50 }
 0x272   :  { %3904 = vmatpush1.bf16.msra.mxu0 %v3903_v11  ;;  %v5358_v2 = vpop.permute.xlu1 %5357  ;;  %v3129_v59 = vsel %vm3127_vm8, %v5344_v57, %v5345_v49  ;;  %v3493_v49 = vld [vmem:[%s8643_s1 + $0x2e0] sm:$0xff] }
 0x273   :  { %v5353_v22 = vpop.permute.xlu0 %5352  ;;  %v3905_v34 = vpack.c.bf16 %v3131_v23, %v3129_v59  ;;  %v5360_v35 = vunpack.i.h.bf16 %v5358_v2  ;;  %v5359_v37 = vunpack.i.l.bf16 %v5358_v2  ;;  %v8487_v20 = vpop.f32.mrb[8].mxu1  ;;  %v3496_v59 = vld [vmem:[%s8643_s1 + $0x2f8] sm:$0xff] }
 0x274   :  { %v5355_v9 = vunpack.i.h.bf16 %v5353_v22  ;;  %v5354_v7 = vunpack.i.l.bf16 %v5353_v22  ;;  %v8489_v30 = vpop.f32.mrb[9].mxu1 }
 0x275   :  { %2922 = vmatmul.mubr.f32.vlgmr.msra.gmra.mrb[0].mxu0 %v3485_v55  ;;  %3906 = vmatprep.subr.bf16.mxu0 %v3905_v34  ;;  %v3133_v52 = vsel %vm3127_vm8, %v5359_v37, %v5360_v35  ;;  %v3495_v35 = vld [vmem:[%s8643_s1 + $0x2f0] sm:$0xff] }
 0x276   :  { %v3130_v26 = vsel %vm3127_vm8, %v5355_v9, %v5349_v47  ;;  %v3128_v25 = vsel %vm3127_vm8, %v5354_v7, %v5344_v57  ;;  %3953 = vmatprep.subr.bf16.mxu1 %v3905_v34  ;;  %v5368_v45 = vpop.permute.xlu1 %5367  ;;  %3498 = vmatprep.mubr.msk.f32.mxu0 %vm421_vm0, %v3488_v43 }
 0x277   :  { %v3907_v5 = vpack.c.bf16 %v3130_v26, %v3128_v25  ;;  %v5370_v12 = vunpack.i.h.bf16 %v5368_v45  ;;  %v5369_v33 = vunpack.i.l.bf16 %v5368_v45  ;;  %v5363_v53 = vpop.permute.xlu0 %5362 }
 0x278   :  { %v5365_v56 = vunpack.i.h.bf16 %v5363_v53  ;;  %v5364_v6 = vunpack.i.l.bf16 %v5363_v53 }
 0x279   :  { %v3132_v58 = vsel %vm3127_vm8, %v5369_v33, %v5359_v37  ;;  %2928 = vmatmul.mubr.f32.gmra.mrb[2].mxu0 %v3487_v10  ;;  %3965 = vmatpush1.bf16.msra.mxu1 %v3907_v5 }
 0x27a   :  { %v3134_v27 = vsel %vm3127_vm8, %v5370_v12, %v5364_v6  ;;  %3908 = vmatpush1.bf16.msra.mxu0 %v3907_v5  ;;  %v5378_v16 = vpop.permute.xlu1 %5377  ;;  %3499 = vmatprep.mubr.msk.f32.mxu0 %vm421_vm0, %v3490_v29  ;;  %v3135_v1 = vsel %vm3127_vm8, %v5364_v6, %v5365_v56  ;;  %v8499_v18 = vpop.f32.mrb[10].mxu1  ;;  %v3504_v29 = vld [vmem:[%s8643_s1 + $0x308] sm:$0xff] }
 0x27b   :  { %v3911_v61 = vpack.c.bf16 %v3134_v27, %v3132_v58  ;;  %v5380_v54 = vunpack.i.h.bf16 %v5378_v16  ;;  %v5379_v42 = vunpack.i.l.bf16 %v5378_v16  ;;  %v5373_v44 = vpop.permute.xlu0 %5372  ;;  %v3909_v38 = vpack.c.bf16 %v3135_v1, %v3133_v52  ;;  %v8505_v32 = vpop.f32.mrb[11].mxu1 }
 0x27c   :  { %v5375_v21 = vunpack.i.h.bf16 %v5373_v44  ;;  %v5374_v46 = vunpack.i.l.bf16 %v5373_v44 }
 0x27d   :  { %2934 = vmatmul.mubr.f32.gmra.mrb[4].mxu0 %v3489_v41  ;;  %3910 = vmatprep.subr.bf16.mxu0 %v3909_v38  ;;  %v3139_v24 = vsel %vm3127_vm8, %v5379_v42, %v5380_v54 }
 0x27e   :  { %3954 = vmatprep.subr.bf16.mxu1 %v3909_v38  ;;  %3912 = vmatpush1.bf16.msra.mxu0 %v3911_v61  ;;  %v5388_v17 = vpop.permute.xlu1 %5387  ;;  %v3137_v0 = vsel %vm3127_vm8, %v5374_v46, %v5375_v21 }
 0x27f   :  { %3966 = vmatpush1.bf16.msra.mxu1 %v3911_v61  ;;  %v5383_v19 = vpop.permute.xlu0 %5382  ;;  %3500 = vmatprep.mubr.msk.f32.mxu0 %vm421_vm0, %v3492_v8  ;;  %v3913_v48 = vpack.c.bf16 %v3139_v24, %v3137_v0  ;;  %v5390_v11 = vunpack.i.h.bf16 %v5388_v17  ;;  %v5389_v50 = vunpack.i.l.bf16 %v5388_v17 }
 0x280   :  { %v5385_v15 = vunpack.i.h.bf16 %v5383_v19  ;;  %v5384_v28 = vunpack.i.l.bf16 %v5383_v19 }
 0x281   :  { %2940 = vmatmul.mubr.f32.gmra.mrb[6].mxu0 %v3491_v39  ;;  %3914 = vmatprep.subr.bf16.mxu0 %v3913_v48  ;;  %v3141_v37 = vsel %vm3127_vm8, %v5389_v50, %v5390_v11 }
 0x282   :  { %v3138_v47 = vsel %vm3127_vm8, %v5385_v15, %v5379_v42  ;;  %v3136_v4 = vsel %vm3127_vm8, %v5384_v28, %v5374_v46  ;;  %3955 = vmatprep.subr.bf16.mxu1 %v3913_v48  ;;  %v5398_v3 = vpop.permute.xlu1 %5397  ;;  %3501 = vmatprep.mubr.msk.f32.mxu0 %vm421_vm0, %v3494_v13 }
 0x283   :  { %v3915_v57 = vpack.c.bf16 %v3138_v47, %v3136_v4  ;;  %v5400_v23 = vunpack.i.h.bf16 %v5398_v3  ;;  %v5399_v2 = vunpack.i.l.bf16 %v5398_v3  ;;  %v5393_v55 = vpop.permute.xlu0 %5392 }
 0x284   :  { %v5395_v22 = vunpack.i.h.bf16 %v5393_v55  ;;  %v5394_v34 = vunpack.i.l.bf16 %v5393_v55 }
 0x285   :  { %v3140_v43 = vsel %vm3127_vm8, %v5399_v2, %v5389_v50  ;;  %2946 = vmatmul.mubr.f32.gmra.mrb[8].mxu0 %v3493_v49  ;;  %3967 = vmatpush1.bf16.msra.mxu1 %v3915_v57 }
 0x286   :  { %v3142_v9 = vsel %vm3127_vm8, %v5400_v23, %v5394_v34  ;;  %3916 = vmatpush1.bf16.msra.mxu0 %v3915_v57  ;;  %v5408_v7 = vpop.permute.xlu1 %5407  ;;  %3502 = vmatprep.mubr.msk.f32.mxu0 %vm421_vm0, %v3496_v59  ;;  %v3143_v26 = vsel %vm3127_vm8, %v5394_v34, %v5395_v22 }
 0x287   :  { %v3919_v25 = vpack.c.bf16 %v3142_v9, %v3140_v43  ;;  %v5410_v45 = vunpack.i.h.bf16 %v5408_v7  ;;  %v5409_v10 = vunpack.i.l.bf16 %v5408_v7  ;;  %v5403_v5 = vpop.permute.xlu0 %5402  ;;  %v3917_v12 = vpack.c.bf16 %v3143_v26, %v3141_v37 }
 0x288   :  { %v5405_v33 = vunpack.i.h.bf16 %v5403_v5  ;;  %v5404_v53 = vunpack.i.l.bf16 %v5403_v5 }
 0x289   :  { %2952 = vmatmul.mubr.f32.gmra.mrb[10].mxu0 %v3495_v35  ;;  %3918 = vmatprep.subr.bf16.mxu0 %v3917_v12  ;;  %v3147_v56 = vsel %vm3127_vm8, %v5409_v10, %v5410_v45 }
 0x28a   :  { %3956 = vmatprep.subr.bf16.mxu1 %v3917_v12  ;;  %3920 = vmatpush1.bf16.msra.mxu0 %v3919_v25  ;;  %v5418_v6 = vpop.permute.xlu1 %5417  ;;  %v3145_v58 = vsel %vm3127_vm8, %v5404_v53, %v5405_v33 }
 0x28b   :  { %3968 = vmatpush1.bf16.msra.mxu1 %v3919_v25  ;;  %v5413_v27 = vpop.permute.xlu0 %5412  ;;  %v3921_v16 = vpack.c.bf16 %v3147_v56, %v3145_v58  ;;  %3515 = vmatprep.mubr.msk.f32.mxu0 %vm421_vm0, %v3504_v29  ;;  %v5420_v1 = vunpack.i.h.bf16 %v5418_v6  ;;  %v5419_v61 = vunpack.i.l.bf16 %v5418_v6 }
 0x28c   :  { %v5415_v41 = vunpack.i.h.bf16 %v5413_v27  ;;  %v5414_v52 = vunpack.i.l.bf16 %v5413_v27 }
 0x28d   :  { %3922 = vmatprep.subr.bf16.mxu0 %v3921_v16  ;;  %3957 = vmatprep.subr.bf16.mxu1 %v3921_v16  ;;  %v3149_v48 = vsel %vm3127_vm8, %v5419_v61, %v5420_v1 }
 0x28e   :  { %v3146_v54 = vsel %vm3127_vm8, %v5415_v41, %v5409_v10  ;;  %v3144_v42 = vsel %vm3127_vm8, %v5414_v52, %v5404_v53  ;;  %v5428_v44 = vpop.permute.xlu1 %5427 }
 0x28f   :  { %v3923_v38 = vpack.c.bf16 %v3146_v54, %v3144_v42  ;;  %v5430_v21 = vunpack.i.h.bf16 %v5428_v44  ;;  %v5429_v46 = vunpack.i.l.bf16 %v5428_v44  ;;  %v5423_v8 = vpop.permute.xlu0 %5422 }
 0x290   :  { %v5425_v24 = vunpack.i.h.bf16 %v5423_v8  ;;  %v5424_v17 = vunpack.i.l.bf16 %v5423_v8 }
 0x291   :  { %v3148_v39 = vsel %vm3127_vm8, %v5429_v46, %v5419_v61  ;;  %3924 = vmatpush1.bf16.msra.mxu0 %v3923_v38  ;;  %3969 = vmatpush1.bf16.msra.mxu1 %v3923_v38 }
 0x292   :  { %v3150_v0 = vsel %vm3127_vm8, %v5430_v21, %v5424_v17  ;;  %v5438_v19 = vpop.permute.xlu1 %5437  ;;  %v3151_v13 = vsel %vm3127_vm8, %v5424_v17, %v5425_v24 }
 0x293   :  { %v3927_v15 = vpack.c.bf16 %v3150_v0, %v3148_v39  ;;  %v5440_v28 = vunpack.i.h.bf16 %v5438_v19  ;;  %v5439_v11 = vunpack.i.l.bf16 %v5438_v19  ;;  %v5433_v50 = vpop.permute.xlu0 %5432  ;;  %v3925_v47 = vpack.c.bf16 %v3151_v13, %v3149_v48 }
 0x294   :  { %v5435_v4 = vunpack.i.h.bf16 %v5433_v50  ;;  %v5434_v3 = vunpack.i.l.bf16 %v5433_v50 }
 0x295   :  { %3926 = vmatprep.subr.bf16.mxu0 %v3925_v47  ;;  %3958 = vmatprep.subr.bf16.mxu1 %v3925_v47  ;;  %v3155_v49 = vsel %vm3127_vm8, %v5439_v11, %v5440_v28 }
 0x296   :  { %3928 = vmatpush1.bf16.msra.mxu0 %v3927_v15  ;;  %3970 = vmatpush1.bf16.msra.mxu1 %v3927_v15  ;;  %v5448_v57 = vpop.permute.xlu1 %5447  ;;  %v3153_v23 = vsel %vm3127_vm8, %v5434_v3, %v5435_v4 }
 0x297   :  { %v5443_v2 = vpop.permute.xlu0 %5442  ;;  %v3929_v55 = vpack.c.bf16 %v3155_v49, %v3153_v23  ;;  %v5450_v34 = vunpack.i.h.bf16 %v5448_v57  ;;  %v5449_v43 = vunpack.i.l.bf16 %v5448_v57 }
 0x298   :  { %v5445_v59 = vunpack.i.h.bf16 %v5443_v2  ;;  %v5444_v22 = vunpack.i.l.bf16 %v5443_v2 }
 0x299   :  { %3930 = vmatprep.subr.bf16.mxu0 %v3929_v55  ;;  %3959 = vmatprep.subr.bf16.mxu1 %v3929_v55  ;;  %v3157_v29 = vsel %vm3127_vm8, %v5449_v43, %v5450_v34 }
 0x29a   :  { %v3154_v9 = vsel %vm3127_vm8, %v5445_v59, %v5439_v11  ;;  %v3152_v7 = vsel %vm3127_vm8, %v5444_v22, %v5434_v3  ;;  %v5458_v35 = vpop.permute.xlu1 %5457 }
 0x29b   :  { %v3931_v37 = vpack.c.bf16 %v3154_v9, %v3152_v7  ;;  %v5460_v26 = vunpack.i.h.bf16 %v5458_v35  ;;  %v5459_v25 = vunpack.i.l.bf16 %v5458_v35  ;;  %v5453_v45 = vpop.permute.xlu0 %5452 }
 0x29c   :  { %v5455_v10 = vunpack.i.h.bf16 %v5453_v45  ;;  %v5454_v5 = vunpack.i.l.bf16 %v5453_v45 }
 0x29d   :  { %v3156_v12 = vsel %vm3127_vm8, %v5459_v25, %v5449_v43  ;;  %3932 = vmatpush1.bf16.msra.mxu0 %v3931_v37  ;;  %3971 = vmatpush1.bf16.msra.mxu1 %v3931_v37 }
 0x29e   :  { %v3158_v33 = vsel %vm3127_vm8, %v5460_v26, %v5454_v5  ;;  %v5468_v53 = vpop.permute.xlu1 %5467  ;;  %v3159_v56 = vsel %vm3127_vm8, %v5454_v5, %v5455_v10 }
 0x29f   :  { %v3935_v6 = vpack.c.bf16 %v3158_v33, %v3156_v12  ;;  %v5470_v58 = vunpack.i.h.bf16 %v5468_v53  ;;  %v5469_v27 = vunpack.i.l.bf16 %v5468_v53  ;;  %v5463_v16 = vpop.permute.xlu0 %5462  ;;  %v3933_v41 = vpack.c.bf16 %v3159_v56, %v3157_v29 }
 0x2a0   :  { %v5465_v52 = vunpack.i.h.bf16 %v5463_v16  ;;  %v5464_v1 = vunpack.i.l.bf16 %v5463_v16 }
 0x2a1   :  { %3934 = vmatprep.subr.bf16.mxu0 %v3933_v41  ;;  %3960 = vmatprep.subr.bf16.mxu1 %v3933_v41  ;;  %v3163_v61 = vsel %vm3127_vm8, %v5469_v27, %v5470_v58 }
 0x2a2   :  { %3936 = vmatpush1.bf16.msra.mxu0 %v3935_v6  ;;  %3972 = vmatpush1.bf16.msra.mxu1 %v3935_v6  ;;  %v5478_v54 = vpop.permute.xlu1 %5477  ;;  %v3161_v42 = vsel %vm3127_vm8, %v5464_v1, %v5465_v52 }
 0x2a3   :  { %v5473_v44 = vpop.permute.xlu0 %5472  ;;  %v3937_v38 = vpack.c.bf16 %v3163_v61, %v3161_v42  ;;  %v5480_v8 = vunpack.i.h.bf16 %v5478_v54  ;;  %v5479_v24 = vunpack.i.l.bf16 %v5478_v54  ;;  %v3503_v42 = vld [vmem:[%s8643_s1 + $0x300] sm:$0xff] }
 0x2a4   :  { %v5475_v21 = vunpack.i.h.bf16 %v5473_v44  ;;  %v5474_v46 = vunpack.i.l.bf16 %v5473_v44  ;;  %v3509_v44 = vld [vmem:[%s8643_s1 + $0x330] sm:$0xff] }
 0x2a5   :  { %3938 = vmatprep.subr.bf16.mxu0 %v3937_v38  ;;  %3961 = vmatprep.subr.bf16.mxu1 %v3937_v38  ;;  %v3165_v3 = vsel %vm3127_vm8, %v5479_v24, %v5480_v8  ;;  %v3506_v38 = vld [vmem:[%s8643_s1 + $0x318] sm:$0xff]  ;;  %v3511_v8 = vld [vmem:[%s8643_s1 + $0x340] sm:$0xff] }
 0x2a6   :  { %v3162_v17 = vsel %vm3127_vm8, %v5475_v21, %v5469_v27  ;;  %v3160_v39 = vsel %vm3127_vm8, %v5474_v46, %v5464_v1  ;;  %v5488_v0 = vpop.permute.xlu1 %5487  ;;  %v3512_v21 = vld [vmem:[%s8643_s1 + $0x348] sm:$0xff]  ;;  %v3505_v46 = vld [vmem:[%s8643_s1 + $0x310] sm:$0xff] }
 0x2a7   :  { %v3939_v19 = vpack.c.bf16 %v3162_v17, %v3160_v39  ;;  %v5490_v48 = vunpack.i.h.bf16 %v5488_v0  ;;  %v5489_v13 = vunpack.i.l.bf16 %v5488_v0  ;;  %v5483_v15 = vpop.permute.xlu0 %5482  ;;  %v3514_v17 = vld [vmem:[%s8643_s1 + $0x358] sm:$0xff]  ;;  %v3507_v39 = vld [vmem:[%s8643_s1 + $0x320] sm:$0xff]  ;;  %v3513_v0 = vld [vmem:[%s8643_s1 + $0x350] sm:$0xff] }
 0x2a8   :  { %v5485_v28 = vunpack.i.h.bf16 %v5483_v15  ;;  %v5484_v11 = vunpack.i.l.bf16 %v5483_v15 }
 0x2a9   :  { %v3164_v50 = vsel %vm3127_vm8, %v5489_v13, %v5479_v24  ;;  %3940 = vmatpush1.bf16.msra.mxu0 %v3939_v19  ;;  %3973 = vmatpush1.bf16.msra.mxu1 %v3939_v19  ;;  %v3508_v24 = vld [vmem:[%s8643_s1 + $0x328] sm:$0xff] }
 0x2aa   :  { %v3166_v47 = vsel %vm3127_vm8, %v5490_v48, %v5484_v11  ;;  %v5498_v4 = vpop.permute.xlu1 %5497  ;;  %v3167_v49 = vsel %vm3127_vm8, %v5484_v11, %v5485_v28 }
 0x2ab   :  { %v3943_v57 = vpack.c.bf16 %v3166_v47, %v3164_v50  ;;  %v5500_v23 = vunpack.i.h.bf16 %v5498_v4  ;;  %v5499_v2 = vunpack.i.l.bf16 %v5498_v4  ;;  %v5493_v55 = vpop.permute.xlu0 %5492  ;;  %v3941_v59 = vpack.c.bf16 %v3167_v49, %v3165_v3 }
 0x2ac   :  { %v5495_v22 = vunpack.i.h.bf16 %v5493_v55  ;;  %v5494_v34 = vunpack.i.l.bf16 %v5493_v55 }
 0x2ad   :  { %3942 = vmatprep.subr.bf16.mxu0 %v3941_v59  ;;  %3962 = vmatprep.subr.bf16.mxu1 %v3941_v59  ;;  %v3171_v43 = vsel %vm3127_vm8, %v5499_v2, %v5500_v23 }
 0x2ae   :  { %3944 = vmatpush1.bf16.msra.mxu0 %v3943_v57  ;;  %3974 = vmatpush1.bf16.msra.mxu1 %v3943_v57  ;;  %v5508_v9 = vpop.permute.xlu1 %5507  ;;  %v3169_v7 = vsel %vm3127_vm8, %v5494_v34, %v5495_v22 }
 0x2af   :  { %v5503_v35 = vpop.permute.xlu0 %5502  ;;  %v3945_v37 = vpack.c.bf16 %v3171_v43, %v3169_v7  ;;  %v5510_v45 = vunpack.i.h.bf16 %v5508_v9  ;;  %v5509_v10 = vunpack.i.l.bf16 %v5508_v9 }
 0x2b0   :  { %v5505_v26 = vunpack.i.h.bf16 %v5503_v35  ;;  %v5504_v25 = vunpack.i.l.bf16 %v5503_v35 }
 0x2b1   :  { %3946 = vmatprep.subr.bf16.mxu0 %v3945_v37  ;;  %3963 = vmatprep.subr.bf16.mxu1 %v3945_v37  ;;  %v3173_v52 = vsel %vm3127_vm8, %v5509_v10, %v5510_v45 }
 0x2b2   :  { %v3170_v5 = vsel %vm3127_vm8, %v5505_v26, %v5499_v2  ;;  %v3168_v12 = vsel %vm3127_vm8, %v5504_v25, %v5494_v34  ;;  %v5518_v33 = vpop.permute.xlu1 %5517 }
 0x2b3   :  { %v3947_v53 = vpack.c.bf16 %v3170_v5, %v3168_v12  ;;  %v5520_v29 = vunpack.i.h.bf16 %v5518_v33  ;;  %v5519_v56 = vunpack.i.l.bf16 %v5518_v33  ;;  %v5513_v6 = vpop.permute.xlu0 %5512 }
 0x2b4   :  { %v5515_v58 = vunpack.i.h.bf16 %v5513_v6  ;;  %v5514_v27 = vunpack.i.l.bf16 %v5513_v6 }
 0x2b5   :  { %v3172_v16 = vsel %vm3127_vm8, %v5519_v56, %v5509_v10  ;;  %3948 = vmatpush1.bf16.msra.mxu0 %v3947_v53  ;;  %3975 = vmatpush1.bf16.msra.mxu1 %v3947_v53 }
 0x2b6   :  { %v3174_v41 = vsel %vm3127_vm8, %v5520_v29, %v5514_v27  ;;  %v3175_v1 = vsel %vm3127_vm8, %v5514_v27, %v5515_v58 }
 0x2b7   :  { %v3951_v61 = vpack.c.bf16 %v3174_v41, %v3172_v16  ;;  %v3949_v54 = vpack.c.bf16 %v3175_v1, %v3173_v52 }
 0x2b9   :  { %3950 = vmatprep.subr.bf16.mxu0 %v3949_v54  ;;  %3964 = vmatprep.subr.bf16.mxu1 %v3949_v54 }
 0x2ba   :  { %3952 = vmatpush1.bf16.msra.mxu0 %v3951_v61  ;;  %3976 = vmatpush1.bf16.msra.mxu1 %v3951_v61 }
 0x2bd   :  { %3307 = vmatmul.mubr.f32.vlgmr.msra.gmra.mrb[0].mxu0 %v3503_v42  ;;  %3325 = vmatmul.mubr.f32.vlgmr.msra.gmra.mrb[12].mxu1 %v3509_v44 }
 0x2be   :  { %3516 = vmatprep.mubr.msk.f32.mxu0 %vm421_vm0, %v3506_v38  ;;  %3519 = vmatprep.mubr.msk.f32.mxu1 %vm421_vm0, %v3512_v21 }
 0x2c1   :  { %3313 = vmatmul.mubr.f32.gmra.mrb[2].mxu0 %v3505_v46  ;;  %3331 = vmatmul.mubr.f32.gmra.mrb[14].mxu1 %v3511_v8 }
 0x2c2   :  { %3517 = vmatprep.mubr.msk.f32.mxu0 %vm421_vm0, %v3508_v24  ;;  %3520 = vmatprep.mubr.msk.f32.mxu1 %vm421_vm0, %v3514_v17 }
 0x2c5   :  { %3319 = vmatmul.mubr.f32.gmra.mrb[4].mxu0 %v3507_v39  ;;  %3337 = vmatmul.mubr.f32.gmra.mrb[16].mxu1 %v3513_v0 }
 0x354   :  { %v2941_v19 = vpop.f32.mrb[6].mxu0 }
 0x355   :  { %v3983_v48 = vadd.f32 %v2941_v19, %v8466_v14  ;;  %v2943_v13 = vpop.f32.mrb[7].mxu0 }
 0x356   :  { %v3985_v15 = vadd.f32 %v2943_v13, %v8474_v62 }
 0x358   :  { %v2947_v28 = vpop.f32.mrb[8].mxu0 }
 0x359   :  { %v3987_v11 = vadd.f32 %v2947_v28, %v8487_v20  ;;  %v2949_v50 = vpop.f32.mrb[9].mxu0 }
 0x35a   :  { %v3989_v47 = vadd.f32 %v2949_v50, %v8489_v30 }
 0x35c   :  { %v2953_v4 = vpop.f32.mrb[10].mxu0 }
 0x35d   :  { %v3991_v3 = vadd.f32 %v2953_v4, %v8499_v18  ;;  %v2955_v49 = vpop.f32.mrb[11].mxu0 }
 0x35e   :  { %v3993_v57 = vadd.f32 %v2955_v49, %v8505_v32 }
 0x390   :  { %v3308_v23 = vpop.f32.mrb[0].mxu0  ;;  %v3326_v2 = vpop.f32.mrb[12].mxu1 }
 0x391   :  { %v3977_v55 = vadd.f32 %v3308_v23, %v8424_v40  ;;  %v3984_v14 = vadd.f32 %v3983_v48, %v3326_v2  ;;  %v3310_v59 = vpop.f32.mrb[1].mxu0  ;;  %v3328_v22 = vpop.f32.mrb[13].mxu1 }
 0x392   :  { %v3978_v62 = vadd.f32 %v3310_v59, %v8428_v36  ;;  %v3986_v34 = vadd.f32 %v3985_v15, %v3328_v22 }
 0x393   :  { %3355 = vst [vmem:[%s8644_s2] sm:$0xff] %v3977_v55  ;;  %3361 = vst [vmem:[%s8644_s2 + $0x30] sm:$0xff] %v3984_v14 }
 0x394   :  { %3356 = vst [vmem:[%s8644_s2 + $0x8] sm:$0xff] %v3978_v62  ;;  %3362 = vst [vmem:[%s8644_s2 + $0x38] sm:$0xff] %v3986_v34  ;;  %v3314_v40 = vpop.f32.mrb[2].mxu0  ;;  %v3332_v20 = vpop.f32.mrb[14].mxu1 }
 0x395   :  { %v3979_v36 = vadd.f32 %v3314_v40, %v8447_v51  ;;  %v3988_v30 = vadd.f32 %v3987_v11, %v3332_v20  ;;  %v3316_v18 = vpop.f32.mrb[3].mxu0  ;;  %v3334_v32 = vpop.f32.mrb[15].mxu1 }
 0x396   :  { %v3980_v43 = vadd.f32 %v3316_v18, %v8452_v60  ;;  %v3990_v9 = vadd.f32 %v3989_v47, %v3334_v32 }
 0x397   :  { %3357 = vst [vmem:[%s8644_s2 + $0x10] sm:$0xff] %v3979_v36  ;;  %3363 = vst [vmem:[%s8644_s2 + $0x40] sm:$0xff] %v3988_v30 }
 0x398   :  { %3358 = vst [vmem:[%s8644_s2 + $0x18] sm:$0xff] %v3980_v43  ;;  %3364 = vst [vmem:[%s8644_s2 + $0x48] sm:$0xff] %v3990_v9  ;;  %v3320_v51 = vpop.f32.mrb[4].mxu0  ;;  %v3338_v7 = vpop.f32.mrb[16].mxu1 }
 0x399   :  { %v3981_v60 = vadd.f32 %v3320_v51, %v8455_v31  ;;  %v3992_v35 = vadd.f32 %v3991_v3, %v3338_v7  ;;  %v3322_v37 = vpop.f32.mrb[5].mxu0  ;;  %v3340_v26 = vpop.f32.mrb[17].mxu1 }
 0x39a   :  { %v3982_v25 = vadd.f32 %v3322_v37, %v8461_v63  ;;  %v3994_v45 = vadd.f32 %v3993_v57, %v3340_v26 }
 0x39b   :  { %3359 = vst [vmem:[%s8644_s2 + $0x20] sm:$0xff] %v3981_v60  ;;  %3365 = vst [vmem:[%s8644_s2 + $0x50] sm:$0xff] %v3992_v35 }
 0x39c   :  { %3360 = vst [vmem:[%s8644_s2 + $0x28] sm:$0xff] %v3982_v25  ;;  %3366 = vst [vmem:[%s8644_s2 + $0x58] sm:$0xff] %v3994_v45 }

</bundles_post_ra>
